<compile_context>
chip_gen: v6e
topology: v6e:2x2x1
jax: 0.10.0
libtpu: 0.0.40
codegen_flags: <defaults>
</compile_context>

<pallas_src>
import functools
import math

import jax
import jax.numpy as jnp
from jax import lax
from jax.experimental import pallas as pl
from jax.experimental.pallas import tpu as pltpu

KERNEL = 3
EPS = 1e-5  # PyTorch LayerNorm default eps


def _layer_norm(v):
    # LayerNorm over the whole block (matches nn.LayerNorm([C, H, W])).
    # Two-pass (mean-subtracted) statistics for numerical robustness.
    n = float(v.size)
    m = jnp.sum(v) / n
    d = v - m
    var = jnp.sum(d * d) / n
    return d * lax.rsqrt(var + EPS)


def _convlstm_fused_kernel(x_ref, mask_ref, wx_ref, wh_ref,
                           wci_ref, wcf_ref, wco_ref,
                           hseq_ref, clast_ref,
                           h_scr, c_scr, s_scr, xp_scr, hp_scr,
                           *, H, W, hd, Cin, T, Tc):
    """One (batch, T-chunk) grid step.  Layout: channels on sublanes, H*W on lanes."""
    HW = H * W
    K9x = KERNEL * KERNEL * Cin
    K9h = KERNEL * KERNEL * hd
    chunk = pl.program_id(1)

    # init_hidden (zeros) + patch-scratch bias rows, once per batch element.
    @pl.when(chunk == 0)
    def _():
        h_scr[...] = jnp.zeros_like(h_scr)
        c_scr[...] = jnp.zeros_like(c_scr)
        xp_scr[...] = jnp.zeros_like(xp_scr)
        hp_scr[...] = jnp.zeros_like(hp_scr)
        # All-ones rows -> matmul picks up the folded-in conv bias column.
        xp_scr[K9x:K9x + 1, :] = jnp.ones((1, HW), jnp.bfloat16)
        hp_scr[K9h:K9h + 1, :] = jnp.ones((1, HW), jnp.bfloat16)

    masks = mask_ref[...]  # (16, HW) f32; rows 0..8 = 3x3 border-validity masks

    def step(ti, carry):
        t_glob = chunk * Tc + ti

        @pl.when(t_glob < T)
        def _():
            # ---- input_conv: im2col of x built in VMEM (bf16) + fused bias ----
            x_cur = x_ref[ti]                                  # (Cin, HW) f32
            for k in range(KERNEL * KERNEL):
                dy, dx = k // KERNEL - 1, k % KERNEL - 1
                shift = (-(dy * W + dx)) % HW
                rolled = x_cur if shift == 0 else pltpu.roll(x_cur, shift=shift, axis=1)
                tap = rolled if (dy == 0 and dx == 0) else rolled * masks[k:k + 1]
                xp_scr[k * Cin:(k + 1) * Cin, :] = tap.astype(jnp.bfloat16)
            xconv = jnp.dot(wx_ref[...], xp_scr[...],
                            preferred_element_type=jnp.float32)     # (4hd, HW)
            s_scr[...] = _layer_norm(xconv)                          # layer_norm_x

            # ---- rnn_conv: im2col of h built in VMEM (bf16) + fused bias ----
            h_cur = h_scr[...]                                  # (hd, HW) f32
            for k in range(KERNEL * KERNEL):
                dy, dx = k // KERNEL - 1, k % KERNEL - 1
                shift = (-(dy * W + dx)) % HW
                rolled = h_cur if shift == 0 else pltpu.roll(h_cur, shift=shift, axis=1)
                tap = rolled if (dy == 0 and dx == 0) else rolled * masks[k:k + 1]
                hp_scr[k * hd:(k + 1) * hd, :] = tap.astype(jnp.bfloat16)
            hconv = jnp.dot(wh_ref[...], hp_scr[...],
                            preferred_element_type=jnp.float32)     # (4hd, HW)
            s_scr[...] = s_scr[...] + _layer_norm(hconv)             # layer_norm_h

            # ---- gate math (peephole + layer norms); gate slices read lazily ----
            c_cur = c_scr[...]
            p_ci = _layer_norm(wci_ref[...] * c_cur)   # layer_norm_ci(weight_ci(c_cur))
            p_cf = _layer_norm(wcf_ref[...] * c_cur)   # layer_norm_cf(weight_cf(c_cur))
            p_co = _layer_norm(wco_ref[...] * c_cur)   # reference uses c_cur here too

            i = jax.nn.sigmoid(s_scr[0 * hd:1 * hd, :] + p_ci)
            f = jax.nn.sigmoid(s_scr[1 * hd:2 * hd, :] + p_cf)
            g = jnp.tanh(s_scr[2 * hd:3 * hd, :])
            c_next = _layer_norm(f * c_cur + i * g)    # layer_norm_cnext
            o = jax.nn.sigmoid(s_scr[3 * hd:4 * hd, :] + p_co)
            h_next = o * jnp.tanh(c_next)

            h_scr[...] = h_next
            c_scr[...] = c_next
            hseq_ref[ti] = h_next                      # lane-dense (hd, HW) store

            @pl.when(t_glob == T - 1)
            def _():
                clast_ref[...] = c_next                # write only at final step

        return carry

    lax.fori_loop(0, Tc, step, 0)


def init_params(key, input_dim, hidden_dim, H, W):
    k = jax.random.split(key, 7)
    bx = 1.0 / math.sqrt(input_dim * KERNEL * KERNEL)
    bh = 1.0 / math.sqrt(hidden_dim * KERNEL * KERNEL)
    return {
        # input_conv / rnn_conv weights+bias (PyTorch-style uniform init)
        "w_x": jax.random.uniform(k[0], (4 * hidden_dim, input_dim, KERNEL, KERNEL),
                                  minval=-bx, maxval=bx, dtype=jnp.float32),
        "b_x": jax.random.uniform(k[1], (4 * hidden_dim,), minval=-bx, maxval=bx,
                                  dtype=jnp.float32),
        "w_h": jax.random.uniform(k[2], (4 * hidden_dim, hidden_dim, KERNEL, KERNEL),
                                  minval=-bh, maxval=bh, dtype=jnp.float32),
        "b_h": jax.random.uniform(k[3], (4 * hidden_dim,), minval=-bh, maxval=bh,
                                  dtype=jnp.float32),
        # HadamardProduct peephole weights ~ torch.rand
        "w_ci": jax.random.uniform(k[4], (1, hidden_dim, H, W), dtype=jnp.float32),
        "w_cf": jax.random.uniform(k[5], (1, hidden_dim, H, W), dtype=jnp.float32),
        "w_co": jax.random.uniform(k[6], (1, hidden_dim, H, W), dtype=jnp.float32),
        # All six LayerNorms keep PyTorch defaults (weight=1, bias=0).
    }


@functools.partial(jax.jit, static_argnames=("hidden_dim",))
def convlstm_forward(x, params, hidden_dim):
    """x: (B, T, Cin, H, W) -> (layer_outputs (B,1,T,hd,H,W), (h_last, c_last), None)."""
    B, T, Cin, H, W = x.shape
    hd = hidden_dim
    HW = H * W
    K9x = KERNEL * KERNEL * Cin
    K9h = KERNEL * KERNEL * hd

    # ---- T-chunk sizing: double-buffered x-in + hseq-out blocks within a
    #      conservative budget so it is safe on v7x (64 MiB VMEM) as well. ----
    step_bytes = 2 * (Cin * HW * 4) + 2 * (hd * HW * 4)
    Tc = int(max(1, min(T, (12 * 1024 * 1024) // step_bytes)))
    n_chunks = -(-T // Tc)
    T_pad = n_chunks * Tc

    # Lane-dense x: (B, T_pad, Cin, HW) f32 (no 9x im2col expansion in HBM).
    x_lane = x.reshape(B, T, Cin, HW)
    if T_pad != T:
        x_lane = jnp.pad(x_lane, ((0, 0), (0, T_pad - T), (0, 0), (0, 0)))

    # Precomputed 3x3 border-validity masks (rows 0..8), padded to 16 rows.
    lane = jnp.arange(HW, dtype=jnp.int32)
    xpos = lane % W
    ypos = lane // W
    rows = []
    for ky in range(KERNEL):
        for kx in range(KERNEL):
            dy, dx = ky - 1, kx - 1
            valid = ((xpos + dx >= 0) & (xpos + dx < W) &
                     (ypos + dy >= 0) & (ypos + dy < H))
            rows.append(valid.astype(jnp.float32))
    while len(rows) < 16:
        rows.append(jnp.zeros((HW,), jnp.float32))
    masks = jnp.stack(rows, axis=0)                                  # (16, HW)

    # Conv weights as MXU matmul operands with the bias folded in as an extra
    # column (the patch scratch has a matching all-ones row).
    # Column layout: j = (ky*3 + kx) * C + c.
    w_x = jnp.transpose(params["w_x"], (0, 2, 3, 1)).reshape(4 * hd, K9x)
    w_x = jnp.concatenate([w_x, params["b_x"].reshape(4 * hd, 1)],
                          axis=1).astype(jnp.bfloat16)               # (4hd, K9x+1)
    w_h = jnp.transpose(params["w_h"], (0, 2, 3, 1)).reshape(4 * hd, K9h)
    w_h = jnp.concatenate([w_h, params["b_h"].reshape(4 * hd, 1)],
                          axis=1).astype(jnp.bfloat16)               # (4hd, K9h+1)
    w_ci = params["w_ci"][0].reshape(hd, HW)
    w_cf = params["w_cf"][0].reshape(hd, HW)
    w_co = params["w_co"][0].reshape(hd, HW)

    kernel = functools.partial(_convlstm_fused_kernel,
                               H=H, W=W, hd=hd, Cin=Cin, T=T, Tc=Tc)

    wspec = lambda shape: pl.BlockSpec(shape, lambda b, c: (0,) * len(shape))

    hseq, c_last = pl.pallas_call(
        kernel,
        out_shape=(jax.ShapeDtypeStruct((B, T_pad, hd, HW), jnp.float32),
                   jax.ShapeDtypeStruct((B, hd, HW), jnp.float32)),
        grid=(B, n_chunks),
        in_specs=[
            pl.BlockSpec((None, Tc, Cin, HW), lambda b, c: (b, c, 0, 0)),  # x
            wspec((16, HW)),                                               # masks
            wspec((4 * hd, K9x + 1)),                                      # w_x+bias
            wspec((4 * hd, K9h + 1)),                                      # w_h+bias
            wspec((hd, HW)),                                               # w_ci
            wspec((hd, HW)),                                               # w_cf
            wspec((hd, HW)),                                               # w_co
        ],
        out_specs=(
            pl.BlockSpec((None, Tc, hd, HW), lambda b, c: (b, c, 0, 0)),   # h sequence
            pl.BlockSpec((None, hd, HW), lambda b, c: (b, 0, 0)),          # c_last
        ),
        scratch_shapes=[
            pltpu.VMEM((hd, HW), jnp.float32),            # h state
            pltpu.VMEM((hd, HW), jnp.float32),            # c state
            pltpu.VMEM((4 * hd, HW), jnp.float32),        # staged gate pre-activations
            pltpu.VMEM((K9x + 1, HW), jnp.bfloat16),      # x im2col patch (+ones row)
            pltpu.VMEM((K9h + 1, HW), jnp.bfloat16),      # h im2col patch (+ones row)
        ],
        compiler_params=pltpu.CompilerParams(
            dimension_semantics=("parallel", "arbitrary"),
            vmem_limit_bytes=32 * 1024 * 1024),
    )(x_lane, masks, w_x, w_h, w_ci, w_cf, w_co)

    # Channels-first layout inside the kernel == NCHW: only reshapes remain.
    hseq = hseq[:, :T]
    layer_outputs = hseq.reshape(B, T, hd, H, W)[:, None]    # (B, 1, T, hd, H, W)
    h_last = hseq[:, -1].reshape(B, hd, H, W)
    c_last = c_last.reshape(B, hd, H, W)
    # Module returns (layer_outputs, last_state_fw, None) since bidirectional=False.
    return layer_outputs, (h_last, c_last), None


if __name__ == "__main__":
    B, T, Cin, H, W = 2, 8, 4, 16, 16
    HID = 32
    key = jax.random.PRNGKey(0)
    k_param, k_x = jax.random.split(key)
    params = init_params(k_param, Cin, HID, H, W)
    x = jax.random.normal(k_x, (B, T, Cin, H, W), dtype=jnp.float32)

    layer_outputs, (h_last, c_last), _ = convlstm_forward(x, params, HID)
    jax.block_until_ready((layer_outputs, h_last, c_last))

    assert layer_outputs.shape == (B, 1, T, HID, H, W)
    assert h_last.shape == (B, HID, H, W)
    assert c_last.shape == (B, HID, H, W)
    assert bool(jnp.all(jnp.isfinite(layer_outputs)))
    print("KERNEL_OK")
</pallas_src>

<mosaic_0001>
module attributes {stable_mosaic.version = 11 : i64} {
  func.func @_convlstm_fused_kernel(%arg0: i32, %arg1: i32, %arg2: memref<1x8x4x256xf32, #tpu.memory_space<vmem>>, %arg3: memref<16x256xf32, #tpu.memory_space<vmem>>, %arg4: memref<128x37xbf16, #tpu.memory_space<vmem>>, %arg5: memref<128x289xbf16, #tpu.memory_space<vmem>>, %arg6: memref<32x256xf32, #tpu.memory_space<vmem>>, %arg7: memref<32x256xf32, #tpu.memory_space<vmem>>, %arg8: memref<32x256xf32, #tpu.memory_space<vmem>>, %arg9: memref<1x8x32x256xf32, #tpu.memory_space<vmem>>, %arg10: memref<1x32x256xf32, #tpu.memory_space<vmem>>, %arg11: memref<32x256xf32, #tpu.memory_space<vmem>>, %arg12: memref<32x256xf32, #tpu.memory_space<vmem>>, %arg13: memref<128x256xf32, #tpu.memory_space<vmem>>, %arg14: memref<37x256xbf16, #tpu.memory_space<vmem>>, %arg15: memref<289x256xbf16, #tpu.memory_space<vmem>>) attributes {dimension_semantics = [#tpu.dimension_semantics<parallel>, #tpu.dimension_semantics<arbitrary>], iteration_bounds = array<i64: 2, 1>, scalar_prefetch = 0 : i64, scratch_operands = 5 : i64, tpu.core_type = #tpu.core_type<tc>, window_params = [{transform_indices = @transform_0, window_bounds = array<i64: 1, 8, 4, 256>}, {pipeline_mode = #tpu.pipeline_mode<synchronous>, transform_indices = @transform_1, window_bounds = array<i64: 16, 256>}, {pipeline_mode = #tpu.pipeline_mode<synchronous>, transform_indices = @transform_2, window_bounds = array<i64: 128, 37>}, {pipeline_mode = #tpu.pipeline_mode<synchronous>, transform_indices = @transform_3, window_bounds = array<i64: 128, 289>}, {pipeline_mode = #tpu.pipeline_mode<synchronous>, transform_indices = @transform_4, window_bounds = array<i64: 32, 256>}, {pipeline_mode = #tpu.pipeline_mode<synchronous>, transform_indices = @transform_5, window_bounds = array<i64: 32, 256>}, {pipeline_mode = #tpu.pipeline_mode<synchronous>, transform_indices = @transform_6, window_bounds = array<i64: 32, 256>}, {transform_indices = @transform_7, window_bounds = array<i64: 1, 8, 32, 256>}, {transform_indices = @transform_8, window_bounds = array<i64: 1, 32, 256>}]} {
    %c0_i32 = arith.constant 0 : i32
    %0 = arith.cmpi eq, %arg1, %c0_i32 : i32
    %1 = arith.extui %0 : i1 to i32
    %c0_i32_0 = arith.constant 0 : i32
    %2 = arith.cmpi ne, %1, %c0_i32_0 : i32
    scf.if %2 {
      %cst = arith.constant 0.000000e+00 : f32
      %5 = vector.broadcast %cst : f32 to vector<32x256xf32>
      %c0_4 = arith.constant 0 : index
      %c0_5 = arith.constant 0 : index
      %6 = vector.load %arg11[%c0_4, %c0_5] : memref<32x256xf32, #tpu.memory_space<vmem>>, vector<32x256xf32>
      tpu.vector_store %arg11[%c0_4, %c0_5], %5 {strides = array<i32>} : memref<32x256xf32, #tpu.memory_space<vmem>>, vector<32x256xf32>,
      %cst_6 = arith.constant 0.000000e+00 : f32
      %7 = vector.broadcast %cst_6 : f32 to vector<32x256xf32>
      %c0_7 = arith.constant 0 : index
      %c0_8 = arith.constant 0 : index
      %8 = vector.load %arg12[%c0_7, %c0_8] : memref<32x256xf32, #tpu.memory_space<vmem>>, vector<32x256xf32>
      tpu.vector_store %arg12[%c0_7, %c0_8], %7 {strides = array<i32>} : memref<32x256xf32, #tpu.memory_space<vmem>>, vector<32x256xf32>,
      %cst_9 = arith.constant 0.000000e+00 : bf16
      %9 = vector.broadcast %cst_9 : bf16 to vector<37x256xbf16>
      %c0_10 = arith.constant 0 : index
      %c0_11 = arith.constant 0 : index
      %10 = vector.load %arg14[%c0_10, %c0_11] : memref<37x256xbf16, #tpu.memory_space<vmem>>, vector<37x256xbf16>
      tpu.vector_store %arg14[%c0_10, %c0_11], %9 {strides = array<i32>} : memref<37x256xbf16, #tpu.memory_space<vmem>>, vector<37x256xbf16>,
      %cst_12 = arith.constant 0.000000e+00 : bf16
      %11 = vector.broadcast %cst_12 : bf16 to vector<289x256xbf16>
      %c0_13 = arith.constant 0 : index
      %c0_14 = arith.constant 0 : index
      %12 = vector.load %arg15[%c0_13, %c0_14] : memref<289x256xbf16, #tpu.memory_space<vmem>>, vector<289x256xbf16>
      tpu.vector_store %arg15[%c0_13, %c0_14], %11 {strides = array<i32>} : memref<289x256xbf16, #tpu.memory_space<vmem>>, vector<289x256xbf16>,
      %cst_15 = arith.constant 1.000000e+00 : bf16
      %13 = vector.broadcast %cst_15 : bf16 to vector<1x256xbf16>
      %c36 = arith.constant 36 : index
      %c0_16 = arith.constant 0 : index
      %14 = vector.load %arg14[%c36, %c0_16] : memref<37x256xbf16, #tpu.memory_space<vmem>>, vector<1x256xbf16>
      tpu.vector_store %arg14[%c36, %c0_16], %13 {strides = array<i32>} : memref<37x256xbf16, #tpu.memory_space<vmem>>, vector<1x256xbf16>,
      %cst_17 = arith.constant 1.000000e+00 : bf16
      %15 = vector.broadcast %cst_17 : bf16 to vector<1x256xbf16>
      %c288 = arith.constant 288 : index
      %c0_18 = arith.constant 0 : index
      %16 = vector.load %arg15[%c288, %c0_18] : memref<289x256xbf16, #tpu.memory_space<vmem>>, vector<1x256xbf16>
      tpu.vector_store %arg15[%c288, %c0_18], %15 {strides = array<i32>} : memref<289x256xbf16, #tpu.memory_space<vmem>>, vector<1x256xbf16>,
    } else {
    }
    %c0 = arith.constant 0 : index
    %c0_1 = arith.constant 0 : index
    %3 = vector.load %arg3[%c0, %c0_1] : memref<16x256xf32, #tpu.memory_space<vmem>>, vector<16x256xf32>
    %c0_i32_2 = arith.constant 0 : i32
    %c8_i32 = arith.constant 8 : i32
    %4 = arith.addi %c0_i32_2, %c8_i32 : i32
    %c1_i32 = arith.constant 1 : i32
    scf.for %arg16 = %c0_i32_2 to %4 step %c1_i32  : i32 {
      %c8_i32_4 = arith.constant 8 : i32
      %5 = arith.muli %arg1, %c8_i32_4 : i32
      %6 = arith.addi %5, %arg16 : i32
      %c8_i32_5 = arith.constant 8 : i32
      %7 = arith.cmpi slt, %6, %c8_i32_5 : i32
      %8 = arith.extui %7 : i1 to i32
      %c0_i32_6 = arith.constant 0 : i32
      %9 = arith.cmpi ne, %8, %c0_i32_6 : i32
      scf.if %9 {
        %c0_7 = arith.constant 0 : index
        %10 = arith.index_cast %arg16 : i32 to index
        %c0_8 = arith.constant 0 : index
        %c0_9 = arith.constant 0 : index
        %11 = vector.load %arg2[%c0_7, %10, %c0_8, %c0_9] : memref<1x8x4x256xf32, #tpu.memory_space<vmem>>, vector<1x1x4x256xf32>
        %12 = vector.shape_cast %11 : vector<1x1x4x256xf32> to vector<4x256xf32>
        %c17_i32 = arith.constant 17 : i32
        %13 = tpu.dynamic_rotate %12 by %c17_i32 dim 1 : vector<4x256xf32>, i32 -> vector<4x256xf32>
        %14 = vector.extract_strided_slice %3 {offsets = [0, 0], sizes = [1, 256], strides = [1, 1]} : vector<16x256xf32> to vector<1x256xf32>
        %15 = vector.broadcast %14 : vector<1x256xf32> to vector<4x256xf32>
        %16 = arith.mulf %13, %15 : vector<4x256xf32>
        %17 = arith.truncf %16 : vector<4x256xf32> to vector<4x256xbf16>
        %c0_10 = arith.constant 0 : index
        %c0_11 = arith.constant 0 : index
        %18 = vector.load %arg14[%c0_10, %c0_11] : memref<37x256xbf16, #tpu.memory_space<vmem>>, vector<4x256xbf16>
        tpu.vector_store %arg14[%c0_10, %c0_11], %17 {strides = array<i32>} : memref<37x256xbf16, #tpu.memory_space<vmem>>, vector<4x256xbf16>,
        %c16_i32 = arith.constant 16 : i32
        %19 = tpu.dynamic_rotate %12 by %c16_i32 dim 1 : vector<4x256xf32>, i32 -> vector<4x256xf32>
        %20 = vector.extract_strided_slice %3 {offsets = [1, 0], sizes = [1, 256], strides = [1, 1]} : vector<16x256xf32> to vector<1x256xf32>
        %21 = vector.broadcast %20 : vector<1x256xf32> to vector<4x256xf32>
        %22 = arith.mulf %19, %21 : vector<4x256xf32>
        %23 = arith.truncf %22 : vector<4x256xf32> to vector<4x256xbf16>
        %c4 = arith.constant 4 : index
        %c0_12 = arith.constant 0 : index
        %24 = vector.load %arg14[%c4, %c0_12] : memref<37x256xbf16, #tpu.memory_space<vmem>>, vector<4x256xbf16>
        tpu.vector_store %arg14[%c4, %c0_12], %23 {strides = array<i32>} : memref<37x256xbf16, #tpu.memory_space<vmem>>, vector<4x256xbf16>,
        %c15_i32 = arith.constant 15 : i32
        %25 = tpu.dynamic_rotate %12 by %c15_i32 dim 1 : vector<4x256xf32>, i32 -> vector<4x256xf32>
        %26 = vector.extract_strided_slice %3 {offsets = [2, 0], sizes = [1, 256], strides = [1, 1]} : vector<16x256xf32> to vector<1x256xf32>
        %27 = vector.broadcast %26 : vector<1x256xf32> to vector<4x256xf32>
        %28 = arith.mulf %25, %27 : vector<4x256xf32>
        %29 = arith.truncf %28 : vector<4x256xf32> to vector<4x256xbf16>
        %c8 = arith.constant 8 : index
        %c0_13 = arith.constant 0 : index
        %30 = vector.load %arg14[%c8, %c0_13] : memref<37x256xbf16, #tpu.memory_space<vmem>>, vector<4x256xbf16>
        tpu.vector_store %arg14[%c8, %c0_13], %29 {strides = array<i32>} : memref<37x256xbf16, #tpu.memory_space<vmem>>, vector<4x256xbf16>,
        %c1_i32_14 = arith.constant 1 : i32
        %31 = tpu.dynamic_rotate %12 by %c1_i32_14 dim 1 : vector<4x256xf32>, i32 -> vector<4x256xf32>
        %32 = vector.extract_strided_slice %3 {offsets = [3, 0], sizes = [1, 256], strides = [1, 1]} : vector<16x256xf32> to vector<1x256xf32>
        %33 = vector.broadcast %32 : vector<1x256xf32> to vector<4x256xf32>
        %34 = arith.mulf %31, %33 : vector<4x256xf32>
        %35 = arith.truncf %34 : vector<4x256xf32> to vector<4x256xbf16>
        %c12 = arith.constant 12 : index
        %c0_15 = arith.constant 0 : index
        %36 = vector.load %arg14[%c12, %c0_15] : memref<37x256xbf16, #tpu.memory_space<vmem>>, vector<4x256xbf16>
        tpu.vector_store %arg14[%c12, %c0_15], %35 {strides = array<i32>} : memref<37x256xbf16, #tpu.memory_space<vmem>>, vector<4x256xbf16>,
        %37 = arith.truncf %12 : vector<4x256xf32> to vector<4x256xbf16>
        %c16 = arith.constant 16 : index
        %c0_16 = arith.constant 0 : index
        %38 = vector.load %arg14[%c16, %c0_16] : memref<37x256xbf16, #tpu.memory_space<vmem>>, vector<4x256xbf16>
        tpu.vector_store %arg14[%c16, %c0_16], %37 {strides = array<i32>} : memref<37x256xbf16, #tpu.memory_space<vmem>>, vector<4x256xbf16>,
        %c255_i32 = arith.constant 255 : i32
        %39 = tpu.dynamic_rotate %12 by %c255_i32 dim 1 : vector<4x256xf32>, i32 -> vector<4x256xf32>
        %40 = vector.extract_strided_slice %3 {offsets = [5, 0], sizes = [1, 256], strides = [1, 1]} : vector<16x256xf32> to vector<1x256xf32>
        %41 = vector.broadcast %40 : vector<1x256xf32> to vector<4x256xf32>
        %42 = arith.mulf %39, %41 : vector<4x256xf32>
        %43 = arith.truncf %42 : vector<4x256xf32> to vector<4x256xbf16>
        %c20 = arith.constant 20 : index
        %c0_17 = arith.constant 0 : index
        %44 = vector.load %arg14[%c20, %c0_17] : memref<37x256xbf16, #tpu.memory_space<vmem>>, vector<4x256xbf16>
        tpu.vector_store %arg14[%c20, %c0_17], %43 {strides = array<i32>} : memref<37x256xbf16, #tpu.memory_space<vmem>>, vector<4x256xbf16>,
        %c241_i32 = arith.constant 241 : i32
        %45 = tpu.dynamic_rotate %12 by %c241_i32 dim 1 : vector<4x256xf32>, i32 -> vector<4x256xf32>
        %46 = vector.extract_strided_slice %3 {offsets = [6, 0], sizes = [1, 256], strides = [1, 1]} : vector<16x256xf32> to vector<1x256xf32>
        %47 = vector.broadcast %46 : vector<1x256xf32> to vector<4x256xf32>
        %48 = arith.mulf %45, %47 : vector<4x256xf32>
        %49 = arith.truncf %48 : vector<4x256xf32> to vector<4x256xbf16>
        %c24 = arith.constant 24 : index
        %c0_18 = arith.constant 0 : index
        %50 = vector.load %arg14[%c24, %c0_18] : memref<37x256xbf16, #tpu.memory_space<vmem>>, vector<4x256xbf16>
        tpu.vector_store %arg14[%c24, %c0_18], %49 {strides = array<i32>} : memref<37x256xbf16, #tpu.memory_space<vmem>>, vector<4x256xbf16>,
        %c240_i32 = arith.constant 240 : i32
        %51 = tpu.dynamic_rotate %12 by %c240_i32 dim 1 : vector<4x256xf32>, i32 -> vector<4x256xf32>
        %52 = vector.extract_strided_slice %3 {offsets = [7, 0], sizes = [1, 256], strides = [1, 1]} : vector<16x256xf32> to vector<1x256xf32>
        %53 = vector.broadcast %52 : vector<1x256xf32> to vector<4x256xf32>
        %54 = arith.mulf %51, %53 : vector<4x256xf32>
        %55 = arith.truncf %54 : vector<4x256xf32> to vector<4x256xbf16>
        %c28 = arith.constant 28 : index
        %c0_19 = arith.constant 0 : index
        %56 = vector.load %arg14[%c28, %c0_19] : memref<37x256xbf16, #tpu.memory_space<vmem>>, vector<4x256xbf16>
        tpu.vector_store %arg14[%c28, %c0_19], %55 {strides = array<i32>} : memref<37x256xbf16, #tpu.memory_space<vmem>>, vector<4x256xbf16>,
        %c239_i32 = arith.constant 239 : i32
        %57 = tpu.dynamic_rotate %12 by %c239_i32 dim 1 : vector<4x256xf32>, i32 -> vector<4x256xf32>
        %58 = vector.extract_strided_slice %3 {offsets = [8, 0], sizes = [1, 256], strides = [1, 1]} : vector<16x256xf32> to vector<1x256xf32>
        %59 = vector.broadcast %58 : vector<1x256xf32> to vector<4x256xf32>
        %60 = arith.mulf %57, %59 : vector<4x256xf32>
        %61 = arith.truncf %60 : vector<4x256xf32> to vector<4x256xbf16>
        %c32 = arith.constant 32 : index
        %c0_20 = arith.constant 0 : index
        %62 = vector.load %arg14[%c32, %c0_20] : memref<37x256xbf16, #tpu.memory_space<vmem>>, vector<4x256xbf16>
        tpu.vector_store %arg14[%c32, %c0_20], %61 {strides = array<i32>} : memref<37x256xbf16, #tpu.memory_space<vmem>>, vector<4x256xbf16>,
        %c0_21 = arith.constant 0 : index
        %c0_22 = arith.constant 0 : index
        %63 = vector.load %arg4[%c0_21, %c0_22] : memref<128x37xbf16, #tpu.memory_space<vmem>>, vector<128x37xbf16>
        %c0_23 = arith.constant 0 : index
        %c0_24 = arith.constant 0 : index
        %64 = vector.load %arg14[%c0_23, %c0_24] : memref<37x256xbf16, #tpu.memory_space<vmem>>, vector<37x256xbf16>
        %cst = arith.constant dense<0.000000e+00> : vector<128x256xf32>
        %65 = tpu.matmul %63, %64, %cst {dimension_numbers = #tpu.dot_dimension_numbers<[1], [0], [0], [1], [0, 0, 1, 1], [], []>} : vector<128x37xbf16>, vector<37x256xbf16>, vector<128x256xf32> -> vector<128x256xf32>
        %66 = vector.shape_cast %65 : vector<128x256xf32> to vector<1x128x256xf32>
        %cst_25 = arith.constant dense<0.000000e+00> : vector<1xf32>
        %67 = vector.multi_reduction <add>, %66, %cst_25 [1, 2] : vector<1x128x256xf32> to vector<1xf32>
        %68 = vector.shape_cast %67 : vector<1xf32> to vector<1x1x1xf32>
        %69 = vector.extract %68[0, 0, 0] : f32 from vector<1x1x1xf32>
        %cst_26 = arith.constant 3.276800e+04 : f32
        %70 = arith.divf %69, %cst_26 : f32
        %71 = vector.broadcast %70 : f32 to vector<128x256xf32>
        %72 = arith.subf %65, %71 : vector<128x256xf32>
        %73 = arith.mulf %72, %72 : vector<128x256xf32>
        %74 = vector.shape_cast %73 : vector<128x256xf32> to vector<1x128x256xf32>
        %cst_27 = arith.constant dense<0.000000e+00> : vector<1xf32>
        %75 = vector.multi_reduction <add>, %74, %cst_27 [1, 2] : vector<1x128x256xf32> to vector<1xf32>
        %76 = vector.shape_cast %75 : vector<1xf32> to vector<1x1x1xf32>
        %77 = vector.extract %76[0, 0, 0] : f32 from vector<1x1x1xf32>
        %cst_28 = arith.constant 3.276800e+04 : f32
        %78 = arith.divf %77, %cst_28 : f32
        %cst_29 = arith.constant 9.99999974E-6 : f32
        %79 = arith.addf %78, %cst_29 : f32
        %80 = math.rsqrt %79 : f32
        %81 = vector.broadcast %80 : f32 to vector<128x256xf32>
        %82 = arith.mulf %72, %81 : vector<128x256xf32>
        %c0_30 = arith.constant 0 : index
        %c0_31 = arith.constant 0 : index
        %83 = vector.load %arg13[%c0_30, %c0_31] : memref<128x256xf32, #tpu.memory_space<vmem>>, vector<128x256xf32>
        tpu.vector_store %arg13[%c0_30, %c0_31], %82 {strides = array<i32>} : memref<128x256xf32, #tpu.memory_space<vmem>>, vector<128x256xf32>,
        %c0_32 = arith.constant 0 : index
        %c0_33 = arith.constant 0 : index
        %84 = vector.load %arg11[%c0_32, %c0_33] : memref<32x256xf32, #tpu.memory_space<vmem>>, vector<32x256xf32>
        %c17_i32_34 = arith.constant 17 : i32
        %85 = tpu.dynamic_rotate %84 by %c17_i32_34 dim 1 : vector<32x256xf32>, i32 -> vector<32x256xf32>
        %86 = vector.extract_strided_slice %3 {offsets = [0, 0], sizes = [1, 256], strides = [1, 1]} : vector<16x256xf32> to vector<1x256xf32>
        %87 = vector.broadcast %86 : vector<1x256xf32> to vector<32x256xf32>
        %88 = arith.mulf %85, %87 : vector<32x256xf32>
        %89 = arith.truncf %88 : vector<32x256xf32> to vector<32x256xbf16>
        %c0_35 = arith.constant 0 : index
        %c0_36 = arith.constant 0 : index
        %90 = vector.load %arg15[%c0_35, %c0_36] : memref<289x256xbf16, #tpu.memory_space<vmem>>, vector<32x256xbf16>
        tpu.vector_store %arg15[%c0_35, %c0_36], %89 {strides = array<i32>} : memref<289x256xbf16, #tpu.memory_space<vmem>>, vector<32x256xbf16>,
        %c16_i32_37 = arith.constant 16 : i32
        %91 = tpu.dynamic_rotate %84 by %c16_i32_37 dim 1 : vector<32x256xf32>, i32 -> vector<32x256xf32>
        %92 = vector.extract_strided_slice %3 {offsets = [1, 0], sizes = [1, 256], strides = [1, 1]} : vector<16x256xf32> to vector<1x256xf32>
        %93 = vector.broadcast %92 : vector<1x256xf32> to vector<32x256xf32>
        %94 = arith.mulf %91, %93 : vector<32x256xf32>
        %95 = arith.truncf %94 : vector<32x256xf32> to vector<32x256xbf16>
        %c32_38 = arith.constant 32 : index
        %c0_39 = arith.constant 0 : index
        %96 = vector.load %arg15[%c32_38, %c0_39] : memref<289x256xbf16, #tpu.memory_space<vmem>>, vector<32x256xbf16>
        tpu.vector_store %arg15[%c32_38, %c0_39], %95 {strides = array<i32>} : memref<289x256xbf16, #tpu.memory_space<vmem>>, vector<32x256xbf16>,
        %c15_i32_40 = arith.constant 15 : i32
        %97 = tpu.dynamic_rotate %84 by %c15_i32_40 dim 1 : vector<32x256xf32>, i32 -> vector<32x256xf32>
        %98 = vector.extract_strided_slice %3 {offsets = [2, 0], sizes = [1, 256], strides = [1, 1]} : vector<16x256xf32> to vector<1x256xf32>
        %99 = vector.broadcast %98 : vector<1x256xf32> to vector<32x256xf32>
        %100 = arith.mulf %97, %99 : vector<32x256xf32>
        %101 = arith.truncf %100 : vector<32x256xf32> to vector<32x256xbf16>
        %c64 = arith.constant 64 : index
        %c0_41 = arith.constant 0 : index
        %102 = vector.load %arg15[%c64, %c0_41] : memref<289x256xbf16, #tpu.memory_space<vmem>>, vector<32x256xbf16>
        tpu.vector_store %arg15[%c64, %c0_41], %101 {strides = array<i32>} : memref<289x256xbf16, #tpu.memory_space<vmem>>, vector<32x256xbf16>,
        %c1_i32_42 = arith.constant 1 : i32
        %103 = tpu.dynamic_rotate %84 by %c1_i32_42 dim 1 : vector<32x256xf32>, i32 -> vector<32x256xf32>
        %104 = vector.extract_strided_slice %3 {offsets = [3, 0], sizes = [1, 256], strides = [1, 1]} : vector<16x256xf32> to vector<1x256xf32>
        %105 = vector.broadcast %104 : vector<1x256xf32> to vector<32x256xf32>
        %106 = arith.mulf %103, %105 : vector<32x256xf32>
        %107 = arith.truncf %106 : vector<32x256xf32> to vector<32x256xbf16>
        %c96 = arith.constant 96 : index
        %c0_43 = arith.constant 0 : index
        %108 = vector.load %arg15[%c96, %c0_43] : memref<289x256xbf16, #tpu.memory_space<vmem>>, vector<32x256xbf16>
        tpu.vector_store %arg15[%c96, %c0_43], %107 {strides = array<i32>} : memref<289x256xbf16, #tpu.memory_space<vmem>>, vector<32x256xbf16>,
        %109 = arith.truncf %84 : vector<32x256xf32> to vector<32x256xbf16>
        %c128 = arith.constant 128 : index
        %c0_44 = arith.constant 0 : index
        %110 = vector.load %arg15[%c128, %c0_44] : memref<289x256xbf16, #tpu.memory_space<vmem>>, vector<32x256xbf16>
        tpu.vector_store %arg15[%c128, %c0_44], %109 {strides = array<i32>} : memref<289x256xbf16, #tpu.memory_space<vmem>>, vector<32x256xbf16>,
        %c255_i32_45 = arith.constant 255 : i32
        %111 = tpu.dynamic_rotate %84 by %c255_i32_45 dim 1 : vector<32x256xf32>, i32 -> vector<32x256xf32>
        %112 = vector.extract_strided_slice %3 {offsets = [5, 0], sizes = [1, 256], strides = [1, 1]} : vector<16x256xf32> to vector<1x256xf32>
        %113 = vector.broadcast %112 : vector<1x256xf32> to vector<32x256xf32>
        %114 = arith.mulf %111, %113 : vector<32x256xf32>
        %115 = arith.truncf %114 : vector<32x256xf32> to vector<32x256xbf16>
        %c160 = arith.constant 160 : index
        %c0_46 = arith.constant 0 : index
        %116 = vector.load %arg15[%c160, %c0_46] : memref<289x256xbf16, #tpu.memory_space<vmem>>, vector<32x256xbf16>
        tpu.vector_store %arg15[%c160, %c0_46], %115 {strides = array<i32>} : memref<289x256xbf16, #tpu.memory_space<vmem>>, vector<32x256xbf16>,
        %c241_i32_47 = arith.constant 241 : i32
        %117 = tpu.dynamic_rotate %84 by %c241_i32_47 dim 1 : vector<32x256xf32>, i32 -> vector<32x256xf32>
        %118 = vector.extract_strided_slice %3 {offsets = [6, 0], sizes = [1, 256], strides = [1, 1]} : vector<16x256xf32> to vector<1x256xf32>
        %119 = vector.broadcast %118 : vector<1x256xf32> to vector<32x256xf32>
        %120 = arith.mulf %117, %119 : vector<32x256xf32>
        %121 = arith.truncf %120 : vector<32x256xf32> to vector<32x256xbf16>
        %c192 = arith.constant 192 : index
        %c0_48 = arith.constant 0 : index
        %122 = vector.load %arg15[%c192, %c0_48] : memref<289x256xbf16, #tpu.memory_space<vmem>>, vector<32x256xbf16>
        tpu.vector_store %arg15[%c192, %c0_48], %121 {strides = array<i32>} : memref<289x256xbf16, #tpu.memory_space<vmem>>, vector<32x256xbf16>,
        %c240_i32_49 = arith.constant 240 : i32
        %123 = tpu.dynamic_rotate %84 by %c240_i32_49 dim 1 : vector<32x256xf32>, i32 -> vector<32x256xf32>
        %124 = vector.extract_strided_slice %3 {offsets = [7, 0], sizes = [1, 256], strides = [1, 1]} : vector<16x256xf32> to vector<1x256xf32>
        %125 = vector.broadcast %124 : vector<1x256xf32> to vector<32x256xf32>
        %126 = arith.mulf %123, %125 : vector<32x256xf32>
        %127 = arith.truncf %126 : vector<32x256xf32> to vector<32x256xbf16>
        %c224 = arith.constant 224 : index
        %c0_50 = arith.constant 0 : index
        %128 = vector.load %arg15[%c224, %c0_50] : memref<289x256xbf16, #tpu.memory_space<vmem>>, vector<32x256xbf16>
        tpu.vector_store %arg15[%c224, %c0_50], %127 {strides = array<i32>} : memref<289x256xbf16, #tpu.memory_space<vmem>>, vector<32x256xbf16>,
        %c239_i32_51 = arith.constant 239 : i32
        %129 = tpu.dynamic_rotate %84 by %c239_i32_51 dim 1 : vector<32x256xf32>, i32 -> vector<32x256xf32>
        %130 = vector.extract_strided_slice %3 {offsets = [8, 0], sizes = [1, 256], strides = [1, 1]} : vector<16x256xf32> to vector<1x256xf32>
        %131 = vector.broadcast %130 : vector<1x256xf32> to vector<32x256xf32>
        %132 = arith.mulf %129, %131 : vector<32x256xf32>
        %133 = arith.truncf %132 : vector<32x256xf32> to vector<32x256xbf16>
        %c256 = arith.constant 256 : index
        %c0_52 = arith.constant 0 : index
        %134 = vector.load %arg15[%c256, %c0_52] : memref<289x256xbf16, #tpu.memory_space<vmem>>, vector<32x256xbf16>
        tpu.vector_store %arg15[%c256, %c0_52], %133 {strides = array<i32>} : memref<289x256xbf16, #tpu.memory_space<vmem>>, vector<32x256xbf16>,
        %c0_53 = arith.constant 0 : index
        %c0_54 = arith.constant 0 : index
        %135 = vector.load %arg5[%c0_53, %c0_54] : memref<128x289xbf16, #tpu.memory_space<vmem>>, vector<128x289xbf16>
        %c0_55 = arith.constant 0 : index
        %c0_56 = arith.constant 0 : index
        %136 = vector.load %arg15[%c0_55, %c0_56] : memref<289x256xbf16, #tpu.memory_space<vmem>>, vector<289x256xbf16>
        %cst_57 = arith.constant dense<0.000000e+00> : vector<128x256xf32>
        %137 = tpu.matmul %135, %136, %cst_57 {dimension_numbers = #tpu.dot_dimension_numbers<[1], [0], [0], [1], [0, 0, 1, 1], [], []>} : vector<128x289xbf16>, vector<289x256xbf16>, vector<128x256xf32> -> vector<128x256xf32>
        %c0_58 = arith.constant 0 : index
        %c0_59 = arith.constant 0 : index
        %138 = vector.load %arg13[%c0_58, %c0_59] : memref<128x256xf32, #tpu.memory_space<vmem>>, vector<128x256xf32>
        %139 = vector.shape_cast %137 : vector<128x256xf32> to vector<1x128x256xf32>
        %cst_60 = arith.constant dense<0.000000e+00> : vector<1xf32>
        %140 = vector.multi_reduction <add>, %139, %cst_60 [1, 2] : vector<1x128x256xf32> to vector<1xf32>
        %141 = vector.shape_cast %140 : vector<1xf32> to vector<1x1x1xf32>
        %142 = vector.extract %141[0, 0, 0] : f32 from vector<1x1x1xf32>
        %cst_61 = arith.constant 3.276800e+04 : f32
        %143 = arith.divf %142, %cst_61 : f32
        %144 = vector.broadcast %143 : f32 to vector<128x256xf32>
        %145 = arith.subf %137, %144 : vector<128x256xf32>
        %146 = arith.mulf %145, %145 : vector<128x256xf32>
        %147 = vector.shape_cast %146 : vector<128x256xf32> to vector<1x128x256xf32>
        %cst_62 = arith.constant dense<0.000000e+00> : vector<1xf32>
        %148 = vector.multi_reduction <add>, %147, %cst_62 [1, 2] : vector<1x128x256xf32> to vector<1xf32>
        %149 = vector.shape_cast %148 : vector<1xf32> to vector<1x1x1xf32>
        %150 = vector.extract %149[0, 0, 0] : f32 from vector<1x1x1xf32>
        %cst_63 = arith.constant 3.276800e+04 : f32
        %151 = arith.divf %150, %cst_63 : f32
        %cst_64 = arith.constant 9.99999974E-6 : f32
        %152 = arith.addf %151, %cst_64 : f32
        %153 = math.rsqrt %152 : f32
        %154 = vector.broadcast %153 : f32 to vector<128x256xf32>
        %155 = arith.mulf %145, %154 : vector<128x256xf32>
        %156 = arith.addf %138, %155 : vector<128x256xf32>
        %c0_65 = arith.constant 0 : index
        %c0_66 = arith.constant 0 : index
        %157 = vector.load %arg13[%c0_65, %c0_66] : memref<128x256xf32, #tpu.memory_space<vmem>>, vector<128x256xf32>
        tpu.vector_store %arg13[%c0_65, %c0_66], %156 {strides = array<i32>} : memref<128x256xf32, #tpu.memory_space<vmem>>, vector<128x256xf32>,
        %c0_67 = arith.constant 0 : index
        %c0_68 = arith.constant 0 : index
        %158 = vector.load %arg12[%c0_67, %c0_68] : memref<32x256xf32, #tpu.memory_space<vmem>>, vector<32x256xf32>
        %c0_69 = arith.constant 0 : index
        %c0_70 = arith.constant 0 : index
        %159 = vector.load %arg6[%c0_69, %c0_70] : memref<32x256xf32, #tpu.memory_space<vmem>>, vector<32x256xf32>
        %160 = arith.mulf %159, %158 : vector<32x256xf32>
        %161 = vector.shape_cast %160 : vector<32x256xf32> to vector<1x32x256xf32>
        %cst_71 = arith.constant dense<0.000000e+00> : vector<1xf32>
        %162 = vector.multi_reduction <add>, %161, %cst_71 [1, 2] : vector<1x32x256xf32> to vector<1xf32>
        %163 = vector.shape_cast %162 : vector<1xf32> to vector<1x1x1xf32>
        %164 = vector.extract %163[0, 0, 0] : f32 from vector<1x1x1xf32>
        %cst_72 = arith.constant 8.192000e+03 : f32
        %165 = arith.divf %164, %cst_72 : f32
        %166 = vector.broadcast %165 : f32 to vector<32x256xf32>
        %167 = arith.subf %160, %166 : vector<32x256xf32>
        %168 = arith.mulf %167, %167 : vector<32x256xf32>
        %169 = vector.shape_cast %168 : vector<32x256xf32> to vector<1x32x256xf32>
        %cst_73 = arith.constant dense<0.000000e+00> : vector<1xf32>
        %170 = vector.multi_reduction <add>, %169, %cst_73 [1, 2] : vector<1x32x256xf32> to vector<1xf32>
        %171 = vector.shape_cast %170 : vector<1xf32> to vector<1x1x1xf32>
        %172 = vector.extract %171[0, 0, 0] : f32 from vector<1x1x1xf32>
        %cst_74 = arith.constant 8.192000e+03 : f32
        %173 = arith.divf %172, %cst_74 : f32
        %cst_75 = arith.constant 9.99999974E-6 : f32
        %174 = arith.addf %173, %cst_75 : f32
        %175 = math.rsqrt %174 : f32
        %176 = vector.broadcast %175 : f32 to vector<32x256xf32>
        %177 = arith.mulf %167, %176 : vector<32x256xf32>
        %c0_76 = arith.constant 0 : index
        %c0_77 = arith.constant 0 : index
        %178 = vector.load %arg7[%c0_76, %c0_77] : memref<32x256xf32, #tpu.memory_space<vmem>>, vector<32x256xf32>
        %179 = arith.mulf %178, %158 : vector<32x256xf32>
        %180 = vector.shape_cast %179 : vector<32x256xf32> to vector<1x32x256xf32>
        %cst_78 = arith.constant dense<0.000000e+00> : vector<1xf32>
        %181 = vector.multi_reduction <add>, %180, %cst_78 [1, 2] : vector<1x32x256xf32> to vector<1xf32>
        %182 = vector.shape_cast %181 : vector<1xf32> to vector<1x1x1xf32>
        %183 = vector.extract %182[0, 0, 0] : f32 from vector<1x1x1xf32>
        %cst_79 = arith.constant 8.192000e+03 : f32
        %184 = arith.divf %183, %cst_79 : f32
        %185 = vector.broadcast %184 : f32 to vector<32x256xf32>
        %186 = arith.subf %179, %185 : vector<32x256xf32>
        %187 = arith.mulf %186, %186 : vector<32x256xf32>
        %188 = vector.shape_cast %187 : vector<32x256xf32> to vector<1x32x256xf32>
        %cst_80 = arith.constant dense<0.000000e+00> : vector<1xf32>
        %189 = vector.multi_reduction <add>, %188, %cst_80 [1, 2] : vector<1x32x256xf32> to vector<1xf32>
        %190 = vector.shape_cast %189 : vector<1xf32> to vector<1x1x1xf32>
        %191 = vector.extract %190[0, 0, 0] : f32 from vector<1x1x1xf32>
        %cst_81 = arith.constant 8.192000e+03 : f32
        %192 = arith.divf %191, %cst_81 : f32
        %cst_82 = arith.constant 9.99999974E-6 : f32
        %193 = arith.addf %192, %cst_82 : f32
        %194 = math.rsqrt %193 : f32
        %195 = vector.broadcast %194 : f32 to vector<32x256xf32>
        %196 = arith.mulf %186, %195 : vector<32x256xf32>
        %c0_83 = arith.constant 0 : index
        %c0_84 = arith.constant 0 : index
        %197 = vector.load %arg8[%c0_83, %c0_84] : memref<32x256xf32, #tpu.memory_space<vmem>>, vector<32x256xf32>
        %198 = arith.mulf %197, %158 : vector<32x256xf32>
        %199 = vector.shape_cast %198 : vector<32x256xf32> to vector<1x32x256xf32>
        %cst_85 = arith.constant dense<0.000000e+00> : vector<1xf32>
        %200 = vector.multi_reduction <add>, %199, %cst_85 [1, 2] : vector<1x32x256xf32> to vector<1xf32>
        %201 = vector.shape_cast %200 : vector<1xf32> to vector<1x1x1xf32>
        %202 = vector.extract %201[0, 0, 0] : f32 from vector<1x1x1xf32>
        %cst_86 = arith.constant 8.192000e+03 : f32
        %203 = arith.divf %202, %cst_86 : f32
        %204 = vector.broadcast %203 : f32 to vector<32x256xf32>
        %205 = arith.subf %198, %204 : vector<32x256xf32>
        %206 = arith.mulf %205, %205 : vector<32x256xf32>
        %207 = vector.shape_cast %206 : vector<32x256xf32> to vector<1x32x256xf32>
        %cst_87 = arith.constant dense<0.000000e+00> : vector<1xf32>
        %208 = vector.multi_reduction <add>, %207, %cst_87 [1, 2] : vector<1x32x256xf32> to vector<1xf32>
        %209 = vector.shape_cast %208 : vector<1xf32> to vector<1x1x1xf32>
        %210 = vector.extract %209[0, 0, 0] : f32 from vector<1x1x1xf32>
        %cst_88 = arith.constant 8.192000e+03 : f32
        %211 = arith.divf %210, %cst_88 : f32
        %cst_89 = arith.constant 9.99999974E-6 : f32
        %212 = arith.addf %211, %cst_89 : f32
        %213 = math.rsqrt %212 : f32
        %214 = vector.broadcast %213 : f32 to vector<32x256xf32>
        %215 = arith.mulf %205, %214 : vector<32x256xf32>
        %c0_90 = arith.constant 0 : index
        %c0_91 = arith.constant 0 : index
        %216 = vector.load %arg13[%c0_90, %c0_91] : memref<128x256xf32, #tpu.memory_space<vmem>>, vector<32x256xf32>
        %217 = arith.addf %216, %177 : vector<32x256xf32>
        %218 = arith.negf %217 : vector<32x256xf32>
        %219 = math.exp %218 : vector<32x256xf32>
        %cst_92 = arith.constant 1.000000e+00 : f32
        %220 = vector.broadcast %cst_92 : f32 to vector<32x256xf32>
        %221 = arith.addf %220, %219 : vector<32x256xf32>
        %222 = arith.divf %220, %221 : vector<32x256xf32>
        %c32_93 = arith.constant 32 : index
        %c0_94 = arith.constant 0 : index
        %223 = vector.load %arg13[%c32_93, %c0_94] : memref<128x256xf32, #tpu.memory_space<vmem>>, vector<32x256xf32>
        %224 = arith.addf %223, %196 : vector<32x256xf32>
        %225 = arith.negf %224 : vector<32x256xf32>
        %226 = math.exp %225 : vector<32x256xf32>
        %cst_95 = arith.constant 1.000000e+00 : f32
        %227 = vector.broadcast %cst_95 : f32 to vector<32x256xf32>
        %228 = arith.addf %227, %226 : vector<32x256xf32>
        %229 = arith.divf %227, %228 : vector<32x256xf32>
        %c64_96 = arith.constant 64 : index
        %c0_97 = arith.constant 0 : index
        %230 = vector.load %arg13[%c64_96, %c0_97] : memref<128x256xf32, #tpu.memory_space<vmem>>, vector<32x256xf32>
        %231 = math.tanh %230 : vector<32x256xf32>
        %232 = arith.mulf %229, %158 : vector<32x256xf32>
        %233 = arith.mulf %222, %231 : vector<32x256xf32>
        %234 = arith.addf %232, %233 : vector<32x256xf32>
        %235 = vector.shape_cast %234 : vector<32x256xf32> to vector<1x32x256xf32>
        %cst_98 = arith.constant dense<0.000000e+00> : vector<1xf32>
        %236 = vector.multi_reduction <add>, %235, %cst_98 [1, 2] : vector<1x32x256xf32> to vector<1xf32>
        %237 = vector.shape_cast %236 : vector<1xf32> to vector<1x1x1xf32>
        %238 = vector.extract %237[0, 0, 0] : f32 from vector<1x1x1xf32>
        %cst_99 = arith.constant 8.192000e+03 : f32
        %239 = arith.divf %238, %cst_99 : f32
        %240 = vector.broadcast %239 : f32 to vector<32x256xf32>
        %241 = arith.subf %234, %240 : vector<32x256xf32>
        %242 = arith.mulf %241, %241 : vector<32x256xf32>
        %243 = vector.shape_cast %242 : vector<32x256xf32> to vector<1x32x256xf32>
        %cst_100 = arith.constant dense<0.000000e+00> : vector<1xf32>
        %244 = vector.multi_reduction <add>, %243, %cst_100 [1, 2] : vector<1x32x256xf32> to vector<1xf32>
        %245 = vector.shape_cast %244 : vector<1xf32> to vector<1x1x1xf32>
        %246 = vector.extract %245[0, 0, 0] : f32 from vector<1x1x1xf32>
        %cst_101 = arith.constant 8.192000e+03 : f32
        %247 = arith.divf %246, %cst_101 : f32
        %cst_102 = arith.constant 9.99999974E-6 : f32
        %248 = arith.addf %247, %cst_102 : f32
        %249 = math.rsqrt %248 : f32
        %250 = vector.broadcast %249 : f32 to vector<32x256xf32>
        %251 = arith.mulf %241, %250 : vector<32x256xf32>
        %c96_103 = arith.constant 96 : index
        %c0_104 = arith.constant 0 : index
        %252 = vector.load %arg13[%c96_103, %c0_104] : memref<128x256xf32, #tpu.memory_space<vmem>>, vector<32x256xf32>
        %253 = arith.addf %252, %215 : vector<32x256xf32>
        %254 = arith.negf %253 : vector<32x256xf32>
        %255 = math.exp %254 : vector<32x256xf32>
        %cst_105 = arith.constant 1.000000e+00 : f32
        %256 = vector.broadcast %cst_105 : f32 to vector<32x256xf32>
        %257 = arith.addf %256, %255 : vector<32x256xf32>
        %258 = arith.divf %256, %257 : vector<32x256xf32>
        %259 = math.tanh %251 : vector<32x256xf32>
        %260 = arith.mulf %258, %259 : vector<32x256xf32>
        %c0_106 = arith.constant 0 : index
        %c0_107 = arith.constant 0 : index
        %261 = vector.load %arg11[%c0_106, %c0_107] : memref<32x256xf32, #tpu.memory_space<vmem>>, vector<32x256xf32>
        tpu.vector_store %arg11[%c0_106, %c0_107], %260 {strides = array<i32>} : memref<32x256xf32, #tpu.memory_space<vmem>>, vector<32x256xf32>,
        %c0_108 = arith.constant 0 : index
        %c0_109 = arith.constant 0 : index
        %262 = vector.load %arg12[%c0_108, %c0_109] : memref<32x256xf32, #tpu.memory_space<vmem>>, vector<32x256xf32>
        tpu.vector_store %arg12[%c0_108, %c0_109], %251 {strides = array<i32>} : memref<32x256xf32, #tpu.memory_space<vmem>>, vector<32x256xf32>,
        %c0_110 = arith.constant 0 : index
        %263 = arith.index_cast %arg16 : i32 to index
        %c0_111 = arith.constant 0 : index
        %c0_112 = arith.constant 0 : index
        %264 = vector.load %arg9[%c0_110, %263, %c0_111, %c0_112] : memref<1x8x32x256xf32, #tpu.memory_space<vmem>>, vector<1x1x32x256xf32>
        %265 = vector.shape_cast %264 : vector<1x1x32x256xf32> to vector<32x256xf32>
        %266 = vector.shape_cast %260 : vector<32x256xf32> to vector<1x1x32x256xf32>
        tpu.vector_store %arg9[%c0_110, %263, %c0_111, %c0_112], %266 {strides = array<i32>} : memref<1x8x32x256xf32, #tpu.memory_space<vmem>>, vector<1x1x32x256xf32>,
        %c7_i32 = arith.constant 7 : i32
        %267 = arith.cmpi eq, %6, %c7_i32 : i32
        %268 = arith.extui %267 : i1 to i32
        %c0_i32_113 = arith.constant 0 : i32
        %269 = arith.cmpi ne, %268, %c0_i32_113 : i32
        scf.if %269 {
          %c0_114 = arith.constant 0 : index
          %c0_115 = arith.constant 0 : index
          %c0_116 = arith.constant 0 : index
          %270 = vector.load %arg10[%c0_114, %c0_115, %c0_116] : memref<1x32x256xf32, #tpu.memory_space<vmem>>, vector<1x32x256xf32>
          %271 = vector.shape_cast %270 : vector<1x32x256xf32> to vector<32x256xf32>
          %272 = vector.shape_cast %251 : vector<32x256xf32> to vector<1x32x256xf32>
          tpu.vector_store %arg10[%c0_114, %c0_115, %c0_116], %272 {strides = array<i32>} : memref<1x32x256xf32, #tpu.memory_space<vmem>>, vector<1x32x256xf32>,
        } else {
        }
      } else {
      }
    }
    %c8_i32_3 = arith.constant 8 : i32
    return
  }
  func.func @transform_0(%arg0: i32, %arg1: i32) -> (i32, i32, i32, i32) {
    %c0_i32 = arith.constant 0 : i32
    %c0_i32_0 = arith.constant 0 : i32
    %c0_i32_1 = arith.constant 0 : i32
    return %arg0, %arg1, %c0_i32, %c0_i32_0 : i32, i32, i32, i32
  }
  func.func @transform_1(%arg0: i32, %arg1: i32) -> (i32, i32) {
    %c0_i32 = arith.constant 0 : i32
    %c0_i32_0 = arith.constant 0 : i32
    %c0_i32_1 = arith.constant 0 : i32
    return %c0_i32, %c0_i32_0 : i32, i32
  }
  func.func @transform_2(%arg0: i32, %arg1: i32) -> (i32, i32) {
    %c0_i32 = arith.constant 0 : i32
    %c0_i32_0 = arith.constant 0 : i32
    %c0_i32_1 = arith.constant 0 : i32
    return %c0_i32, %c0_i32_0 : i32, i32
  }
  func.func @transform_3(%arg0: i32, %arg1: i32) -> (i32, i32) {
    %c0_i32 = arith.constant 0 : i32
    %c0_i32_0 = arith.constant 0 : i32
    %c0_i32_1 = arith.constant 0 : i32
    return %c0_i32, %c0_i32_0 : i32, i32
  }
  func.func @transform_4(%arg0: i32, %arg1: i32) -> (i32, i32) {
    %c0_i32 = arith.constant 0 : i32
    %c0_i32_0 = arith.constant 0 : i32
    %c0_i32_1 = arith.constant 0 : i32
    return %c0_i32, %c0_i32_0 : i32, i32
  }
  func.func @transform_5(%arg0: i32, %arg1: i32) -> (i32, i32) {
    %c0_i32 = arith.constant 0 : i32
    %c0_i32_0 = arith.constant 0 : i32
    %c0_i32_1 = arith.constant 0 : i32
    return %c0_i32, %c0_i32_0 : i32, i32
  }
  func.func @transform_6(%arg0: i32, %arg1: i32) -> (i32, i32) {
    %c0_i32 = arith.constant 0 : i32
    %c0_i32_0 = arith.constant 0 : i32
    %c0_i32_1 = arith.constant 0 : i32
    return %c0_i32, %c0_i32_0 : i32, i32
  }
  func.func @transform_7(%arg0: i32, %arg1: i32) -> (i32, i32, i32, i32) {
    %c0_i32 = arith.constant 0 : i32
    %c0_i32_0 = arith.constant 0 : i32
    %c0_i32_1 = arith.constant 0 : i32
    return %arg0, %arg1, %c0_i32, %c0_i32_0 : i32, i32, i32, i32
  }
  func.func @transform_8(%arg0: i32, %arg1: i32) -> (i32, i32, i32) {
    %c0_i32 = arith.constant 0 : i32
    %c0_i32_0 = arith.constant 0 : i32
    %c0_i32_1 = arith.constant 0 : i32
    return %arg0, %c0_i32, %c0_i32_0 : i32, i32, i32
  }
}

</mosaic_0001>

<bundles_post_ra>
// kernel: convlstm_forward.1
= control target key start
LH: loop header
LB: loop body
LE: loop exit
PB: predicated region body
PF: predicated region fallthrough
CT: control target
= control target key end

     0   :  { %s3977_s27 = smov 0   ;;  %s3979_s28 = smov 0   ;;  %s6033_s0 = inlined_call_operand.vmem [shape: f32[2,8,4,256], index: 0, kind: input, shape index: {}]   ;;  %s6034_s1 = inlined_call_operand.vmem [shape: f32[16,256], index: 1, kind: input, shape index: {}]   ;;  %s6035_s2 = inlined_call_operand.vmem [shape: bf16[128,37], index: 2, kind: input, shape index: {}]   ;;  %s6036_s3 = inlined_call_operand.vmem [shape: bf16[128,289], index: 3, kind: input, shape index: {}]   ;;  %s6037_s4 = inlined_call_operand.vmem [shape: f32[32,256], index: 4, kind: input, shape index: {}]   ;;  %s6038_s5 = inlined_call_operand.vmem [shape: f32[32,256], index: 5, kind: input, shape index: {}]   ;;  %s6039_s6 = inlined_call_operand.vmem [shape: f32[32,256], index: 6, kind: input, shape index: {}]   ;;  %s6040_s7 = inlined_call_operand.vmem [shape: f32[2,8,32,256], index: 7, kind: output, shape index: {0}]   ;;  %s6041_s8 = inlined_call_operand.vmem [shape: f32[2,32,256], index: 8, kind: output, shape index: {1}]  }
   0x1   :  { %s3981_s29 = smov 0  }
   0x2 LB: > { %s31_s30 = sadd.s32 1, %s3910_s28  ;;  %p3347_p0 = scmp.ge.s32.totalorder %s3914_s29, 1  ;;  %s3914_s29 = sphi %s3981_s29, %s19_s29   ;;  %s3910_s28 = sphi %s3979_s28, %s6251_s28   ;;  %s3906_s27 = sphi %s3977_s27, %s6250_s27  }
   0x3   : > { %p33_p1 = scmp.ge.s32.totalorder %s31_s30, 2  ;;  %p287_p2 = scmp.lt.s32.totalorder %s3914_s29, 3 }
   0x5   : > { %s6253_s30 = smov (%p33_p1, %s31_s30), 0  ;;  %p288_p3 = pnand %p3347_p0, %p287_p2 }
   0x6   : > { %p337_p4 = scmp.lt.s32.totalorder (!%p288_p3), %s3906_s27, 1 }
   0x7   : > { %291 = sbr.rel (%p288_p3) target bundleno = 2559 (0x9ff), region = 48 }
   0xc   : > { %vm389_vm0 = vcmask 1042432   ;;  %vm390_vm1 = vsmask.f32 2304  ;;  %vm392_vm2 = vcmask 1046532   ;;  %vm393_vm3 = vsmask.f32 6400 }
   0xd   : > { %vm391_vm4 = vmand %vm389_vm0, %vm390_vm1  ;;  %v396_v0 = vld [vmem:[#allocation5 + $0x20] sm:$0x77]  ;;  %vm445_vm5 = vcmask 1042434   ;;  %vm447_vm7 = vcmask 1046534   ;;  %vm436_vm8 = vsmask.f32 256 }
   0xe   : > { %vm394_vm6 = vmand %vm392_vm2, %vm393_vm3  ;;  %vm435_vm10 = vcmask 1040384   ;;  %v4004_v1 = vld [vmem:[%s6034_s1] sm:$0xff]  ;;  %v4009_v2 = vld [vmem:[%s6034_s1 + $0x8] sm:$0xff]  ;;  %vm438_vm12 = vcmask 1044484   ;;  %vm439_vm13 = vsmask.f32 4352 }
   0xf   : > { %vm395_vm9 = vmor %vm394_vm6, %vm391_vm4  ;;  %6106 = vst [vmem:[#allocation7_spill] sm:$0xff] %v4004_v1  ;;  %v3920_v5 = vmov 0.0   ;;  %v4019_v6 = vld [vmem:[%s6034_s1 + $0x10] sm:$0xff]  ;;  %v4024_v7 = vld [vmem:[%s6034_s1 + $0x18] sm:$0xff]  ;;  %v3921_v8 = vmov 0   ;;  %s6255_s27 = smov (!%p337_p4, %s3906_s27), 1 }
  0x10   : > { %6107 = vst [vmem:[#allocation8_spill] sm:$0xff] %v4009_v2  ;;  %v397_v3 = vsel %vm395_vm9, 0, %v396_v0  ;;  %vm4012_vm11 = vmand %vm445_vm5, %vm390_vm1  ;;  %v442_v11 = vld [vmem:[#allocation6 + $0x100] sm:$0x11]  ;;  %s3523_s17 = sshll.u32 %s6255_s27, 6  ;;  %s3524_s18 = sshll.u32 %s6255_s27, 9 }
  0x11   : > { %369 = vst [vmem:[#allocation2 + $0x30] sm:$0xff] %v3920_v5  ;;  %370 = vst [vmem:[#allocation2] sm:$0xff] %v3920_v5  ;;  %s4048_s21 = scalar_lea.vmem %s6033_s0, %s3523_s17  ;;  %s4053_s24 = scalar_lea.vmem %s6040_s7, %s3524_s18 }
  0x12   : > { %371 = vst [vmem:[#allocation2 + $0x18] sm:$0xff] %v3920_v5  ;;  %372 = vst [vmem:[#allocation2 + $0x10] sm:$0xff] %v3920_v5  ;;  %s4058_s9 = scalar_lea.vmem %s6041_s8, %s3523_s17  ;;  %s4064_s27 = smov 0  }
  0x13   : > { %373 = vst [vmem:[#allocation2 + $0x8] sm:$0xff] %v3920_v5  ;;  %374 = vst [vmem:[#allocation2 + $0x20] sm:$0xff] %v3920_v5 }
  0x14   : > { %375 = vst [vmem:[#allocation2 + $0x28] sm:$0xff] %v3920_v5  ;;  %376 = vst [vmem:[#allocation2 + $0x38] sm:$0xff] %v3920_v5 }
  0x15   : > { %377 = vst [vmem:[#allocation3] sm:$0xff] %v3920_v5  ;;  %378 = vst [vmem:[#allocation3 + $0x18] sm:$0xff] %v3920_v5 }
  0x16   : > { %379 = vst [vmem:[#allocation3 + $0x10] sm:$0xff] %v3920_v5  ;;  %380 = vst [vmem:[#allocation3 + $0x20] sm:$0xff] %v3920_v5 }
  0x17   : > { %381 = vst [vmem:[#allocation3 + $0x28] sm:$0xff] %v3920_v5  ;;  %382 = vst [vmem:[#allocation3 + $0x8] sm:$0xff] %v3920_v5 }
  0x18   : > { %383 = vst [vmem:[#allocation3 + $0x30] sm:$0xff] %v3920_v5  ;;  %384 = vst [vmem:[#allocation3 + $0x38] sm:$0xff] %v3920_v5 }
  0x19   : > { %6110 = vst [vmem:[#allocation9_spill] sm:$0xff] %v4019_v6  ;;  %6111 = vst [vmem:[#allocation10_spill] sm:$0xff] %v4024_v7 }
  0x1a   : > { %385 = vst [vmem:[#allocation5 + $0x18] sm:$0xff] %v3921_v8  ;;  %386 = vst [vmem:[#allocation5 + $0x10] sm:$0xff] %v3921_v8 }
  0x1b   : > { %387 = vst [vmem:[#allocation5 + $0x8] sm:$0xff] %v3921_v8  ;;  %388 = vst [vmem:[#allocation5] sm:$0xff] %v3921_v8 }
  0x1c   : > { %398 = vst [vmem:[#allocation5 + $0x20] sm:$0x77] %v397_v3  ;;  %vm4028_vm14 = vmand %vm447_vm7, %vm393_vm3 }
  0x1d   : > { %vm4037_vm15 = vmand %vm435_vm10, %vm436_vm8 }
  0x1e   : > { %vm440_vm1 = vmand %vm438_vm12, %vm439_vm13 }
  0x1f   : > { %vm441_vm2 = vmor %vm440_vm1, %vm4037_vm15 }
  0x20   : > { %v443_v12 = vsel %vm441_vm2, 0, %v442_v11  ;;  %vm449_vm3 = vmor %vm4028_vm14, %vm4012_vm11 }
  0x21   : > { %444 = vst [vmem:[#allocation6 + $0x100] sm:$0x11] %v443_v12 }
  0x23   : > { %v450_v13 = vld [vmem:[#allocation5 + $0x20] sm:$0x44] }
  0x24   : > { %v451_v14 = vsel %vm449_vm3, 1065369472, %v450_v13 }
  0x25   : > { %452 = vst [vmem:[#allocation5 + $0x20] sm:$0x44] %v451_v14 }
  0x28   : > { %v453_v15 = vld [vmem:[#allocation6 + $0x100] sm:$0x11] }
  0x29   : > { %v454_v16 = vsel %vm441_vm2, 1065369472, %v453_v15 }
  0x2a   : > { %455 = vst [vmem:[#allocation6 + $0x100] sm:$0x11] %v454_v16 }
  0x2b LB: >> { %v6116_v2 = vld [vmem:[#allocation8_spill] sm:$0xff]  ;;  %v6117_v1 = vld [vmem:[#allocation7_spill] sm:$0xff]  ;;  %p3354_p5 = scmp.ge.s32.totalorder %s3918_s27, 8  ;;  %s3918_s27 = sphi %s4064_s27, %s465_s27  }
  0x2d   : >> { %471 = sbr.rel (%p3354_p5) target bundleno = 2551 (0x9f7), region = 63 }
  0x32   : >> { %s3526_s10 = sshll.u32 %s3918_s27, 3  ;;  %s3922_s12 = smov 127   ;;  %v3930_v20 = vmov 0   ;;  %v4085_v21 = vld [vmem:[#allocation2 + $0x28] sm:$0xff]  ;;  %v4091_v23 = vld [vmem:[#allocation2 + $0x38] sm:$0xff]  ;;  %v4093_v24 = vld [vmem:[#allocation2 + $0x20] sm:$0xff]  ;;  %v483_v29 = vlaneseq }
  0x33   : >> { %s474_s11 = scalar_lea.vmem %s4048_s21, %s3526_s10  ;;  %s3923_s13 = smov 111   ;;  %855 = vmatprep.mubr.bf16.mxu0 %v3930_v20  ;;  %v4087_v22 = vld [vmem:[#allocation2 + $0x8] sm:$0xff]  ;;  %v4097_v25 = vld [vmem:[#allocation2 + $0x18] sm:$0xff]  ;;  %v4099_v26 = vld [vmem:[#allocation2 + $0x30] sm:$0xff]  ;;  %vm813_vm8 = vcmask 1041408   ;;  %vm788_vm14 = vcmask 302080  }
  0x34   : >> { %v475_v17 = vld [vmem:[%s474_s11] sm:$0xff]  ;;  %s3924_s14 = smov 112   ;;  %s3925_s15 = smov 113   ;;  %v4103_v27 = vld [vmem:[#allocation2 + $0x10] sm:$0xff]  ;;  %v4121_v30 = vshrl.u32 %v483_v29, 7  ;;  %v4127_v31 = vand.u32 127, %v483_v29 }
  0x35   : >> { %596 = vrot.lane.b32.xlu1 %v475_v17, %s3922_s12  ;;  %676 = vrot.lane.b32.xlu0 %v475_v17, %s3923_s13  ;;  %v477_v18 = vcombine.high %v475_v17, %v475_v17  ;;  %s3926_s16 = smov 16   ;;  %s3927_s17 = smov 1   ;;  %v4105_v28 = vld [vmem:[#allocation2] sm:$0xff]  ;;  %v6119_v7 = vld [vmem:[#allocation10_spill] sm:$0xff]  ;;  %vm2046_vm15 = vcmask 269312  }
  0x36   : >> { %s3928_s18 = smov 17   ;;  %s3929_s19 = smov 15   ;;  %v605_v32 = vsub.s32 5, %v4121_v30  ;;  %v4131_v33 = vsub.s32 0, %v4121_v30  ;;  %v658_v36 = vsub.s32 7, %v4121_v30  ;;  %vm600_vm4 = vcmp.lt.s32.totalorder %v4127_v31, 127 }
  0x37   : >> { %v3531_v19 = vpack.c.bf16 %v477_v18, %v475_v17  ;;  %vm680_vm5 = vcmp.lt.s32.totalorder %v4127_v31, 111  ;;  %v6118_v6 = vld [vmem:[#allocation9_spill] sm:$0xff]  ;;  %vm653_vm6 = vcmp.lt.s32.totalorder %v4127_v31, 112  ;;  %v632_v45 = vsub.s32 6, %v4121_v30  ;;  %p3520_p6 = scmp.ne.s32.totalorder %s3918_s27, 7 }
  0x38   : >> { %v4141_v37 = vrot.slane %v6117_v1, %v605_v32  ;;  %v4144_v38 = vrot.slane %v6116_v2, %v605_v32  ;;  %v4148_v39 = vrot.slane %v6118_v6, %v4131_v33  ;;  %v4152_v40 = vrot.slane %v6119_v7, %v4131_v33 }
  0x39   : >> { %598 = vrot.lane.b32.xlu1 %v477_v18, %s3922_s12  ;;  %678 = vrot.lane.b32.xlu0 %v477_v18, %s3923_s13  ;;  %595 = vst [vmem:[#allocation5 + $0x8] sm:$0x33] %v3531_v19  ;;  %v4156_v43 = vrot.slane %v6117_v1, %v658_v36  ;;  %v4159_v44 = vrot.slane %v6116_v2, %v658_v36  ;;  %vm627_vm7 = vcmp.lt.s32.totalorder %v4127_v31, 113  ;;  %v516_v61 = vsub.s32 1, %v4121_v30 }
  0x3a   : >> { %v4188_v60 = vrot.slane %v6117_v1, %v632_v45  ;;  %v4194_v3 = vrot.slane %v6116_v2, %v632_v45  ;;  %vm511_vm9 = vcmp.lt.s32.totalorder %v4127_v31, 16  ;;  %v569_v9 = vsub.s32 3, %v4121_v30 }
  0x3b   : >> { %v4207_v12 = vrot.slane %v6117_v1, %v516_v61  ;;  %v4210_v13 = vrot.slane %v6116_v2, %v516_v61  ;;  %vm564_vm11 = vcmp.lt.s32.totalorder %v4127_v31, 1  ;;  %vm485_vm12 = vcmp.lt.s32.totalorder %v4127_v31, 17 }
  0x3c   : >> { %vm538_vm13 = vcmp.lt.s32.totalorder %v4127_v31, 15 }
  0x3d   : >> { %651 = vrot.lane.b32.xlu1 %v477_v18, %s3924_s14  ;;  %649 = vrot.lane.b32.xlu0 %v475_v17, %s3924_s14 }
  0x41   : >> { %625 = vrot.lane.b32.xlu1 %v477_v18, %s3925_s15  ;;  %623 = vrot.lane.b32.xlu0 %v475_v17, %s3925_s15 }
  0x45   : >> { %509 = vrot.lane.b32.xlu1 %v477_v18, %s3926_s16  ;;  %507 = vrot.lane.b32.xlu0 %v475_v17, %s3926_s16 }
  0x49   : >> { %562 = vrot.lane.b32.xlu1 %v477_v18, %s3927_s17  ;;  %560 = vrot.lane.b32.xlu0 %v475_v17, %s3927_s17 }
  0x4d   : >> { %481 = vrot.lane.b32.xlu1 %v477_v18, %s3928_s18  ;;  %479 = vrot.lane.b32.xlu0 %v475_v17, %s3928_s18 }
  0x51   : >> { %536 = vrot.lane.b32.xlu1 %v477_v18, %s3929_s19  ;;  %534 = vrot.lane.b32.xlu0 %v475_v17, %s3929_s19  ;;  %v3931_v17 = vmov 65535  }
  0x52   : >> { %v815_v18 = vsel %vm813_vm8, 4294967295, %v3931_v17 }
  0x53   : >> { %v816_v45 = vsel %vm389_vm0, %v815_v18, 0 }
  0x55   : >> { %1350 = vrot.lane.b32.xlu1 %v4085_v21, %s3927_s17  ;;  %1348 = vrot.lane.b32.xlu0 %v4087_v22, %s3927_s17 }
  0x59   : >> { %1358 = vrot.lane.b32.xlu1 %v4091_v23, %s3927_s17  ;;  %1356 = vrot.lane.b32.xlu0 %v4093_v24, %s3927_s17 }
  0x5d   : >> { %1346 = vrot.lane.b32.xlu1 %v4097_v25, %s3927_s17  ;;  %1344 = vrot.lane.b32.xlu0 %v4099_v26, %s3927_s17 }
  0x61   : >> { %1354 = vrot.lane.b32.xlu1 %v4103_v27, %s3927_s17  ;;  %1352 = vrot.lane.b32.xlu0 %v4105_v28, %s3927_s17 }
  0x65   : >> { %1290 = vrot.lane.b32.xlu1 %v4085_v21, %s3929_s19  ;;  %1288 = vrot.lane.b32.xlu0 %v4087_v22, %s3929_s19 }
  0x69   : >> { %1298 = vrot.lane.b32.xlu1 %v4091_v23, %s3929_s19  ;;  %1296 = vrot.lane.b32.xlu0 %v4093_v24, %s3929_s19 }
  0x6d   : >> { %1286 = vrot.lane.b32.xlu1 %v4097_v25, %s3929_s19  ;;  %1284 = vrot.lane.b32.xlu0 %v4099_v26, %s3929_s19 }
  0x71   : >> { %1294 = vrot.lane.b32.xlu1 %v4103_v27, %s3929_s19  ;;  %1292 = vrot.lane.b32.xlu0 %v4105_v28, %s3929_s19 }
  0x75   : >> { %1230 = vrot.lane.b32.xlu1 %v4085_v21, %s3926_s16  ;;  %1228 = vrot.lane.b32.xlu0 %v4087_v22, %s3926_s16 }
  0x79   : >> { %1238 = vrot.lane.b32.xlu1 %v4091_v23, %s3926_s16  ;;  %1236 = vrot.lane.b32.xlu0 %v4093_v24, %s3926_s16 }
  0x7d   : >> { %1226 = vrot.lane.b32.xlu1 %v4097_v25, %s3926_s16  ;;  %1224 = vrot.lane.b32.xlu0 %v4099_v26, %s3926_s16 }
  0x81   : >> { %1234 = vrot.lane.b32.xlu1 %v4103_v27, %s3926_s16  ;;  %1232 = vrot.lane.b32.xlu0 %v4105_v28, %s3926_s16 }
  0x85   : >> { %1170 = vrot.lane.b32.xlu1 %v4085_v21, %s3928_s18  ;;  %1168 = vrot.lane.b32.xlu0 %v4087_v22, %s3928_s18 }
  0x89   : >> { %1178 = vrot.lane.b32.xlu1 %v4091_v23, %s3928_s18  ;;  %1176 = vrot.lane.b32.xlu0 %v4093_v24, %s3928_s18 }
  0x8d   : >> { %1166 = vrot.lane.b32.xlu1 %v4097_v25, %s3928_s18  ;;  %1164 = vrot.lane.b32.xlu0 %v4099_v26, %s3928_s18 }
  0x91   : >> { %1174 = vrot.lane.b32.xlu1 %v4103_v27, %s3928_s18  ;;  %1172 = vrot.lane.b32.xlu0 %v4105_v28, %s3928_s18 }
  0x95   : >> { %1558 = vrot.lane.b32.xlu1 %v4085_v21, %s3924_s14  ;;  %1556 = vrot.lane.b32.xlu0 %v4087_v22, %s3924_s14 }
  0x99   : >> { %1566 = vrot.lane.b32.xlu1 %v4091_v23, %s3924_s14  ;;  %1564 = vrot.lane.b32.xlu0 %v4093_v24, %s3924_s14 }
  0x9d   : >> { %1554 = vrot.lane.b32.xlu1 %v4097_v25, %s3924_s14  ;;  %1552 = vrot.lane.b32.xlu0 %v4099_v26, %s3924_s14 }
  0xa1   : >> { %1562 = vrot.lane.b32.xlu1 %v4103_v27, %s3924_s14  ;;  %1560 = vrot.lane.b32.xlu0 %v4105_v28, %s3924_s14 }
  0xa5   : >> { %1498 = vrot.lane.b32.xlu1 %v4085_v21, %s3925_s15  ;;  %1496 = vrot.lane.b32.xlu0 %v4087_v22, %s3925_s15 }
  0xa7   : >> { %v597_v34 = vpop.permute.xlu1 %596  ;;  %v677_v35 = vpop.permute.xlu0 %676 }
  0xa9   : >> { %1506 = vrot.lane.b32.xlu1 %v4091_v23, %s3925_s15  ;;  %1504 = vrot.lane.b32.xlu0 %v4093_v24, %s3925_s15 }
  0xab   : >> { %v599_v41 = vpop.permute.xlu1 %598  ;;  %v679_v42 = vpop.permute.xlu0 %678 }
  0xac   : >> { %v601_v46 = vsel %vm600_vm4, %v597_v34, %v599_v41  ;;  %v602_v47 = vsel %vm600_vm4, %v599_v41, %v597_v34  ;;  %v681_v48 = vsel %vm680_vm5, %v677_v35, %v679_v42  ;;  %v682_v49 = vsel %vm680_vm5, %v679_v42, %v677_v35 }
  0xad   : >> { %v611_v50 = vmul.f32 %v4141_v37, %v601_v46  ;;  %v612_v51 = vmul.f32 %v4144_v38, %v602_v47  ;;  %v691_v52 = vmul.f32 %v4148_v39, %v681_v48  ;;  %v692_v53 = vmul.f32 %v4152_v40, %v682_v49  ;;  %1494 = vrot.lane.b32.xlu1 %v4097_v25, %s3925_s15 }
  0xae   : >> { %v4217_v34 = vrot.slane %v6117_v1, %v569_v9  ;;  %v4228_v41 = vrot.slane %v6116_v2, %v569_v9  ;;  %1492 = vrot.lane.b32.xlu0 %v4099_v26, %s3925_s15 }
  0xaf   : >> { %v3532_v54 = vpack.c.bf16 %v612_v51, %v611_v50  ;;  %v3535_v55 = vpack.c.bf16 %v692_v53, %v691_v52  ;;  %v652_v56 = vpop.permute.xlu1 %651  ;;  %v650_v57 = vpop.permute.xlu0 %649 }
  0xb0   : >> { %v654_v58 = vsel %vm653_vm6, %v650_v57, %v652_v56  ;;  %v655_v59 = vsel %vm653_vm6, %v652_v56, %v650_v57  ;;  %v4244_v57 = vrot.slane %v6117_v1, %v4131_v33 }
  0xb1   : >> { %v620_v62 = vrot.slane %v3532_v54, 6  ;;  %701 = vst [vmem:[#allocation5 + $0x20] sm:$0x33] %v3535_v55  ;;  %v664_v63 = vmul.f32 %v4156_v43, %v654_v58  ;;  %v665_v0 = vmul.f32 %v4159_v44, %v655_v59  ;;  %v543_v58 = vsub.s32 2, %v4121_v30  ;;  %1502 = vrot.lane.b32.xlu1 %v4103_v27, %s3925_s15 }
  0xb2   : >> { %1500 = vrot.lane.b32.xlu0 %v4105_v28, %s3925_s15 }
  0xb3   : >> { %622 = vst [vmem:[#allocation5 + $0x8] sm:$0xcc] %v620_v62  ;;  %v3534_v4 = vpack.c.bf16 %v665_v0, %v664_v63  ;;  %v626_v5 = vpop.permute.xlu1 %625  ;;  %v624_v8 = vpop.permute.xlu0 %623  ;;  %v4251_v63 = vrot.slane %v6116_v2, %v4131_v33  ;;  %v4263_v33 = vrot.slane %v6117_v1, %v543_v58 }
  0xb4   : >> { %v628_v10 = vsel %vm627_vm7, %v624_v8, %v626_v5  ;;  %v629_v11 = vsel %vm627_vm7, %v626_v5, %v624_v8 }
  0xb5   : >> { %v673_v14 = vrot.slane %v3534_v4, 6  ;;  %v638_v15 = vmul.f32 %v4188_v60, %v628_v10  ;;  %v639_v16 = vmul.f32 %v4194_v3, %v629_v11  ;;  %1438 = vrot.lane.b32.xlu1 %v4085_v21, %s3922_s12 }
  0xb6   : >> { %1436 = vrot.lane.b32.xlu0 %v4087_v22, %s3922_s12 }
  0xb7   : >> { %675 = vst [vmem:[#allocation5] sm:$0xcc] %v673_v14  ;;  %v3533_v19 = vpack.c.bf16 %v639_v16, %v638_v15  ;;  %v510_v29 = vpop.permute.xlu1 %509  ;;  %v508_v32 = vpop.permute.xlu0 %507  ;;  %v4268_v16 = vrot.slane %v6116_v2, %v543_v58 }
  0xb8   : >> { %v512_v35 = vsel %vm511_vm9, %v508_v32, %v510_v29  ;;  %v513_v36 = vsel %vm511_vm9, %v510_v29, %v508_v32  ;;  %v722_v42 = vld [vmem:[#allocation5 + $0x20] sm:$0x77] }
  0xb9   : >> { %648 = vst [vmem:[#allocation5] sm:$0x33] %v3533_v19  ;;  %v522_v46 = vmul.f32 %v4207_v12, %v513_v36  ;;  %v523_v47 = vmul.f32 %v4210_v13, %v512_v35  ;;  %v3379_v48 = vcombine.high %v722_v42, %v722_v42  ;;  %v3378_v49 = vcombine.low %v722_v42, %v722_v42 }
  0xba   : >> { %1446 = vrot.lane.b32.xlu1 %v4091_v23, %s3922_s12  ;;  %1444 = vrot.lane.b32.xlu0 %v4093_v24, %s3922_s12 }
  0xbb   : >> { %v3528_v50 = vpack.c.bf16 %v523_v47, %v522_v46  ;;  %v563_v51 = vpop.permute.xlu1 %562  ;;  %v561_v52 = vpop.permute.xlu0 %560  ;;  %v821_v53 = vand.u32 %v3379_v48, %v816_v45  ;;  %v818_v54 = vand.u32 %v3378_v49, %v816_v45  ;;  %v3662_v47 = vld [vmem:[%s6035_s2] sm:$0xff]   ;;  %v3663_v48 = vld [vmem:[%s6035_s2 + $0x8] sm:$0xff]   ;;  %v3664_v49 = vld [vmem:[%s6035_s2 + $0x10] sm:$0xff]  }
  0xbc   : >> { %v565_v55 = vsel %vm564_vm11, %v561_v52, %v563_v51  ;;  %v566_v56 = vsel %vm564_vm11, %v563_v51, %v561_v52 }
  0xbd   : >> { %v531_v59 = vrot.slane %v3528_v50, 6  ;;  %v575_v61 = vmul.f32 %v4217_v34, %v566_v56  ;;  %v576_v62 = vmul.f32 %v4228_v41, %v565_v55  ;;  %833 = vmatprep.subr.bf16.mxu0 %v821_v53  ;;  %v3665_v50 = vld [vmem:[%s6035_s2 + $0x18] sm:$0xff]   ;;  %v3666_v53 = vld [vmem:[%s6035_s2 + $0x20] sm:$0xff]  }
  0xbe   : >> { %834 = vmatpush1.bf16.msra.mxu0 %v818_v54  ;;  %1434 = vrot.lane.b32.xlu1 %v4097_v25, %s3922_s12 }
  0xbf   : >> { %533 = vst [vmem:[#allocation5 + $0x18] sm:$0xcc] %v531_v59  ;;  %v3530_v0 = vpack.c.bf16 %v576_v62, %v575_v61  ;;  %v482_v4 = vpop.permute.xlu1 %481  ;;  %v480_v5 = vpop.permute.xlu0 %479  ;;  %1432 = vrot.lane.b32.xlu0 %v4099_v26, %s3922_s12 }
  0xc0   : >> { %v486_v30 = vsel %vm485_vm12, %v480_v5, %v482_v4  ;;  %v487_v8 = vsel %vm485_vm12, %v482_v4, %v480_v5  ;;  %v3656_v9 = vld [vmem:[#allocation5 + $0xc] ss:$-8 sps:$4 sm:$0xff]   ;;  %v3658_v10 = vld [vmem:[#allocation5 + $0x8] ss:$-8 sps:$4 sm:$0xff]  }
  0xc1   : >> { %v584_v11 = vrot.slane %v3530_v0, 6  ;;  %v496_v14 = vmul.f32 %v4244_v57, %v487_v8  ;;  %v497_v15 = vmul.f32 %v4251_v63, %v486_v30  ;;  %835 = vmatprep.subr.bf16.mxu0 %v3656_v9  ;;  %v3667_v9 = vld [vmem:[%s6035_s2 + $0x28] sm:$0xff]  }
  0xc2   : >> { %836 = vmatpush1.bf16.msra.mxu0 %v3658_v10  ;;  %1442 = vrot.lane.b32.xlu1 %v4103_v27, %s3922_s12 }
  0xc3   : >> { %586 = vst [vmem:[#allocation5 + $0x10] sm:$0xcc] %v584_v11  ;;  %v3527_v17 = vpack.c.bf16 %v497_v15, %v496_v14  ;;  %v537_v18 = vpop.permute.xlu1 %536  ;;  %v535_v19 = vpop.permute.xlu0 %534  ;;  %1440 = vrot.lane.b32.xlu0 %v4105_v28, %s3922_s12 }
  0xc4   : >> { %v539_v29 = vsel %vm538_vm13, %v535_v19, %v537_v18  ;;  %v540_v32 = vsel %vm538_vm13, %v537_v18, %v535_v19 }
  0xc5   : >> { %506 = vst [vmem:[#allocation5 + $0x18] sm:$0x33] %v3527_v17  ;;  %v549_v35 = vmul.f32 %v4263_v33, %v540_v32  ;;  %v550_v36 = vmul.f32 %v4268_v16, %v539_v29 }
  0xc6   : >> { %1618 = vrot.lane.b32.xlu1 %v4085_v21, %s3923_s13 }
  0xc7   : >> { %v3529_v42 = vpack.c.bf16 %v550_v36, %v549_v35  ;;  %1616 = vrot.lane.b32.xlu0 %v4087_v22, %s3923_s13  ;;  %v1351_v51 = vpop.permute.xlu1 %1350  ;;  %v1349_v52 = vpop.permute.xlu0 %1348 }
  0xc9   : >> { %559 = vst [vmem:[#allocation5 + $0x10] sm:$0x33] %v3529_v42 }
  0xca   : >> { %1626 = vrot.lane.b32.xlu1 %v4091_v23, %s3923_s13 }
  0xcb   : >> { %1624 = vrot.lane.b32.xlu0 %v4093_v24, %s3923_s13  ;;  %v1359_v54 = vpop.permute.xlu1 %1358  ;;  %v1357_v55 = vpop.permute.xlu0 %1356 }
  0xcc   : >> { %v1363_v56 = vsel %vm564_vm11, %v1351_v51, %v1359_v54  ;;  %v1367_v58 = vsel %vm564_vm11, %v1359_v54, %v1351_v51  ;;  %v1362_v59 = vsel %vm564_vm11, %v1349_v52, %v1357_v55  ;;  %v1366_v61 = vsel %vm564_vm11, %v1357_v55, %v1349_v52 }
  0xcd   : >> { %v1374_v62 = vmul.f32 %v1367_v58, %v4217_v34  ;;  %v1375_v0 = vmul.f32 %v1363_v56, %v4228_v41  ;;  %v1372_v4 = vmul.f32 %v1366_v61, %v4217_v34  ;;  %v1373_v5 = vmul.f32 %v1362_v59, %v4228_v41 }
  0xce   : >> { %1614 = vrot.lane.b32.xlu1 %v4097_v25, %s3923_s13 }
  0xcf   : >> { %1612 = vrot.lane.b32.xlu0 %v4099_v26, %s3923_s13  ;;  %v1347_v30 = vpop.permute.xlu1 %1346  ;;  %v1345_v8 = vpop.permute.xlu0 %1344  ;;  %v3852_v10 = vpack.c.bf16 %v1375_v0, %v1373_v5  ;;  %v3853_v11 = vpack.c.bf16 %v1374_v62, %v1372_v4  ;;  %v3669_v62 = vld [vmem:[%s6035_s2 + $0x38] sm:$0xff]  }
  0xd0   : >> { %v3659_v45 = vld [vmem:[#allocation5 + $0x1c] ss:$-8 sps:$4 sm:$0xff]   ;;  %v3661_v46 = vld [vmem:[#allocation5 + $0x18] ss:$-8 sps:$4 sm:$0xff]  }
  0xd1   : >> { %837 = vmatprep.subr.bf16.mxu0 %v3659_v45  ;;  %2080 = vmatprep.subr.bf16.mxu1 %v3852_v10 }
  0xd2   : >> { %838 = vmatpush1.bf16.msra.mxu0 %v3661_v46  ;;  %1622 = vrot.lane.b32.xlu1 %v4103_v27, %s3923_s13 }
  0xd3   : >> { %1620 = vrot.lane.b32.xlu0 %v4105_v28, %s3923_s13  ;;  %v1355_v14 = vpop.permute.xlu1 %1354  ;;  %v1353_v15 = vpop.permute.xlu0 %1352  ;;  %2081 = vmatpush1.bf16.msra.mxu1 %v3853_v11 }
  0xd4   : >> { %v1361_v17 = vsel %vm564_vm11, %v1347_v30, %v1355_v14  ;;  %v1365_v18 = vsel %vm564_vm11, %v1355_v14, %v1347_v30  ;;  %v1360_v19 = vsel %vm564_vm11, %v1345_v8, %v1353_v15  ;;  %v1364_v29 = vsel %vm564_vm11, %v1353_v15, %v1345_v8 }
  0xd5   : >> { %3380 = vmatmul.mubr.msk.bf16.vlgmr.msra.gmra.mxu0 %vm788_vm14, %v3662_v47  ;;  %v1370_v32 = vmul.f32 %v1365_v18, %v4217_v34  ;;  %v1371_v35 = vmul.f32 %v1361_v17, %v4228_v41  ;;  %v1368_v36 = vmul.f32 %v1364_v29, %v4217_v34  ;;  %v1369_v42 = vmul.f32 %v1360_v19, %v4228_v41  ;;  %v3668_v47 = vld [vmem:[%s6035_s2 + $0x30] sm:$0xff]  }
  0xd6   : >> { %865 = vmatprep.mubr.bf16.mxu0 %v3930_v20 }
  0xd7   : >> { %v1291_v45 = vpop.permute.xlu1 %1290  ;;  %v1289_v46 = vpop.permute.xlu0 %1288 }
  0xdb   : >> { %v1297_v51 = vpop.permute.xlu0 %1296 }
  0xdc   : >> { %v1302_v41 = vsel %vm538_vm13, %v1289_v46, %v1297_v51 }
  0xdd   : >> { %3381 = vmatmul.mubr.msk.bf16.gmra.mxu0 %vm788_vm14, %v3663_v48  ;;  %v3854_v48 = vpack.c.bf16 %v1371_v35, %v1369_v42  ;;  %v1313_v58 = vmul.f32 %v1302_v41, %v4268_v16 }
  0xde   : >> { %875 = vmatprep.mubr.bf16.mxu0 %v3930_v20 }
  0xdf   : >> { %2082 = vmatprep.subr.bf16.mxu1 %v3854_v48  ;;  %v1285_v61 = vpop.permute.xlu0 %1284 }
  0xe3   : >> { %v1293_v5 = vpop.permute.xlu0 %1292 }
  0xe4   : >> { %v1304_v10 = vsel %vm538_vm13, %v1293_v5, %v1285_v61 }
  0xe5   : >> { %3382 = vmatmul.mubr.msk.bf16.gmra.mxu0 %vm788_vm14, %v3664_v49  ;;  %v3855_v49 = vpack.c.bf16 %v1370_v32, %v1368_v36  ;;  %v1308_v15 = vmul.f32 %v1304_v10, %v4263_v33 }
  0xe6   : >> { %885 = vmatprep.mubr.bf16.mxu0 %v3930_v20 }
  0xe7   : >> { %2083 = vmatpush1.bf16.msra.mxu1 %v3855_v49  ;;  %v1229_v19 = vpop.permute.xlu0 %1228 }
  0xeb   : >> { %v1237_v32 = vpop.permute.xlu0 %1236 }
  0xec   : >> { %v1242_v42 = vsel %vm511_vm9, %v1229_v19, %v1237_v32 }
  0xed   : >> { %3383 = vmatmul.mubr.msk.bf16.gmra.mxu0 %vm788_vm14, %v3665_v50  ;;  %v1299_v50 = vpop.permute.xlu1 %1298 }
  0xee   : >> { %895 = vmatprep.mubr.bf16.mxu0 %v3930_v20  ;;  %v1303_v52 = vsel %vm538_vm13, %v1291_v45, %v1299_v50  ;;  %v1307_v34 = vsel %vm538_vm13, %v1299_v50, %v1291_v45 }
  0xef   : >> { %v1314_v54 = vmul.f32 %v1307_v34, %v4263_v33  ;;  %v1315_v55 = vmul.f32 %v1303_v52, %v4268_v16  ;;  %v1225_v50 = vpop.permute.xlu0 %1224 }
  0xf1   : >> { %v1287_v59 = vpop.permute.xlu1 %1286  ;;  %v3856_v0 = vpack.c.bf16 %v1315_v55, %v1313_v58 }
  0xf3   : >> { %2084 = vmatprep.subr.bf16.mxu1 %v3856_v0  ;;  %v1233_v34 = vpop.permute.xlu0 %1232 }
  0xf4   : >> { %v1240_v55 = vsel %vm511_vm9, %v1225_v50, %v1233_v34  ;;  %v1244_v58 = vsel %vm511_vm9, %v1233_v34, %v1225_v50 }
  0xf5   : >> { %3384 = vmatmul.mubr.msk.bf16.gmra.mxu0 %vm788_vm14, %v3666_v53  ;;  %v1306_v53 = vsel %vm538_vm13, %v1297_v51, %v1289_v46  ;;  %v1295_v4 = vpop.permute.xlu1 %1294 }
  0xf6   : >> { %905 = vmatprep.mubr.bf16.mxu0 %v3930_v20  ;;  %v1312_v56 = vmul.f32 %v1306_v53, %v4263_v33  ;;  %v1301_v30 = vsel %vm538_vm13, %v1287_v59, %v1295_v4  ;;  %v1305_v8 = vsel %vm538_vm13, %v1295_v4, %v1287_v59  ;;  %v1248_v59 = vmul.f32 %v1244_v58, %v4207_v12 }
  0xf7   : >> { %v1310_v11 = vmul.f32 %v1305_v8, %v4263_v33  ;;  %v1311_v14 = vmul.f32 %v1301_v30, %v4268_v16  ;;  %v1246_v33 = vsel %vm511_vm9, %v1237_v32, %v1229_v19  ;;  %v1169_v4 = vpop.permute.xlu0 %1168 }
  0xf8   : >> { %v1252_v46 = vmul.f32 %v1246_v33, %v4207_v12  ;;  %v3857_v48 = vpack.c.bf16 %v1314_v54, %v1312_v56 }
  0xf9   : >> { %v1231_v18 = vpop.permute.xlu1 %1230 }
  0xfa   : >> { %2085 = vmatpush1.bf16.msra.mxu1 %v3857_v48 }
  0xfb   : >> { %v1177_v8 = vpop.permute.xlu0 %1176 }
  0xfd   : >> { %3385 = vmatmul.mubr.msk.bf16.gmra.mxu0 %vm788_vm14, %v3667_v9  ;;  %v1300_v9 = vsel %vm538_vm13, %v1285_v61, %v1293_v5  ;;  %v1239_v29 = vpop.permute.xlu1 %1238  ;;  %v1249_v61 = vmul.f32 %v1240_v55, %v4210_v13 }
  0xfe   : >> { %915 = vmatprep.mubr.bf16.mxu0 %v3930_v20  ;;  %v1309_v17 = vmul.f32 %v1300_v9, %v4268_v16  ;;  %v1243_v35 = vsel %vm511_vm9, %v1231_v18, %v1239_v29  ;;  %v1247_v36 = vsel %vm511_vm9, %v1239_v29, %v1231_v18 }
  0xff   : >> { %v1254_v16 = vmul.f32 %v1247_v36, %v4207_v12  ;;  %v1255_v45 = vmul.f32 %v1243_v35, %v4210_v13  ;;  %v1165_v29 = vpop.permute.xlu0 %1164 }
 0x100   : >> { %v3858_v52 = vpack.c.bf16 %v1311_v14, %v1309_v17  ;;  %v1182_v14 = vsel %vm485_vm12, %v1169_v4, %v1177_v8 }
 0x101   : >> { %v1227_v49 = vpop.permute.xlu1 %1226  ;;  %v1193_v17 = vmul.f32 %v1182_v14, %v4251_v63  ;;  %v3861_v18 = vpack.c.bf16 %v1254_v16, %v1252_v46 }
 0x102   : >> { %2086 = vmatprep.subr.bf16.mxu1 %v3858_v52 }
 0x103   : >> { %v1173_v36 = vpop.permute.xlu0 %1172 }
 0x105   : >> { %3386 = vmatmul.mubr.msk.bf16.gmra.mxu0 %vm788_vm14, %v3668_v47  ;;  %v1253_v47 = vmul.f32 %v1242_v42, %v4210_v13  ;;  %v1235_v51 = vpop.permute.xlu1 %1234 }
 0x106   : >> { %925 = vmatprep.mubr.bf16.mxu0 %v3930_v20  ;;  %v1241_v41 = vsel %vm511_vm9, %v1227_v49, %v1235_v51  ;;  %v1245_v53 = vsel %vm511_vm9, %v1235_v51, %v1227_v49 }
 0x107   : >> { %v1250_v54 = vmul.f32 %v1245_v53, %v4207_v12  ;;  %v1251_v56 = vmul.f32 %v1241_v41, %v4210_v13  ;;  %v3860_v30 = vpack.c.bf16 %v1255_v45, %v1253_v47  ;;  %v1186_v12 = vsel %vm485_vm12, %v1177_v8, %v1169_v4  ;;  %v1557_v52 = vpop.permute.xlu0 %1556 }
 0x108   : >> { %v1180_v45 = vsel %vm485_vm12, %v1165_v29, %v1173_v36  ;;  %v1184_v47 = vsel %vm485_vm12, %v1173_v36, %v1165_v29 }
 0x109   : >> { %v1171_v0 = vpop.permute.xlu1 %1170  ;;  %v3862_v35 = vpack.c.bf16 %v1251_v56, %v1249_v61  ;;  %v1188_v48 = vmul.f32 %v1184_v47, %v4244_v57  ;;  %v1189_v49 = vmul.f32 %v1180_v45, %v4251_v63  ;;  %v3863_v50 = vpack.c.bf16 %v1250_v54, %v1248_v59 }
 0x10b   : >> { %v1565_v58 = vpop.permute.xlu0 %1564 }
 0x10d   : >> { %3387 = vmatmul.mubr.msk.bf16.gmra.mxu0 %vm788_vm14, %v3669_v62  ;;  %v3859_v62 = vpack.c.bf16 %v1310_v11, %v1308_v15  ;;  %v1179_v5 = vpop.permute.xlu1 %1178  ;;  %v1192_v15 = vmul.f32 %v1186_v12, %v4244_v57 }
 0x10e   : >> { %2225 = vmatprep.mubr.bf16.mxu0 %v3930_v20  ;;  %v1183_v9 = vsel %vm485_vm12, %v1171_v0, %v1179_v5  ;;  %v1187_v10 = vsel %vm485_vm12, %v1179_v5, %v1171_v0 }
 0x10f   : >> { %2087 = vmatpush1.bf16.msra.mxu1 %v3859_v62  ;;  %v1194_v13 = vmul.f32 %v1187_v10, %v4244_v57  ;;  %v1195_v11 = vmul.f32 %v1183_v9, %v4251_v63  ;;  %v1553_v4 = vpop.permute.xlu0 %1552 }
 0x110   : >> { %2088 = vmatprep.subr.bf16.mxu1 %v3860_v30 }
 0x111   : >> { %v1167_v19 = vpop.permute.xlu1 %1166  ;;  %v3864_v41 = vpack.c.bf16 %v1195_v11, %v1193_v17  ;;  %v3865_v62 = vpack.c.bf16 %v1194_v13, %v1192_v15 }
 0x113   : >> { %2089 = vmatpush1.bf16.msra.mxu1 %v3861_v18  ;;  %v1561_v10 = vpop.permute.xlu0 %1560 }
 0x114   : >> { %2090 = vmatprep.subr.bf16.mxu1 %v3862_v35  ;;  %v1568_v13 = vsel %vm653_vm6, %v1553_v4, %v1561_v10  ;;  %v1572_v11 = vsel %vm653_vm6, %v1561_v10, %v1553_v4 }
 0x115   : >> { %v1175_v32 = vpop.permute.xlu1 %1174  ;;  %v1576_v15 = vmul.f32 %v1568_v13, %v4156_v43  ;;  %v1577_v17 = vmul.f32 %v1572_v11, %v4159_v44  ;;  %v3674_v13 = vld [vmem:[%s6036_s3 + $0x4] ss:$12 sps:$4 sm:$0xff]  }
 0x116   : >> { %v1181_v42 = vsel %vm485_vm12, %v1167_v19, %v1175_v32  ;;  %v1185_v33 = vsel %vm485_vm12, %v1175_v32, %v1167_v19  ;;  %2112 = vmatprep.mubr.bf16.mxu1 %v3674_v13 }
 0x117   : >> { %v1190_v16 = vmul.f32 %v1185_v33, %v4244_v57  ;;  %v1191_v46 = vmul.f32 %v1181_v42, %v4251_v63  ;;  %2091 = vmatpush1.bf16.msra.mxu1 %v3863_v50  ;;  %v1570_v57 = vsel %vm653_vm6, %v1557_v52, %v1565_v58  ;;  %v1574_v63 = vsel %vm653_vm6, %v1565_v58, %v1557_v52  ;;  %v1497_v29 = vpop.permute.xlu0 %1496 }
 0x118   : >> { %2092 = vmatprep.subr.bf16.mxu1 %v3864_v41  ;;  %v1580_v54 = vmul.f32 %v1570_v57, %v4156_v43  ;;  %v1581_v59 = vmul.f32 %v1574_v63, %v4159_v44 }
 0x119   : >> { %v1559_v51 = vpop.permute.xlu1 %1558  ;;  %v3866_v30 = vpack.c.bf16 %v1191_v46, %v1189_v49  ;;  %v3867_v18 = vpack.c.bf16 %v1190_v16, %v1188_v48 }
 0x11b   : >> { %2093 = vmatpush1.bf16.msra.mxu1 %v3865_v62  ;;  %v1505_v33 = vpop.permute.xlu0 %1504 }
 0x11c   : >> { %2094 = vmatprep.subr.bf16.mxu1 %v3866_v30 }
 0x11d   : >> { %v1567_v34 = vpop.permute.xlu1 %1566 }
 0x11e   : >> { %v1571_v53 = vsel %vm653_vm6, %v1559_v51, %v1567_v34  ;;  %v1575_v55 = vsel %vm653_vm6, %v1567_v34, %v1559_v51 }
 0x11f   : >> { %v1582_v56 = vmul.f32 %v1571_v53, %v4156_v43  ;;  %v1583_v61 = vmul.f32 %v1575_v55, %v4159_v44  ;;  %2095 = vmatpush1.bf16.msra.mxu1 %v3867_v18 }
 0x120   : >> { %v1493_v50 = vpop.permute.xlu0 %1492 }
 0x121   : >> { %v1555_v0 = vpop.permute.xlu1 %1554  ;;  %v3868_v35 = vpack.c.bf16 %v1583_v61, %v1581_v59  ;;  %v3869_v48 = vpack.c.bf16 %v1582_v56, %v1580_v54 }
 0x123   : >> { %2096 = vmatprep.subr.bf16.mxu1 %v3868_v35  ;;  %v2073_v35 = vsel %vm435_vm10, 65535, %v3930_v20 }
 0x124   : >> { %2097 = vmatpush2.bf16.msra.mxu1 %v3869_v48  ;;  %v1501_v53 = vpop.permute.xlu0 %1500 }
 0x125   : >> { %v1563_v5 = vpop.permute.xlu1 %1562  ;;  %v1508_v56 = vsel %vm627_vm7, %v1493_v50, %v1501_v53  ;;  %v1512_v61 = vsel %vm627_vm7, %v1501_v53, %v1493_v50 }
 0x126   : >> { %v1569_v8 = vsel %vm653_vm6, %v1555_v0, %v1563_v5  ;;  %v1573_v9 = vsel %vm653_vm6, %v1563_v5, %v1555_v0  ;;  %v1516_v57 = vmul.f32 %v1508_v56, %v4188_v60  ;;  %v1517_v63 = vmul.f32 %v1512_v61, %v4194_v3 }
 0x127   : >> { %v1578_v14 = vmul.f32 %v1569_v8, %v4156_v43  ;;  %v1579_v12 = vmul.f32 %v1573_v9, %v4159_v44  ;;  %v1510_v43 = vsel %vm627_vm7, %v1497_v29, %v1505_v33  ;;  %v1514_v44 = vsel %vm627_vm7, %v1505_v33, %v1497_v29 }
 0x128   : >> { %v1520_v16 = vmul.f32 %v1510_v43, %v4188_v60  ;;  %v1521_v46 = vmul.f32 %v1514_v44, %v4194_v3  ;;  %v1437_v62 = vpop.permute.xlu0 %1436  ;;  %v3880_v56 = vpack.c.bf16 %v4091_v23, %v4093_v24 }
 0x129   : >> { %v1499_v19 = vpop.permute.xlu1 %1498  ;;  %v3870_v52 = vpack.c.bf16 %v1579_v12, %v1577_v17  ;;  %v3871_v54 = vpack.c.bf16 %v1578_v14, %v1576_v15  ;;  %v1740_v12 = vld [vmem:[#allocation6 + $0x100] sm:$0x11] }
 0x12a   : >> { %v3484_v29 = vcombine.low %v1740_v12, %v1740_v12 }
 0x12b   : >> { %2098 = vmatprep.subr.bf16.mxu1 %v3870_v52 }
 0x12c   : >> { %2099 = vmatpush2.bf16.msra.mxu1 %v3871_v54  ;;  %v1445_v9 = vpop.permute.xlu0 %1444 }
 0x12d   : >> { %v1507_v32 = vpop.permute.xlu1 %1506  ;;  %v1454_v14 = vsel %vm600_vm4, %v1445_v9, %v1437_v62 }
 0x12e   : >> { %v1511_v36 = vsel %vm627_vm7, %v1499_v19, %v1507_v32  ;;  %v1515_v42 = vsel %vm627_vm7, %v1507_v32, %v1499_v19  ;;  %v1461_v15 = vmul.f32 %v1454_v14, %v4144_v38  ;;  %v3485_v32 = vcombine.high %v1740_v12, %v1740_v12 }
 0x12f   : >> { %v1522_v45 = vmul.f32 %v1511_v36, %v4188_v60  ;;  %v1523_v47 = vmul.f32 %v1515_v42, %v4194_v3  ;;  %v2075_v42 = vand.u32 %v3484_v29, %v2073_v35  ;;  %v3684_v29 = vld [vmem:[%s6036_s3 + $0x4c] ss:$12 sps:$4 sm:$0xff]  }
 0x130   : >> { %v2078_v33 = vand.u32 %v3485_v32, %v2073_v35  ;;  %v3683_v32 = vld [vmem:[%s6036_s3 + $0x38] ss:$12 sps:$4 sm:$0xff]   ;;  %v3686_v35 = vld [vmem:[%s6036_s3 + $0x48] ss:$12 sps:$4 sm:$0xff]  }
 0x131   : >> { %v1495_v49 = vpop.permute.xlu1 %1494  ;;  %v3872_v0 = vpack.c.bf16 %v1523_v47, %v1521_v46  ;;  %v3873_v4 = vpack.c.bf16 %v1522_v45, %v1520_v16  ;;  %v1433_v36 = vpop.permute.xlu0 %1432 }
 0x132   : >> { %2203 = vmatprep.subr.bf16.mxu0 %v2078_v33  ;;  %v3690_v33 = vld [vmem:[%s6036_s3 + $0x60] ss:$12 sps:$4 sm:$0xff]  }
 0x133   : >> { %2100 = vmatprep.subr.bf16.mxu1 %v3872_v0  ;;  %2204 = vmatpush1.bf16.msra.mxu0 %v2075_v42  ;;  %v3687_v42 = vld [vmem:[%s6036_s3 + $0x50] ss:$12 sps:$4 sm:$0xff]  }
 0x134   : >> { %2101 = vmatpush2.bf16.msra.mxu1 %v3873_v4  ;;  %v3882_v4 = vpack.c.bf16 %v4103_v27, %v4105_v28 }
 0x135   : >> { %v1503_v51 = vpop.permute.xlu1 %1502  ;;  %v1441_v46 = vpop.permute.xlu0 %1440 }
 0x136   : >> { %v1509_v34 = vsel %vm627_vm7, %v1495_v49, %v1503_v51  ;;  %v1513_v41 = vsel %vm627_vm7, %v1503_v51, %v1495_v49  ;;  %v1448_v50 = vsel %vm600_vm4, %v1433_v36, %v1441_v46  ;;  %v1452_v51 = vsel %vm600_vm4, %v1441_v46, %v1433_v36  ;;  %v3688_v36 = vld [vmem:[%s6036_s3 + $0x64] ss:$12 sps:$4 sm:$0xff]   ;;  %v3696_v46 = vld [vmem:[%s6036_s3 + $0x94] ss:$12 sps:$4 sm:$0xff]  }
 0x137   : >> { %v1518_v55 = vmul.f32 %v1509_v34, %v4188_v60  ;;  %v1519_v58 = vmul.f32 %v1513_v41, %v4194_v3  ;;  %v1450_v3 = vsel %vm600_vm4, %v1437_v62, %v1445_v9  ;;  %v1456_v52 = vmul.f32 %v1448_v50, %v4141_v37 }
 0x138   : >> { %v1460_v11 = vmul.f32 %v1450_v3, %v4141_v37  ;;  %v1457_v34 = vmul.f32 %v1452_v51, %v4144_v38 }
 0x139   : >> { %v1439_v59 = vpop.permute.xlu1 %1438  ;;  %v3874_v17 = vpack.c.bf16 %v1519_v58, %v1517_v63  ;;  %v3875_v18 = vpack.c.bf16 %v1518_v55, %v1516_v57  ;;  %v1617_v53 = vpop.permute.xlu0 %1616 }
 0x13b   : >> { %2102 = vmatprep.subr.bf16.mxu1 %v3874_v17  ;;  %v3675_v17 = vld [vmem:[%s6036_s3 + $0x8] ss:$12 sps:$4 sm:$0xff]  }
 0x13c   : >> { %2103 = vmatpush2.bf16.msra.mxu1 %v3875_v18  ;;  %v3679_v18 = vld [vmem:[%s6036_s3 + $0x20] ss:$12 sps:$4 sm:$0xff]  }
 0x13d   : >> { %v1447_v5 = vpop.permute.xlu1 %1446  ;;  %v1625_v54 = vpop.permute.xlu0 %1624 }
 0x13e   : >> { %v1451_v30 = vsel %vm600_vm4, %v1439_v59, %v1447_v5  ;;  %v1455_v8 = vsel %vm600_vm4, %v1447_v5, %v1439_v59  ;;  %v1630_v62 = vsel %vm680_vm5, %v1617_v53, %v1625_v54  ;;  %v1634_v23 = vsel %vm680_vm5, %v1625_v54, %v1617_v53 }
 0x13f   : >> { %v1462_v10 = vmul.f32 %v1451_v30, %v4141_v37  ;;  %v1463_v60 = vmul.f32 %v1455_v8, %v4144_v38  ;;  %v1640_v24 = vmul.f32 %v1630_v62, %v4148_v39  ;;  %v1641_v0 = vmul.f32 %v1634_v23, %v4152_v40  ;;  %v3702_v23 = vld [vmem:[%s6036_s3 + $0xa8] ss:$12 sps:$4 sm:$0xff]  }
 0x140   : >> { %v3885_v8 = vpack.c.bf16 %v4097_v25, %v4099_v26  ;;  %v3672_v25 = vld [vmem:[%s6036_s3] ss:$12 sps:$4 sm:$0xff]  }
 0x141   : >> { %v1435_v19 = vpop.permute.xlu1 %1434  ;;  %v3876_v45 = vpack.c.bf16 %v1463_v60, %v1461_v15  ;;  %v3877_v47 = vpack.c.bf16 %v1462_v10, %v1460_v11  ;;  %v3676_v11 = vld [vmem:[%s6036_s3 + $0x1c] ss:$12 sps:$4 sm:$0xff]  }
 0x143   : >> { %2104 = vmatprep.subr.bf16.mxu1 %v3876_v45  ;;  %v3692_v45 = vld [vmem:[%s6036_s3 + $0x7c] ss:$12 sps:$4 sm:$0xff]  }
 0x144   : >> { %2105 = vmatpush2.bf16.msra.mxu1 %v3877_v47 }
 0x145   : >> { %v1443_v43 = vpop.permute.xlu1 %1442 }
 0x146   : >> { %v1449_v44 = vsel %vm600_vm4, %v1435_v19, %v1443_v43  ;;  %v1453_v16 = vsel %vm600_vm4, %v1443_v43, %v1435_v19  ;;  %v3682_v19 = vld [vmem:[%s6036_s3 + $0x30] ss:$12 sps:$4 sm:$0xff]   ;;  %v3691_v43 = vld [vmem:[%s6036_s3 + $0x68] ss:$12 sps:$4 sm:$0xff]  }
 0x147   : >> { %v1458_v48 = vmul.f32 %v1449_v44, %v4141_v37  ;;  %v1459_v49 = vmul.f32 %v1453_v16, %v4144_v38  ;;  %v3881_v37 = vpack.c.bf16 %v4085_v21, %v4087_v22  ;;  %v1613_v22 = vpop.permute.xlu0 %1612  ;;  %v3694_v44 = vld [vmem:[%s6036_s3 + $0x78] ss:$12 sps:$4 sm:$0xff]  }
 0x149   : >> { %v1619_v41 = vpop.permute.xlu1 %1618  ;;  %v3878_v55 = vpack.c.bf16 %v1459_v49, %v1457_v34  ;;  %v3879_v58 = vpack.c.bf16 %v1458_v48, %v1456_v52 }
 0x14b   : >> { %2106 = vmatprep.subr.bf16.mxu1 %v3878_v55  ;;  %v1621_v10 = vpop.permute.xlu0 %1620  ;;  %v3698_v55 = vld [vmem:[%s6036_s3 + $0x90] ss:$12 sps:$4 sm:$0xff]  }
 0x14c   : >> { %2107 = vmatpush2.bf16.msra.mxu1 %v3879_v58  ;;  %v1628_v27 = vsel %vm680_vm5, %v1613_v22, %v1621_v10  ;;  %v1632_v28 = vsel %vm680_vm5, %v1621_v10, %v1613_v22 }
 0x14d   : >> { %v1627_v61 = vpop.permute.xlu1 %1626  ;;  %2108 = vmatprep.subr.bf16.mxu1 %v3880_v56  ;;  %v1636_v12 = vmul.f32 %v1628_v27, %v4148_v39  ;;  %v1637_v13 = vmul.f32 %v1632_v28, %v4152_v40  ;;  %v3700_v56 = vld [vmem:[%s6036_s3 + $0xac] ss:$12 sps:$4 sm:$0xff]  }
 0x14e   : >> { %v1631_v57 = vsel %vm680_vm5, %v1619_v41, %v1627_v61  ;;  %v1635_v63 = vsel %vm680_vm5, %v1627_v61, %v1619_v41  ;;  %v3695_v41 = vld [vmem:[%s6036_s3 + $0x80] ss:$12 sps:$4 sm:$0xff]  }
 0x14f   : >> { %v1642_v38 = vmul.f32 %v1631_v57, %v4148_v39  ;;  %v1643_v59 = vmul.f32 %v1635_v63, %v4152_v40 }
 0x150   : >> { %2109 = vmatpush2.bf16.msra.mxu1 %v3881_v37 }
 0x151   : >> { %v1615_v21 = vpop.permute.xlu1 %1614  ;;  %v3883_v5 = vpack.c.bf16 %v1642_v38, %v1640_v24  ;;  %v3884_v30 = vpack.c.bf16 %v1643_v59, %v1641_v0  ;;  %2110 = vmatprep.subr.bf16.mxu1 %v3882_v4  ;;  %v3699_v59 = vld [vmem:[%s6036_s3 + $0x98] ss:$12 sps:$4 sm:$0xff]  }
 0x153   : >> { %2205 = vmatprep.subr.bf16.mxu0 %v3884_v30 }
 0x154   : >> { %2206 = vmatpush1.bf16.msra.mxu0 %v3883_v5  ;;  %2111 = vmatpush2.bf16.msra.mxu1 %v3885_v8  ;;  %v3703_v8 = vld [vmem:[%s6036_s3 + $0xb0] ss:$12 sps:$4 sm:$0xff]  }
 0x155   : >> { %v1623_v9 = vpop.permute.xlu1 %1622 }
 0x156   : >> { %v1629_v60 = vsel %vm680_vm5, %v1615_v21, %v1623_v9  ;;  %v1633_v3 = vsel %vm680_vm5, %v1623_v9, %v1615_v21 }
 0x157   : >> { %v1638_v26 = vmul.f32 %v1629_v60, %v4148_v39  ;;  %v1639_v14 = vmul.f32 %v1633_v3, %v4152_v40  ;;  %2113 = vmatmul.mubr.bf16.vlgmr.msra.gmra.mxu1 %v3672_v25  ;;  %v3678_v39 = vld [vmem:[%s6036_s3 + $0x18] ss:$12 sps:$4 sm:$0xff]   ;;  %v3680_v40 = vld [vmem:[%s6036_s3 + $0x34] ss:$12 sps:$4 sm:$0xff]  }
 0x158   : >> { %2122 = vmatprep.mubr.bf16.mxu1 %v3676_v11 }
 0x159   : >> { %v3886_v31 = vpack.c.bf16 %v1638_v26, %v1636_v12  ;;  %v3887_v15 = vpack.c.bf16 %v1639_v14, %v1637_v13 }
 0x15b   : >> { %2207 = vmatprep.subr.bf16.mxu0 %v3887_v15 }
 0x15c   : >> { %2208 = vmatpush1.bf16.msra.mxu0 %v3886_v31 }
 0x15f   : >> { %3486 = vmatmul.mubr.msk.bf16.vlgmr.msra.gmra.mxu0 %vm2046_vm15, %v3675_v17  ;;  %2123 = vmatmul.mubr.bf16.gmra.mxu1 %v3678_v39 }
 0x160   : >> { %2235 = vmatprep.mubr.bf16.mxu0 %v3930_v20  ;;  %2132 = vmatprep.mubr.bf16.mxu1 %v3680_v40 }
 0x167   : >> { %3487 = vmatmul.mubr.msk.bf16.gmra.mxu0 %vm2046_vm15, %v3679_v18  ;;  %2133 = vmatmul.mubr.bf16.gmra.mxu1 %v3682_v19 }
 0x168   : >> { %2245 = vmatprep.mubr.bf16.mxu0 %v3930_v20  ;;  %2142 = vmatprep.mubr.bf16.mxu1 %v3684_v29 }
 0x16f   : >> { %3488 = vmatmul.mubr.msk.bf16.gmra.mxu0 %vm2046_vm15, %v3683_v32  ;;  %2143 = vmatmul.mubr.bf16.gmra.mxu1 %v3686_v35 }
 0x170   : >> { %2255 = vmatprep.mubr.bf16.mxu0 %v3930_v20  ;;  %2152 = vmatprep.mubr.bf16.mxu1 %v3688_v36 }
 0x177   : >> { %3489 = vmatmul.mubr.msk.bf16.gmra.mxu0 %vm2046_vm15, %v3687_v42  ;;  %2153 = vmatmul.mubr.bf16.gmra.mxu1 %v3690_v33 }
 0x178   : >> { %2265 = vmatprep.mubr.bf16.mxu0 %v3930_v20  ;;  %2162 = vmatprep.mubr.bf16.mxu1 %v3692_v45 }
 0x17f   : >> { %3490 = vmatmul.mubr.msk.bf16.gmra.mxu0 %vm2046_vm15, %v3691_v43  ;;  %2163 = vmatmul.mubr.bf16.gmra.mxu1 %v3694_v44 }
 0x180   : >> { %2275 = vmatprep.mubr.bf16.mxu0 %v3930_v20  ;;  %2172 = vmatprep.mubr.bf16.mxu1 %v3696_v46 }
 0x187   : >> { %3491 = vmatmul.mubr.msk.bf16.gmra.mxu0 %vm2046_vm15, %v3695_v41  ;;  %2173 = vmatmul.mubr.bf16.gmra.mxu1 %v3698_v55 }
 0x188   : >> { %2285 = vmatprep.mubr.bf16.mxu0 %v3930_v20  ;;  %2182 = vmatprep.mubr.bf16.mxu1 %v3700_v56 }
 0x18f   : >> { %3492 = vmatmul.mubr.msk.bf16.gmra.mxu0 %vm2046_vm15, %v3699_v59  ;;  %2183 = vmatmul.mubr.bf16.gmra.mxu1 %v3702_v23 }
 0x190   : >> { %2295 = vmatprep.mubr.bf16.mxu0 %v3930_v20 }
 0x195   : >> { %v4631_v47 = vpop.f32.mrf.mxu0 }
 0x197   : >> { %v4639_v16 = vpop.f32.mrf.mxu0  ;;  %3493 = vmatmul.mubr.msk.bf16.gmra.mxu0 %vm2046_vm15, %v3703_v8 }
 0x198   : >> { %v936_v48 = vadd.f32 %v4639_v16, %v4631_v47 }
 0x199   : >> { %v4646_v49 = vpop.f32.mrf.mxu0 }
 0x19a   : >> { %v937_v50 = vadd.f32 %v936_v48, %v4646_v49 }
 0x19b   : >> { %v4651_v51 = vpop.f32.mrf.mxu0 }
 0x19c   : >> { %v938_v52 = vadd.f32 %v937_v50, %v4651_v51 }
 0x19d   : >> { %v4654_v34 = vpop.f32.mrf.mxu0 }
 0x19e   : >> { %v939_v53 = vadd.f32 %v938_v52, %v4654_v34 }
 0x19f   : >> { %v4663_v58 = vpop.f32.mrf.mxu0 }
 0x1a0   : >> { %v940_v61 = vadd.f32 %v939_v53, %v4663_v58 }
 0x1a1   : >> { %v4669_v57 = vpop.f32.mrf.mxu0 }
 0x1a2   : >> { %v941_v63 = vadd.f32 %v940_v61, %v4669_v57 }
 0x1a3   : >> { %v4674_v54 = vpop.f32.mrf.mxu0 }
 0x1a4   : >> { %v942_v37 = vadd.f32 %v941_v63, %v4674_v54 }
 0x1a5   : >> { %v4677_v38 = vpop.f32.mrf.mxu0 }
 0x1a6   : >> { %v943_v62 = vadd.f32 %v942_v37, %v4677_v38 }
 0x1a7   : >> { %v4686_v24 = vpop.f32.mrf.mxu0 }
 0x1a8   : >> { %v944_v0 = vadd.f32 %v943_v62, %v4686_v24 }
 0x1a9   : >> { %v4689_v4 = vpop.f32.mrf.mxu0 }
 0x1aa   : >> { %v945_v21 = vadd.f32 %v944_v0, %v4689_v4 }
 0x1ab   : >> { %v4694_v22 = vpop.f32.mrf.mxu0 }
 0x1ac   : >> { %v946_v5 = vadd.f32 %v945_v21, %v4694_v22 }
 0x1ad   : >> { %v4697_v30 = vpop.f32.mrf.mxu0 }
 0x1ae   : >> { %v947_v9 = vadd.f32 %v946_v5, %v4697_v30 }
 0x1af   : >> { %v4703_v10 = vpop.f32.mrf.mxu0 }
 0x1b0   : >> { %v948_v60 = vadd.f32 %v947_v9, %v4703_v10 }
 0x1b1   : >> { %v4706_v3 = vpop.f32.mrf.mxu0 }
 0x1b2   : >> { %v949_v20 = vadd.f32 %v948_v60, %v4706_v3 }
 0x1b3   : >> { %v4710_v27 = vpop.f32.mrf.mxu0 }
 0x1b4   : >> { %v950_v28 = vadd.f32 %v949_v20, %v4710_v27 }
 0x1b5   : >> { %v4713_v25 = vpop.f32.mrf.mxu0 }
 0x1b6   : >> { %v951_v26 = vadd.f32 %v950_v28, %v4713_v25 }
 0x1b7   : >> { %v4716_v14 = vpop.f32.mrf.mxu0 }
 0x1b8   : >> { %v952_v12 = vadd.f32 %v951_v26, %v4716_v14 }
 0x1b9   : >> { %v4719_v13 = vpop.f32.mrf.mxu0 }
 0x1ba   : >> { %v953_v11 = vadd.f32 %v952_v12, %v4719_v13 }
 0x1bb   : >> { %v4722_v31 = vpop.f32.mrf.mxu0 }
 0x1bc   : >> { %v954_v15 = vadd.f32 %v953_v11, %v4722_v31 }
 0x1bd   : >> { %v4725_v17 = vpop.f32.mrf.mxu0 }
 0x1be   : >> { %v955_v39 = vadd.f32 %v954_v15, %v4725_v17 }
 0x1bf   : >> { %v4728_v40 = vpop.f32.mrf.mxu0 }
 0x1c0   : >> { %v956_v18 = vadd.f32 %v955_v39, %v4728_v40 }
 0x1c1   : >> { %v4731_v19 = vpop.f32.mrf.mxu0 }
 0x1c2   : >> { %v957_v29 = vadd.f32 %v956_v18, %v4731_v19 }
 0x1c3   : >> { %v4734_v32 = vpop.f32.mrf.mxu0 }
 0x1c4   : >> { %v958_v35 = vadd.f32 %v957_v29, %v4734_v32 }
 0x1c5   : >> { %v4737_v36 = vpop.f32.mrf.mxu0 }
 0x1c6   : >> { %v959_v42 = vadd.f32 %v958_v35, %v4737_v36 }
 0x1c7   : >> { %v4740_v33 = vpop.f32.mrf.mxu0 }
 0x1c8   : >> { %v960_v45 = vadd.f32 %v959_v42, %v4740_v33 }
 0x1c9   : >> { %v4743_v43 = vpop.f32.mrf.mxu0 }
 0x1ca   : >> { %v961_v44 = vadd.f32 %v960_v45, %v4743_v43 }
 0x1cb   : >> { %v4746_v46 = vpop.f32.mrf.mxu0 }
 0x1cc   : >> { %v962_v48 = vadd.f32 %v961_v44, %v4746_v46 }
 0x1cd   : >> { %v4749_v50 = vpop.f32.mrf.mxu0 }
 0x1ce   : >> { %v963_v52 = vadd.f32 %v962_v48, %v4749_v50 }
 0x1cf   : >> { %v4752_v41 = vpop.f32.mrf.mxu0 }
 0x1d0   : >> { %v964_v53 = vadd.f32 %v963_v52, %v4752_v41 }
 0x1d1   : >> { %v4755_v55 = vpop.f32.mrf.mxu0 }
 0x1d2   : >> { %v965_v56 = vadd.f32 %v964_v53, %v4755_v55 }
 0x1d3   : >> { %v4758_v61 = vpop.f32.mrf.mxu0 }
 0x1d4   : >> { %v966_v63 = vadd.f32 %v965_v56, %v4758_v61 }
 0x1d6   : >> { %967 = vadd.xlane.f32.xlu0 %v966_v63 }
 0x217   : >> { %v2114_v37 = vpop.f32.mrf.mxu1 }
 0x219   : >> { %v2116_v62 = vpop.f32.mrf.mxu1 }
 0x21b   : >> { %v2118_v5 = vpop.f32.mrf.mxu1 }
 0x21d   : >> { %v2120_v20 = vpop.f32.mrf.mxu1 }
 0x21f   : >> { %v2227_v59 = vpop.f32.mrf.mxu0  ;;  %v2124_v18 = vpop.f32.mrf.mxu1 }
 0x220   : >> { %v4761_v0 = vadd.f32 %v2227_v59, %v2114_v37 }
 0x221   : >> { %v2229_v23 = vpop.f32.mrf.mxu0  ;;  %v2126_v48 = vpop.f32.mrf.mxu1 }
 0x222   : >> { %v4763_v21 = vadd.f32 %v2229_v23, %v2116_v62 }
 0x223   : >> { %v2231_v8 = vpop.f32.mrf.mxu0  ;;  %v2128_v62 = vpop.f32.mrf.mxu1 }
 0x224   : >> { %v2338_v9 = vadd.f32 %v4763_v21, %v4761_v0  ;;  %v4767_v60 = vadd.f32 %v2231_v8, %v2118_v5 }
 0x225   : >> { %v2233_v28 = vpop.f32.mrf.mxu0  ;;  %v2130_v8 = vpop.f32.mrf.mxu1 }
 0x226   : >> { %v2339_v11 = vadd.f32 %v2338_v9, %v4767_v60  ;;  %v4770_v15 = vadd.f32 %v2233_v28, %v2120_v20 }
 0x227   : >> { %v2237_v29 = vpop.f32.mrf.mxu0 }
 0x228   : >> { %v2340_v42 = vadd.f32 %v2339_v11, %v4770_v15  ;;  %v4773_v45 = vadd.f32 %v2237_v29, %v2124_v18 }
 0x229   : >> { %v2239_v52 = vpop.f32.mrf.mxu0 }
 0x22a   : >> { %v2341_v56 = vadd.f32 %v2340_v42, %v4773_v45  ;;  %v4776_v63 = vadd.f32 %v2239_v52, %v2126_v48 }
 0x22b   : >> { %v2241_v23 = vpop.f32.mrf.mxu0 }
 0x22c   : >> { %v2342_v59 = vadd.f32 %v2341_v56, %v4776_v63  ;;  %v4779_v5 = vadd.f32 %v2241_v23, %v2128_v62 }
 0x22d   : >> { %v2243_v9 = vpop.f32.mrf.mxu0 }
 0x22e   : >> { %v2343_v20 = vadd.f32 %v2342_v59, %v4779_v5  ;;  %v4782_v28 = vadd.f32 %v2243_v9, %v2130_v8 }
 0x230   : >> { %v2344_v11 = vadd.f32 %v2343_v20, %v4782_v28 }
 0x25f   : >> { %v968_v26 = vpop.xlane.xlu0 %967 }
 0x260   : >> { %v969_v12 = vrot.slane %v968_v26, 4 }
 0x262   : >> { %v970_v39 = vadd.f32 %v969_v12, %v968_v26  ;;  %v2134_v26 = vpop.f32.mrf.mxu1  ;;  %v2247_v12 = vpop.f32.mrf.mxu0 }
 0x264   : >> { %v971_v35 = vrot.slane %v970_v39, 2  ;;  %v2136_v18 = vpop.f32.mrf.mxu1  ;;  %v2249_v29 = vpop.f32.mrf.mxu0 }
 0x265   : >> { %v4788_v42 = vadd.f32 %v2249_v29, %v2136_v18 }
 0x266   : >> { %v972_v44 = vadd.f32 %v971_v35, %v970_v39  ;;  %v4785_v39 = vadd.f32 %v2247_v12, %v2134_v26  ;;  %v2251_v48 = vpop.f32.mrf.mxu0 }
 0x268   : >> { %v973_v53 = vrot.slane %v972_v44, 1  ;;  %v2345_v35 = vadd.f32 %v2344_v11, %v4785_v39 }
 0x26a   : >> { %v974_v37 = vadd.f32 %v973_v53, %v972_v44  ;;  %v2138_v44 = vpop.f32.mrf.mxu1  ;;  %v2346_v52 = vadd.f32 %v2345_v35, %v4788_v42 }
 0x26b   : >> { %v4791_v53 = vadd.f32 %v2251_v48, %v2138_v44 }
 0x26c   : >> { %3573 = vpush %v974_v37  ;;  %v2140_v56 = vpop.f32.mrf.mxu1  ;;  %v2253_v37 = vpop.f32.mrf.mxu0 }
 0x26d   : >> { %v2347_v59 = vadd.f32 %v2346_v52, %v4791_v53  ;;  %v4794_v62 = vadd.f32 %v2253_v37, %v2140_v56 }
 0x26e   : >> { %v2144_v23 = vpop.f32.mrf.mxu1  ;;  %v2257_v8 = vpop.f32.mrf.mxu0 }
 0x26f   : >> { %v2348_v9 = vadd.f32 %v2347_v59, %v4794_v62  ;;  %v4797_v20 = vadd.f32 %v2257_v8, %v2144_v23 }
 0x270   : >> { %v2146_v26 = vpop.f32.mrf.mxu1  ;;  %v2259_v12 = vpop.f32.mrf.mxu0 }
 0x271   : >> { %v2349_v11 = vadd.f32 %v2348_v9, %v4797_v20  ;;  %v4800_v18 = vadd.f32 %v2259_v12, %v2146_v26 }
 0x272   : >> { %v2148_v29 = vpop.f32.mrf.mxu1  ;;  %v2261_v35 = vpop.f32.mrf.mxu0 }
 0x273   : >> { %v2350_v44 = vadd.f32 %v2349_v11, %v4800_v18  ;;  %v4803_v48 = vadd.f32 %v2261_v35, %v2148_v29 }
 0x274   : >> { %v2150_v52 = vpop.f32.mrf.mxu1  ;;  %v2263_v56 = vpop.f32.mrf.mxu0 }
 0x275   : >> { %6120 = vst [vmem:[#allocation11_spill] sm:$0xff] %v4803_v48  ;;  %v2351_v37 = vadd.f32 %v2350_v44, %v4803_v48  ;;  %v4806_v1 = vadd.f32 %v2263_v56, %v2150_v52 }
 0x276   : >> { %v2154_v59 = vpop.f32.mrf.mxu1  ;;  %v2267_v23 = vpop.f32.mrf.mxu0 }
 0x277   : >> { %6121 = vst [vmem:[#allocation12_spill] sm:$0xff] %v4806_v1  ;;  %v2352_v8 = vadd.f32 %v2351_v37, %v4806_v1  ;;  %v4809_v2 = vadd.f32 %v2267_v23, %v2154_v59 }
 0x278   : >> { %v2156_v9 = vpop.f32.mrf.mxu1  ;;  %v2269_v26 = vpop.f32.mrf.mxu0 }
 0x279   : >> { %6122 = vst [vmem:[#allocation13_spill] sm:$0xff] %v4809_v2  ;;  %v2353_v12 = vadd.f32 %v2352_v8, %v4809_v2  ;;  %v4812_v6 = vadd.f32 %v2269_v26, %v2156_v9 }
 0x27a   : >> { %v2158_v11 = vpop.f32.mrf.mxu1  ;;  %v2271_v29 = vpop.f32.mrf.mxu0 }
 0x27b   : >> { %6123 = vst [vmem:[#allocation14_spill] sm:$0xff] %v4812_v6  ;;  %v2354_v35 = vadd.f32 %v2353_v12, %v4812_v6  ;;  %v4815_v7 = vadd.f32 %v2271_v29, %v2158_v11 }
 0x27c   : >> { %v2160_v44 = vpop.f32.mrf.mxu1  ;;  %v2273_v52 = vpop.f32.mrf.mxu0 }
 0x27d   : >> { %6124 = vst [vmem:[#allocation15_spill] sm:$0xff] %v4815_v7  ;;  %v2355_v56 = vadd.f32 %v2354_v35, %v4815_v7  ;;  %v4818_v48 = vadd.f32 %v2273_v52, %v2160_v44 }
 0x27e   : >> { %v2164_v37 = vpop.f32.mrf.mxu1  ;;  %v2277_v59 = vpop.f32.mrf.mxu0 }
 0x27f   : >> { %6125 = vst [vmem:[#allocation16_spill] sm:$0xff] %v4818_v48  ;;  %v2356_v23 = vadd.f32 %v2355_v56, %v4818_v48  ;;  %v4821_v1 = vadd.f32 %v2277_v59, %v2164_v37 }
 0x280   : >> { %v2166_v8 = vpop.f32.mrf.mxu1  ;;  %v2279_v9 = vpop.f32.mrf.mxu0 }
 0x281   : >> { %6126 = vst [vmem:[#allocation17_spill] sm:$0xff] %v4821_v1  ;;  %v2357_v26 = vadd.f32 %v2356_v23, %v4821_v1  ;;  %v4824_v2 = vadd.f32 %v2279_v9, %v2166_v8 }
 0x282   : >> { %v2168_v12 = vpop.f32.mrf.mxu1  ;;  %v2281_v11 = vpop.f32.mrf.mxu0 }
 0x283   : >> { %6127 = vst [vmem:[#allocation18_spill] sm:$0xff] %v4824_v2  ;;  %v2358_v29 = vadd.f32 %v2357_v26, %v4824_v2  ;;  %v4827_v6 = vadd.f32 %v2281_v11, %v2168_v12 }
 0x284   : >> { %v2170_v35 = vpop.f32.mrf.mxu1  ;;  %v2283_v44 = vpop.f32.mrf.mxu0 }
 0x285   : >> { %v2359_v52 = vadd.f32 %v2358_v29, %v4827_v6  ;;  %v4830_v7 = vadd.f32 %v2283_v44, %v2170_v35 }
 0x286   : >> { %v2174_v56 = vpop.f32.mrf.mxu1  ;;  %v2287_v37 = vpop.f32.mrf.mxu0 }
 0x287   : >> { %6128 = vst [vmem:[#allocation19_spill] sm:$0xff] %v4830_v7  ;;  %v2360_v59 = vadd.f32 %v2359_v52, %v4830_v7  ;;  %v4833_v48 = vadd.f32 %v2287_v37, %v2174_v56 }
 0x288   : >> { %v2176_v23 = vpop.f32.mrf.mxu1  ;;  %v2289_v8 = vpop.f32.mrf.mxu0 }
 0x289   : >> { %v2361_v9 = vadd.f32 %v2360_v59, %v4833_v48  ;;  %v4836_v1 = vadd.f32 %v2289_v8, %v2176_v23 }
 0x28a   : >> { %v2178_v26 = vpop.f32.mrf.mxu1  ;;  %v2291_v12 = vpop.f32.mrf.mxu0 }
 0x28b   : >> { %v2362_v11 = vadd.f32 %v2361_v9, %v4836_v1  ;;  %v4839_v2 = vadd.f32 %v2291_v12, %v2178_v26 }
 0x28c   : >> { %v2180_v29 = vpop.f32.mrf.mxu1  ;;  %v2293_v35 = vpop.f32.mrf.mxu0 }
 0x28d   : >> { %6129 = vst [vmem:[#allocation20_spill] sm:$0xff] %v4839_v2  ;;  %v2363_v44 = vadd.f32 %v2362_v11, %v4839_v2  ;;  %v4842_v52 = vadd.f32 %v2293_v35, %v2180_v29 }
 0x28e   : >> { %v2184_v56 = vpop.f32.mrf.mxu1  ;;  %v2297_v37 = vpop.f32.mrf.mxu0 }
 0x28f   : >> { %6130 = vst [vmem:[#allocation21_spill] sm:$0xff] %v4842_v52  ;;  %v2364_v59 = vadd.f32 %v2363_v44, %v4842_v52  ;;  %v4847_v23 = vadd.f32 %v2297_v37, %v2184_v56 }
 0x290   : >> { %v2186_v8 = vpop.f32.mrf.mxu1  ;;  %v2299_v9 = vpop.f32.mrf.mxu0 }
 0x291   : >> { %6131 = vst [vmem:[#allocation22_spill] sm:$0xff] %v4847_v23  ;;  %v2365_v11 = vadd.f32 %v2364_v59, %v4847_v23  ;;  %v4858_v29 = vadd.f32 %v2299_v9, %v2186_v8 }
 0x292   : >> { %v2188_v35 = vpop.f32.mrf.mxu1  ;;  %v2301_v2 = vpop.f32.mrf.mxu0 }
 0x293   : >> { %v2366_v37 = vadd.f32 %v2365_v11, %v4858_v29 }
 0x294   : >> { %v2190_v8 = vpop.f32.mrf.mxu1  ;;  %v2303_v9 = vpop.f32.mrf.mxu0 }
 0x295   : >> { %v4882_v52 = vadd.f32 %v2303_v9, %v2190_v8 }
 0x29d   : >> { %s3574_s26 = spop %3573 }
 0x29e   : >> { %s978_s10 = smul.f32 3.0517578e-05, %s3574_s26 }
 0x2a0   : >> { %v4844_v7 = vstv %s978_s10 }
 0x2a1   : >> { %v4851_v26 = vsub.f32 %v4631_v47, %v4844_v7  ;;  %v4855_v12 = vsub.f32 %v4639_v16, %v4844_v7  ;;  %v4862_v44 = vsub.f32 %v4646_v49, %v4844_v7  ;;  %v4869_v16 = vadd.f32 %v2301_v2, %v2188_v35 }
 0x2a2   : >> { %v4873_v59 = vsub.f32 %v4651_v51, %v4844_v7  ;;  %v4877_v49 = vsub.f32 %v4654_v34, %v4844_v7  ;;  %v4886_v2 = vsub.f32 %v4663_v58, %v4844_v7  ;;  %v4893_v34 = vsub.f32 %v4669_v57, %v4844_v7 }
 0x2a3   : >> { %6132 = vst [vmem:[#allocation23_spill] sm:$0xff] %v4851_v26  ;;  %6133 = vst [vmem:[#allocation24_spill] sm:$0xff] %v4855_v12  ;;  %v1012_v56 = vmul.f32 %v4851_v26, %v4851_v26  ;;  %v1013_v47 = vmul.f32 %v4855_v12, %v4855_v12  ;;  %v1014_v26 = vmul.f32 %v4862_v44, %v4862_v44 }
 0x2a4   : >> { %v2367_v12 = vadd.f32 %v2366_v37, %v4869_v16  ;;  %v1015_v51 = vmul.f32 %v4873_v59, %v4873_v59  ;;  %v4899_v37 = vsub.f32 %v4674_v54, %v4844_v7  ;;  %v1017_v58 = vmul.f32 %v4886_v2, %v4886_v2 }
 0x2a5   : >> { %v1044_v23 = vadd.f32 %v1013_v47, %v1012_v56  ;;  %v1016_v56 = vmul.f32 %v4877_v49, %v4877_v49  ;;  %v1018_v57 = vmul.f32 %v4893_v34, %v4893_v34 }
 0x2a6   : >> { %v2368_v35 = vadd.f32 %v2367_v12, %v4882_v52  ;;  %v4911_v12 = vsub.f32 %v4686_v24, %v4844_v7  ;;  %v1019_v54 = vmul.f32 %v4899_v37, %v4899_v37 }
 0x2a7   : >> { %v1045_v11 = vadd.f32 %v1044_v23, %v1014_v26  ;;  %v4905_v23 = vsub.f32 %v4677_v38, %v4844_v7 }
 0x2a8   : >> { %2369 = vadd.xlane.f32.xlu0 %v2368_v35  ;;  %v4923_v35 = vsub.f32 %v4694_v22, %v4844_v7  ;;  %v1021_v24 = vmul.f32 %v4911_v12, %v4911_v12 }
 0x2a9   : >> { %v1046_v47 = vadd.f32 %v1045_v11, %v1015_v51  ;;  %v4917_v51 = vsub.f32 %v4689_v4, %v4844_v7  ;;  %v1020_v38 = vmul.f32 %v4905_v23, %v4905_v23 }
 0x2aa   : >> { %v1023_v22 = vmul.f32 %v4923_v35, %v4923_v35 }
 0x2ab   : >> { %v1047_v8 = vadd.f32 %v1046_v47, %v1016_v56  ;;  %v4929_v47 = vsub.f32 %v4697_v30, %v4844_v7  ;;  %v1022_v4 = vmul.f32 %v4917_v51, %v4917_v51 }
 0x2ad   : >> { %v1048_v26 = vadd.f32 %v1047_v8, %v1017_v58  ;;  %v4935_v8 = vsub.f32 %v4703_v10, %v4844_v7  ;;  %v1024_v30 = vmul.f32 %v4929_v47, %v4929_v47 }
 0x2af   : >> { %v1049_v9 = vadd.f32 %v1048_v26, %v1018_v57  ;;  %v4941_v26 = vsub.f32 %v4706_v3, %v4844_v7  ;;  %v1025_v10 = vmul.f32 %v4935_v8, %v4935_v8 }
 0x2b1   : >> { %v1050_v11 = vadd.f32 %v1049_v9, %v1019_v54  ;;  %v4947_v9 = vsub.f32 %v4710_v27, %v4844_v7  ;;  %v1026_v3 = vmul.f32 %v4941_v26, %v4941_v26 }
 0x2b3   : >> { %v1051_v56 = vadd.f32 %v1050_v11, %v1020_v38  ;;  %v4953_v11 = vsub.f32 %v4713_v25, %v4844_v7  ;;  %v1027_v27 = vmul.f32 %v4947_v9, %v4947_v9 }
 0x2b5   : >> { %v1052_v58 = vadd.f32 %v1051_v56, %v1021_v24  ;;  %v4959_v56 = vsub.f32 %v4716_v14, %v4844_v7  ;;  %v1028_v25 = vmul.f32 %v4953_v11, %v4953_v11 }
 0x2b7   : >> { %v1053_v57 = vadd.f32 %v1052_v58, %v1022_v4  ;;  %v4965_v58 = vsub.f32 %v4719_v13, %v4844_v7  ;;  %v1029_v14 = vmul.f32 %v4959_v56, %v4959_v56 }
 0x2b9   : >> { %v1054_v54 = vadd.f32 %v1053_v57, %v1023_v22  ;;  %v4971_v57 = vsub.f32 %v4722_v31, %v4844_v7  ;;  %v1030_v13 = vmul.f32 %v4965_v58, %v4965_v58 }
 0x2bb   : >> { %v1055_v38 = vadd.f32 %v1054_v54, %v1024_v30  ;;  %v4977_v54 = vsub.f32 %v4725_v17, %v4844_v7  ;;  %v1031_v31 = vmul.f32 %v4971_v57, %v4971_v57 }
 0x2bd   : >> { %v1056_v24 = vadd.f32 %v1055_v38, %v1025_v10  ;;  %v4983_v38 = vsub.f32 %v4728_v40, %v4844_v7  ;;  %v1032_v17 = vmul.f32 %v4977_v54, %v4977_v54 }
 0x2bf   : >> { %v1057_v4 = vadd.f32 %v1056_v24, %v1026_v3  ;;  %v4989_v24 = vsub.f32 %v4731_v19, %v4844_v7  ;;  %v1033_v40 = vmul.f32 %v4983_v38, %v4983_v38 }
 0x2c1   : >> { %v1058_v22 = vadd.f32 %v1057_v4, %v1027_v27  ;;  %v4995_v4 = vsub.f32 %v4734_v32, %v4844_v7  ;;  %v1034_v19 = vmul.f32 %v4989_v24, %v4989_v24 }
 0x2c3   : >> { %v1059_v30 = vadd.f32 %v1058_v22, %v1028_v25  ;;  %v5001_v22 = vsub.f32 %v4737_v36, %v4844_v7  ;;  %v1035_v32 = vmul.f32 %v4995_v4, %v4995_v4 }
 0x2c5   : >> { %v1060_v10 = vadd.f32 %v1059_v30, %v1029_v14  ;;  %v5007_v30 = vsub.f32 %v4740_v33, %v4844_v7  ;;  %v1036_v36 = vmul.f32 %v5001_v22, %v5001_v22 }
 0x2c7   : >> { %v1061_v3 = vadd.f32 %v1060_v10, %v1030_v13  ;;  %v5013_v10 = vsub.f32 %v4743_v43, %v4844_v7  ;;  %v1037_v33 = vmul.f32 %v5007_v30, %v5007_v30 }
 0x2c9   : >> { %v1062_v27 = vadd.f32 %v1061_v3, %v1031_v31  ;;  %6134 = vst [vmem:[#allocation25_spill] sm:$0xff] %v5013_v10  ;;  %v5019_v3 = vsub.f32 %v4746_v46, %v4844_v7  ;;  %v1038_v43 = vmul.f32 %v5013_v10, %v5013_v10 }
 0x2cb   : >> { %v1063_v25 = vadd.f32 %v1062_v27, %v1032_v17  ;;  %6135 = vst [vmem:[#allocation26_spill] sm:$0xff] %v5019_v3  ;;  %v5025_v27 = vsub.f32 %v4749_v50, %v4844_v7  ;;  %v1039_v46 = vmul.f32 %v5019_v3, %v5019_v3 }
 0x2cd   : >> { %v1064_v14 = vadd.f32 %v1063_v25, %v1033_v40  ;;  %6136 = vst [vmem:[#allocation27_spill] sm:$0xff] %v5025_v27  ;;  %v5031_v25 = vsub.f32 %v4752_v41, %v4844_v7  ;;  %v1040_v50 = vmul.f32 %v5025_v27, %v5025_v27 }
 0x2cf   : >> { %v1065_v13 = vadd.f32 %v1064_v14, %v1034_v19  ;;  %6137 = vst [vmem:[#allocation28_spill] sm:$0xff] %v5031_v25  ;;  %v5037_v14 = vsub.f32 %v4755_v55, %v4844_v7  ;;  %v1041_v41 = vmul.f32 %v5031_v25, %v5031_v25 }
 0x2d1   : >> { %v1066_v31 = vadd.f32 %v1065_v13, %v1035_v32  ;;  %6138 = vst [vmem:[#allocation29_spill] sm:$0xff] %v5037_v14  ;;  %v5043_v13 = vsub.f32 %v4758_v61, %v4844_v7 }
 0x2d3   : >> { %v1067_v17 = vadd.f32 %v1066_v31, %v1036_v36  ;;  %6139 = vst [vmem:[#allocation30_spill] sm:$0xff] %v5043_v13  ;;  %v1042_v31 = vmul.f32 %v5037_v14, %v5037_v14  ;;  %v1043_v55 = vmul.f32 %v5043_v13, %v5043_v13 }
 0x2d5   : >> { %v1068_v40 = vadd.f32 %v1067_v17, %v1037_v33 }
 0x2d7   : >> { %v1069_v19 = vadd.f32 %v1068_v40, %v1038_v43 }
 0x2d9   : >> { %v1070_v32 = vadd.f32 %v1069_v19, %v1039_v46 }
 0x2db   : >> { %v1071_v36 = vadd.f32 %v1070_v32, %v1040_v50 }
 0x2dd   : >> { %v1072_v33 = vadd.f32 %v1071_v36, %v1041_v41 }
 0x2df   : >> { %v1073_v17 = vadd.f32 %v1072_v33, %v1042_v31 }
 0x2e1   : >> { %v1074_v43 = vadd.f32 %v1073_v17, %v1043_v55 }
 0x2e3   : >> { %1075 = vadd.xlane.f32.xlu1 %v1074_v43  ;;  %v5051_v43 = vld [vmem:[#allocation3] sm:$0xff] }
 0x331   : >> { %v2370_v25 = vpop.xlane.xlu0 %2369 }
 0x332   : >> { %v2371_v50 = vrot.slane %v2370_v25, 4 }
 0x334   : >> { %v2372_v32 = vadd.f32 %v2371_v50, %v2370_v25  ;;  %v2598_v25 = vld [vmem:[%s6037_s4] sm:$0xff] }
 0x336   : >> { %v2373_v36 = vrot.slane %v2372_v32, 2 }
 0x338   : >> { %v2374_v31 = vadd.f32 %v2373_v36, %v2372_v32  ;;  %v2602_v36 = vld [vmem:[%s6037_s4 + $0x20] sm:$0xff] }
 0x33a   : >> { %v2375_v33 = vrot.slane %v2374_v31, 1 }
 0x33c   : >> { %v2376_v17 = vadd.f32 %v2375_v33, %v2374_v31 }
 0x36c   : >> { %v1076_v40 = vpop.xlane.xlu1 %1075 }
 0x36d   : >> { %v1077_v46 = vrot.slane %v1076_v40, 4 }
 0x36f   : >> { %v1078_v19 = vadd.f32 %v1077_v46, %v1076_v40  ;;  %v5057_v40 = vld [vmem:[#allocation3 + $0x20] sm:$0xff]  ;;  %v2599_v46 = vld [vmem:[%s6037_s4 + $0x8] sm:$0xff] }
 0x371   : >> { %v1079_v27 = vrot.slane %v1078_v19, 2 }
 0x373   : >> { %v1080_v7 = vadd.f32 %v1079_v27, %v1078_v19  ;;  %v5053_v27 = vld [vmem:[#allocation3 + $0x18] sm:$0xff]  ;;  %v2600_v19 = vld [vmem:[%s6037_s4 + $0x10] sm:$0xff] }
 0x374   : >> { %v5075_v50 = vmul.f32 %v2599_v46, %v5053_v27 }
 0x375   : >> { %v1081_v61 = vrot.slane %v1080_v7, 1 }
 0x376   : >> { %6141 = vst [vmem:[#allocation32_spill] sm:$0xff] %v5075_v50 }
 0x377   : >> { %v1082_v3 = vadd.f32 %v1081_v61, %v1080_v7  ;;  %v2601_v7 = vld [vmem:[%s6037_s4 + $0x18] sm:$0xff]  ;;  %v5072_v61 = vmul.f32 %v2598_v25, %v5051_v43 }
 0x378   : >> { %v5086_v31 = vmul.f32 %v2601_v7, %v5057_v40  ;;  %v2604_v7 = vld [vmem:[%s6037_s4 + $0x30] sm:$0xff] }
 0x379   : >> { %3575 = vpush %v1082_v3  ;;  %v5055_v3 = vld [vmem:[#allocation3 + $0x10] sm:$0xff]  ;;  %6140 = vst [vmem:[#allocation31_spill] sm:$0xff] %v5072_v61  ;;  %v2614_v33 = vadd.f32 %v5075_v50, %v5072_v61  ;;  %v5108_v50 = vld [vmem:[#allocation3 + $0x38] sm:$0xff] }
 0x37a   : >> { %v5078_v32 = vmul.f32 %v2600_v19, %v5055_v3  ;;  %6144 = vst [vmem:[#allocation35_spill] sm:$0xff] %v5086_v31  ;;  %v5099_v19 = vld [vmem:[#allocation3 + $0x30] sm:$0xff]  ;;  %6149 = vst [vmem:[#allocation40_spill] sm:$0xff] %v5108_v50 }
 0x37b   : >> { %6147 = vst [vmem:[#allocation38_spill] sm:$0xff] %v5099_v19  ;;  %v5114_v61 = vmul.f32 %v2604_v7, %v5099_v19 }
 0x37c   : >> { %6142 = vst [vmem:[#allocation33_spill] sm:$0xff] %v5078_v32  ;;  %v2615_v46 = vadd.f32 %v2614_v33, %v5078_v32 }
 0x37d   : >> { %6150 = vst [vmem:[#allocation41_spill] sm:$0xff] %v5114_v61 }
 0x37e   : >> { %v2616_v14 = vadd.f32 %v2615_v46, %v5086_v31 }
 0x3aa   : >> { %s3576_s11 = spop %3575 }
 0x3ab   : >> { %s1086_s14 = smul.f32 3.0517578e-05, %s3576_s11 }
 0x3ad   : >> { %s1087_s15 = sadd.f32 1e-05, %s1086_s14 }
 0x3af   : >> { %v1088_v41 = vstv %s1087_s15 }
 0x3b0   : >> { %3704 = vrsqrt.f32 %v1088_v41  ;;  %v5080_v41 = vld [vmem:[#allocation3 + $0x28] sm:$0xff] }
 0x3b1   : >> { %6143 = vst [vmem:[#allocation34_spill] sm:$0xff] %v5080_v41  ;;  %v5096_v25 = vmul.f32 %v2602_v36, %v5080_v41  ;;  %v2605_v36 = vld [vmem:[%s6037_s4 + $0x38] sm:$0xff] }
 0x3b2   : >> { %v5118_v32 = vmul.f32 %v2605_v36, %v5108_v50 }
 0x3b3   : >> { %6146 = vst [vmem:[#allocation37_spill] sm:$0xff] %v5096_v25  ;;  %v2617_v33 = vadd.f32 %v2616_v14, %v5096_v25 }
 0x3b4   : >> { %6151 = vst [vmem:[#allocation42_spill] sm:$0xff] %v5118_v32 }
 0x3bd   : >> { %v3705_v55 = vpop.eup %3704 }
 0x3be   : >> { %3577 = vpush %v3705_v55  ;;  %v5090_v55 = vld [vmem:[#allocation3 + $0x8] sm:$0xff] }
 0x3bf   : >> { %3579 = vpush %v2376_v17  ;;  %6145 = vst [vmem:[#allocation36_spill] sm:$0xff] %v5090_v55  ;;  %v2603_v17 = vld [vmem:[%s6037_s4 + $0x28] sm:$0xff] }
 0x3c0   : >> { %v5105_v13 = vmul.f32 %v2603_v17, %v5090_v55 }
 0x3c2   : >> { %6148 = vst [vmem:[#allocation39_spill] sm:$0xff] %v5105_v13  ;;  %v2618_v10 = vadd.f32 %v2617_v33, %v5105_v13 }
 0x3c4   : >> { %v2619_v17 = vadd.f32 %v2618_v10, %v5114_v61 }
 0x3c6   : >> { %v2620_v46 = vadd.f32 %v2619_v17, %v5118_v32 }
 0x3c8   : >> { %2621 = vadd.xlane.f32.xlu1 %v2620_v46 }
 0x3ef   : >> { %s5123_s12 = spop %3577 }
 0x3f0   : >> { %s3580_s17 = spop %3579 }
 0x3f1   : >> { %s2380_s13 = smul.f32 3.0517578e-05, %s3580_s17 }
 0x3f3   : >> { %v5125_v31 = vstv %s2380_s13 }
 0x3f4   : >> { %v5129_v7 = vsub.f32 %v4761_v0, %v5125_v31  ;;  %v5133_v14 = vsub.f32 %v4763_v21, %v5125_v31  ;;  %v5137_v10 = vsub.f32 %v4767_v60, %v5125_v31  ;;  %v5145_v17 = vsub.f32 %v4770_v15, %v5125_v31 }
 0x3f5   : >> { %v5149_v0 = vsub.f32 %v4773_v45, %v5125_v31  ;;  %v5155_v60 = vsub.f32 %v4776_v63, %v5125_v31  ;;  %v5161_v15 = vsub.f32 %v4779_v5, %v5125_v31  ;;  %v5167_v25 = vsub.f32 %v4782_v28, %v5125_v31 }
 0x3f6   : >> { %v2414_v36 = vmul.f32 %v5129_v7, %v5129_v7  ;;  %v2415_v33 = vmul.f32 %v5133_v14, %v5133_v14  ;;  %v2416_v21 = vmul.f32 %v5137_v10, %v5137_v10  ;;  %v2417_v32 = vmul.f32 %v5145_v17, %v5145_v17 }
 0x3f7   : >> { %v2418_v45 = vmul.f32 %v5149_v0, %v5149_v0  ;;  %v2419_v63 = vmul.f32 %v5155_v60, %v5155_v60  ;;  %v2420_v5 = vmul.f32 %v5161_v15, %v5161_v15  ;;  %v2421_v28 = vmul.f32 %v5167_v25, %v5167_v25 }
 0x3f8   : >> { %v2446_v46 = vadd.f32 %v2415_v33, %v2414_v36  ;;  %v5173_v33 = vsub.f32 %v4785_v39, %v5125_v31 }
 0x3fa   : >> { %v2447_v61 = vadd.f32 %v2446_v46, %v2416_v21  ;;  %v5179_v46 = vsub.f32 %v4788_v42, %v5125_v31  ;;  %v2422_v39 = vmul.f32 %v5173_v33, %v5173_v33 }
 0x3fc   : >> { %v2448_v13 = vadd.f32 %v2447_v61, %v2417_v32  ;;  %6152 = vst [vmem:[#allocation43_spill] sm:$0xff] %v5179_v46  ;;  %v5185_v32 = vsub.f32 %v4791_v53, %v5125_v31  ;;  %v2423_v42 = vmul.f32 %v5179_v46, %v5179_v46 }
 0x3fe   : >> { %v2449_v36 = vadd.f32 %v2448_v13, %v2418_v45  ;;  %6153 = vst [vmem:[#allocation44_spill] sm:$0xff] %v5185_v32  ;;  %v5191_v45 = vsub.f32 %v4794_v62, %v5125_v31  ;;  %v2424_v53 = vmul.f32 %v5185_v32, %v5185_v32 }
 0x400   : >> { %v2450_v21 = vadd.f32 %v2449_v36, %v2419_v63  ;;  %6154 = vst [vmem:[#allocation45_spill] sm:$0xff] %v5191_v45  ;;  %v5197_v36 = vsub.f32 %v4797_v20, %v5125_v31  ;;  %v2425_v62 = vmul.f32 %v5191_v45, %v5191_v45 }
 0x402   : >> { %v2451_v61 = vadd.f32 %v2450_v21, %v2420_v5  ;;  %6155 = vst [vmem:[#allocation46_spill] sm:$0xff] %v5197_v36  ;;  %v5203_v21 = vsub.f32 %v4800_v18, %v5125_v31  ;;  %v2426_v20 = vmul.f32 %v5197_v36, %v5197_v36 }
 0x404   : >> { %v2452_v13 = vadd.f32 %v2451_v61, %v2421_v28  ;;  %6156 = vst [vmem:[#allocation47_spill] sm:$0xff] %v5203_v21  ;;  %v6157_v61 = vld [vmem:[#allocation11_spill] sm:$0xff]  ;;  %v2427_v18 = vmul.f32 %v5203_v21, %v5203_v21 }
 0x405   : >> { %v5209_v46 = vsub.f32 %v6157_v61, %v5125_v31  ;;  %v6163_v61 = vld [vmem:[#allocation14_spill] sm:$0xff] }
 0x406   : >> { %v2453_v63 = vadd.f32 %v2452_v13, %v2422_v39  ;;  %v6159_v13 = vld [vmem:[#allocation12_spill] sm:$0xff]  ;;  %v5227_v36 = vsub.f32 %v6163_v61, %v5125_v31  ;;  %v6167_v61 = vld [vmem:[#allocation17_spill] sm:$0xff] }
 0x407   : >> { %6158 = vst [vmem:[#allocation11_spill] sm:$0xff] %v5209_v46  ;;  %v5215_v32 = vsub.f32 %v6159_v13, %v5125_v31  ;;  %v6164_v13 = vld [vmem:[#allocation15_spill] sm:$0xff] }
 0x408   : >> { %v2454_v5 = vadd.f32 %v2453_v63, %v2423_v42  ;;  %v6161_v63 = vld [vmem:[#allocation13_spill] sm:$0xff]  ;;  %v5233_v21 = vsub.f32 %v6164_v13, %v5125_v31  ;;  %v6168_v13 = vld [vmem:[#allocation18_spill] sm:$0xff] }
 0x409   : >> { %6160 = vst [vmem:[#allocation12_spill] sm:$0xff] %v5215_v32  ;;  %v5221_v45 = vsub.f32 %v6161_v63, %v5125_v31  ;;  %v6166_v63 = vld [vmem:[#allocation16_spill] sm:$0xff] }
 0x40a   : >> { %v2455_v28 = vadd.f32 %v2454_v5, %v2424_v53  ;;  %v2428_v53 = vmul.f32 %v5209_v46, %v5209_v46  ;;  %6165 = vst [vmem:[#allocation14_spill] sm:$0xff] %v5233_v21  ;;  %v5239_v46 = vsub.f32 %v6166_v63, %v5125_v31  ;;  %v5257_v63 = vsub.f32 %v4827_v6, %v5125_v31 }
 0x40b   : >> { %6162 = vst [vmem:[#allocation13_spill] sm:$0xff] %v5221_v45 }
 0x40c   : >> { %v2456_v39 = vadd.f32 %v2455_v28, %v2425_v62  ;;  %v2429_v62 = vmul.f32 %v5215_v32, %v5215_v32  ;;  %v5245_v32 = vsub.f32 %v6167_v61, %v5125_v31  ;;  %6170 = vst [vmem:[#allocation16_spill] sm:$0xff] %v5257_v63  ;;  %v6171_v61 = vld [vmem:[#allocation19_spill] sm:$0xff]  ;;  %v2436_v6 = vmul.f32 %v5257_v63, %v5257_v63 }
 0x40e   : >> { %v2457_v42 = vadd.f32 %v2456_v39, %v2426_v20  ;;  %v2430_v20 = vmul.f32 %v5221_v45, %v5221_v45  ;;  %v5251_v45 = vsub.f32 %v6168_v13, %v5125_v31  ;;  %v5269_v13 = vsub.f32 %v4833_v48, %v5125_v31 }
 0x410   : >> { %v2458_v5 = vadd.f32 %v2457_v42, %v2427_v18  ;;  %v2431_v18 = vmul.f32 %v5227_v36, %v5227_v36  ;;  %6169 = vst [vmem:[#allocation15_spill] sm:$0xff] %v5251_v45  ;;  %v2438_v48 = vmul.f32 %v5269_v13, %v5269_v13 }
 0x412   : >> { %v2459_v28 = vadd.f32 %v2458_v5, %v2428_v53  ;;  %v2432_v53 = vmul.f32 %v5233_v21, %v5233_v21  ;;  %v5263_v21 = vsub.f32 %v6171_v61, %v5125_v31  ;;  %v6174_v61 = vld [vmem:[#allocation20_spill] sm:$0xff] }
 0x414   : >> { %v2460_v39 = vadd.f32 %v2459_v28, %v2429_v62  ;;  %v2433_v62 = vmul.f32 %v5239_v46, %v5239_v46  ;;  %6172 = vst [vmem:[#allocation17_spill] sm:$0xff] %v5263_v21 }
 0x416   : >> { %v2461_v42 = vadd.f32 %v2460_v39, %v2430_v20  ;;  %v2434_v20 = vmul.f32 %v5245_v32, %v5245_v32 }
 0x418   : >> { %v2462_v5 = vadd.f32 %v2461_v42, %v2431_v18  ;;  %v2435_v18 = vmul.f32 %v5251_v45, %v5251_v45  ;;  %v5281_v45 = vsub.f32 %v6174_v61, %v5125_v31  ;;  %v5299_v61 = vsub.f32 %v4858_v29, %v5125_v31 }
 0x41a   : >> { %v2463_v28 = vadd.f32 %v2462_v5, %v2432_v53  ;;  %v5275_v5 = vsub.f32 %v4836_v1, %v5125_v31  ;;  %6175 = vst [vmem:[#allocation19_spill] sm:$0xff] %v5281_v45  ;;  %v2443_v29 = vmul.f32 %v5299_v61, %v5299_v61 }
 0x41c   : >> { %v2464_v39 = vadd.f32 %v2463_v28, %v2433_v62  ;;  %6173 = vst [vmem:[#allocation18_spill] sm:$0xff] %v5275_v5  ;;  %v2437_v62 = vmul.f32 %v5263_v21, %v5263_v21  ;;  %v2439_v1 = vmul.f32 %v5275_v5, %v5275_v5 }
 0x41e   : >> { %v2465_v42 = vadd.f32 %v2464_v39, %v2434_v20  ;;  %v6176_v39 = vld [vmem:[#allocation21_spill] sm:$0xff] }
 0x41f   : >> { %v5287_v63 = vsub.f32 %v6176_v39, %v5125_v31  ;;  %v5305_v39 = vsub.f32 %v4869_v16, %v5125_v31 }
 0x420   : >> { %v2466_v53 = vadd.f32 %v2465_v42, %v2435_v18  ;;  %v6178_v42 = vld [vmem:[#allocation22_spill] sm:$0xff] }
 0x421   : >> { %6177 = vst [vmem:[#allocation20_spill] sm:$0xff] %v5287_v63  ;;  %v5293_v21 = vsub.f32 %v6178_v42, %v5125_v31  ;;  %v5311_v42 = vsub.f32 %v4882_v52, %v5125_v31 }
 0x422   : >> { %v2467_v28 = vadd.f32 %v2466_v53, %v2436_v6  ;;  %v2440_v6 = vmul.f32 %v5281_v45, %v5281_v45 }
 0x423   : >> { %6179 = vst [vmem:[#allocation21_spill] sm:$0xff] %v5293_v21  ;;  %v2445_v16 = vmul.f32 %v5311_v42, %v5311_v42 }
 0x424   : >> { %v2468_v20 = vadd.f32 %v2467_v28, %v2437_v62  ;;  %v2441_v62 = vmul.f32 %v5287_v63, %v5287_v63 }
 0x426   : >> { %v2469_v18 = vadd.f32 %v2468_v20, %v2438_v48  ;;  %v2442_v48 = vmul.f32 %v5293_v21, %v5293_v21 }
 0x428   : >> { %v2470_v53 = vadd.f32 %v2469_v18, %v2439_v1  ;;  %v2444_v18 = vmul.f32 %v5305_v39, %v5305_v39 }
 0x42a   : >> { %v2471_v28 = vadd.f32 %v2470_v53, %v2440_v6 }
 0x42c   : >> { %v2472_v20 = vadd.f32 %v2471_v28, %v2441_v62 }
 0x42e   : >> { %v2473_v1 = vadd.f32 %v2472_v20, %v2442_v48  ;;  %v2682_v48 = vld [vmem:[%s6038_s5] sm:$0xff]  ;;  %v2683_v20 = vld [vmem:[%s6038_s5 + $0x8] sm:$0xff] }
 0x430   : >> { %v2474_v6 = vadd.f32 %v2473_v1, %v2443_v29  ;;  %v2686_v1 = vld [vmem:[%s6038_s5 + $0x20] sm:$0xff] }
 0x432   : >> { %v2475_v53 = vadd.f32 %v2474_v6, %v2444_v18 }
 0x434   : >> { %v2476_v63 = vadd.f32 %v2475_v53, %v2445_v16  ;;  %v2687_v16 = vld [vmem:[%s6038_s5 + $0x28] sm:$0xff]  ;;  %v5352_v53 = vmul.f32 %v2686_v1, %v5080_v41 }
 0x436   : >> { %2477 = vadd.xlane.f32.xlu0 %v2476_v63  ;;  %v2684_v63 = vld [vmem:[%s6038_s5 + $0x10] sm:$0xff]  ;;  %6184 = vst [vmem:[#allocation51_spill] sm:$0xff] %v5352_v53 }
 0x437   : >> { %v5338_v29 = vmul.f32 %v2684_v63, %v5055_v3 }
 0x439   : >> { %6182 = vst [vmem:[#allocation49_spill] sm:$0xff] %v5338_v29 }
 0x4bf   : >> { %v2478_v21 = vpop.xlane.xlu0 %2477 }
 0x4c0   : >> { %v2479_v62 = vrot.slane %v2478_v21, 4 }
 0x4c2   : >> { %v2480_v28 = vadd.f32 %v2479_v62, %v2478_v21  ;;  %v2685_v21 = vld [vmem:[%s6038_s5 + $0x18] sm:$0xff] }
 0x4c3   : >> { %v5344_v18 = vmul.f32 %v2685_v21, %v5057_v40 }
 0x4c4   : >> { %v2481_v45 = vrot.slane %v2480_v28, 2 }
 0x4c5   : >> { %6183 = vst [vmem:[#allocation50_spill] sm:$0xff] %v5344_v18 }
 0x4c6   : >> { %v2482_v52 = vadd.f32 %v2481_v45, %v2480_v28  ;;  %v5332_v45 = vmul.f32 %v2682_v48, %v5051_v43  ;;  %v2688_v28 = vld [vmem:[%s6038_s5 + $0x30] sm:$0xff]  ;;  %v2689_v48 = vld [vmem:[%s6038_s5 + $0x38] sm:$0xff] }
 0x4c7   : >> { %v5370_v21 = vmul.f32 %v2689_v48, %v5108_v50 }
 0x4c8   : >> { %v2483_v31 = vrot.slane %v2482_v52, 1  ;;  %6180 = vst [vmem:[#allocation22_spill] sm:$0xff] %v5332_v45 }
 0x4c9   : >> { %6187 = vst [vmem:[#allocation54_spill] sm:$0xff] %v5370_v21 }
 0x4ca   : >> { %v2484_v5 = vadd.f32 %v2483_v31, %v2482_v52  ;;  %v5359_v52 = vmul.f32 %v2687_v16, %v5090_v55 }
 0x4cc   : >> { %3581 = vpush %v2484_v5  ;;  %v5335_v5 = vmul.f32 %v2683_v20, %v5053_v27  ;;  %6185 = vst [vmem:[#allocation52_spill] sm:$0xff] %v5359_v52  ;;  %v5366_v20 = vmul.f32 %v2688_v28, %v5099_v19 }
 0x4ce   : >> { %6181 = vst [vmem:[#allocation48_spill] sm:$0xff] %v5335_v5  ;;  %v2698_v6 = vadd.f32 %v5335_v5, %v5332_v45  ;;  %6186 = vst [vmem:[#allocation53_spill] sm:$0xff] %v5366_v20 }
 0x4d0   : >> { %v2699_v62 = vadd.f32 %v2698_v6, %v5338_v29 }
 0x4d2   : >> { %v2700_v31 = vadd.f32 %v2699_v62, %v5344_v18  ;;  %v2622_v62 = vpop.xlane.xlu1 %2621 }
 0x4d3   : >> { %v2623_v18 = vrot.slane %v2622_v62, 4 }
 0x4d4   : >> { %v2701_v63 = vadd.f32 %v2700_v31, %v5352_v53 }
 0x4d5   : >> { %v2624_v28 = vadd.f32 %v2623_v18, %v2622_v62 }
 0x4d6   : >> { %v2702_v1 = vadd.f32 %v2701_v63, %v5359_v52  ;;  %v5376_v63 = vstv %s5123_s12 }
 0x4d7   : >> { %v2625_v31 = vrot.slane %v2624_v28, 2  ;;  %v1094_v18 = vmul.f32 %v5376_v63, %v4862_v44  ;;  %v1096_v62 = vmul.f32 %v5376_v63, %v4877_v49  ;;  %v5400_v44 = vmul.f32 %v5376_v63, %v4911_v12 }
 0x4d8   : >> { %v2703_v6 = vadd.f32 %v2702_v1, %v5366_v20  ;;  %v6188_v1 = vld [vmem:[#allocation23_spill] sm:$0xff]  ;;  %v5408_v49 = vmul.f32 %v5376_v63, %v4923_v35  ;;  %v5428_v12 = vmul.f32 %v5376_v63, %v4953_v11  ;;  %v5436_v35 = vmul.f32 %v5376_v63, %v4965_v58 }
 0x4d9   : >> { %v2626_v53 = vadd.f32 %v2625_v31, %v2624_v28  ;;  %v5396_v28 = vmul.f32 %v5376_v63, %v4905_v23  ;;  %v5424_v23 = vmul.f32 %v5376_v63, %v4947_v9  ;;  %v5452_v9 = vmul.f32 %v5376_v63, %v4989_v24 }
 0x4da   : >> { %v2704_v16 = vadd.f32 %v2703_v6, %v5370_v21  ;;  %v1092_v6 = vmul.f32 %v5376_v63, %v6188_v1  ;;  %v5456_v11 = vmul.f32 %v5376_v63, %v4995_v4  ;;  %v5462_v58 = vmul.f32 %v5376_v63, %v5001_v22  ;;  %v6191_v22 = vld [vmem:[#allocation26_spill] sm:$0xff] }
 0x4db   : >> { %v2627_v48 = vrot.slane %v2626_v53, 1 }
 0x4dc   : >> { %2705 = vadd.xlane.f32.xlu1 %v2704_v16  ;;  %v6189_v16 = vld [vmem:[#allocation24_spill] sm:$0xff] }
 0x4dd   : >> { %v2628_v45 = vadd.f32 %v2627_v48, %v2626_v53  ;;  %v1093_v21 = vmul.f32 %v5376_v63, %v6189_v16  ;;  %v1099_v53 = vmul.f32 %v5376_v63, %v4899_v37  ;;  %v5420_v37 = vmul.f32 %v5376_v63, %v4941_v26 }
 0x4de   : >> { %v5448_v26 = vmul.f32 %v5376_v63, %v4983_v38  ;;  %v5480_v48 = vmul.f32 %v5376_v63, %v6191_v22  ;;  %v6195_v22 = vld [vmem:[#allocation31_spill] sm:$0xff] }
 0x4fd   : >> { %s3582_s20 = spop %3581 }
 0x4fe   : >> { %s2488_s22 = smul.f32 3.0517578e-05, %s3582_s20 }
 0x500   : >> { %s2489_s23 = sadd.f32 1e-05, %s2488_s22 }
 0x502   : >> { %v2490_v29 = vstv %s2489_s23 }
 0x503   : >> { %3706 = vrsqrt.f32 %v2490_v29  ;;  %v1095_v29 = vmul.f32 %v5376_v63, %v4873_v59  ;;  %v5404_v59 = vmul.f32 %v5376_v63, %v4917_v51  ;;  %v5432_v51 = vmul.f32 %v5376_v63, %v4959_v56 }
 0x510   : >> { %v3707_v5 = vpop.eup %3706 }
 0x511   : >> { %3583 = vpush %v3707_v5  ;;  %v1098_v5 = vmul.f32 %v5376_v63, %v4893_v34  ;;  %v5416_v34 = vmul.f32 %v5376_v63, %v4935_v8  ;;  %v5444_v8 = vmul.f32 %v5376_v63, %v4977_v54  ;;  %v6190_v54 = vld [vmem:[#allocation25_spill] sm:$0xff] }
 0x512   : >> { %3585 = vpush %v2628_v45  ;;  %v1097_v45 = vmul.f32 %v5376_v63, %v4886_v2  ;;  %v5412_v2 = vmul.f32 %v5376_v63, %v4929_v47  ;;  %v5440_v47 = vmul.f32 %v5376_v63, %v4971_v57  ;;  %v5466_v57 = vmul.f32 %v5376_v63, %v5007_v30 }
 0x513   : >> { %v5470_v38 = vmul.f32 %v5376_v63, %v6190_v54 }
 0x542   : >> { %s3584_s12 = spop %3583 }
 0x543   : >> { %v5458_v56 = vstv %s3584_s12  ;;  %s3586_s25 = spop %3585 }
 0x544   : >> { %s2632_s26 = smul.f32 0.00012207031, %s3586_s25  ;;  %v2494_v24 = vmul.f32 %v5458_v56, %v5129_v7  ;;  %v2495_v4 = vmul.f32 %v5458_v56, %v5133_v14  ;;  %v2496_v31 = vmul.f32 %v5458_v56, %v5137_v10  ;;  %v2497_v30 = vmul.f32 %v5458_v56, %v5145_v17  ;;  %v6197_v17 = vld [vmem:[#allocation32_spill] sm:$0xff] }
 0x545   : >> { %v2498_v1 = vmul.f32 %v5458_v56, %v5149_v0  ;;  %v2499_v16 = vmul.f32 %v5458_v56, %v5155_v60  ;;  %v2500_v7 = vmul.f32 %v5458_v56, %v5161_v15  ;;  %v6199_v0 = vld [vmem:[#allocation33_spill] sm:$0xff]  ;;  %v6201_v60 = vld [vmem:[#allocation35_spill] sm:$0xff] }
 0x546   : >> { %v2633_v14 = vstv %s2632_s26  ;;  %v5490_v54 = vadd.f32 %v2494_v24, %v1092_v6  ;;  %v5492_v10 = vadd.f32 %v2495_v4, %v1093_v21  ;;  %v5494_v20 = vadd.f32 %v2496_v31, %v1094_v18  ;;  %v6203_v15 = vld [vmem:[#allocation37_spill] sm:$0xff]  ;;  %v6205_v6 = vld [vmem:[#allocation39_spill] sm:$0xff]  ;;  %v6208_v31 = vld [vmem:[#allocation42_spill] sm:$0xff] }
 0x547   : >> { %v5497_v52 = vsub.f32 %v6195_v22, %v2633_v14  ;;  %v5500_v50 = vsub.f32 %v6197_v17, %v2633_v14  ;;  %v5503_v19 = vsub.f32 %v6199_v0, %v2633_v14  ;;  %v5506_v55 = vsub.f32 %v6201_v60, %v2633_v14  ;;  %v6207_v18 = vld [vmem:[#allocation41_spill] sm:$0xff] }
 0x548   : >> { %6192 = vst [vmem:[#allocation23_spill] sm:$0xff] %v5490_v54  ;;  %6193 = vst [vmem:[#allocation24_spill] sm:$0xff] %v5492_v10  ;;  %v5509_v41 = vsub.f32 %v6203_v15, %v2633_v14  ;;  %v5512_v21 = vsub.f32 %v6205_v6, %v2633_v14  ;;  %v5515_v24 = vsub.f32 %v6207_v18, %v2633_v14 }
 0x549   : >> { %6194 = vst [vmem:[#allocation25_spill] sm:$0xff] %v5494_v20  ;;  %6196 = vst [vmem:[#allocation26_spill] sm:$0xff] %v5497_v52  ;;  %v2501_v4 = vmul.f32 %v5458_v56, %v5167_v25  ;;  %v5520_v22 = vsub.f32 %v6208_v31, %v2633_v14  ;;  %v2642_v17 = vmul.f32 %v5497_v52, %v5497_v52  ;;  %v6210_v52 = vld [vmem:[#allocation44_spill] sm:$0xff] }
 0x54a   : >> { %6198 = vst [vmem:[#allocation31_spill] sm:$0xff] %v5500_v50  ;;  %6200 = vst [vmem:[#allocation32_spill] sm:$0xff] %v5503_v19  ;;  %v2643_v0 = vmul.f32 %v5500_v50, %v5500_v50  ;;  %v2644_v60 = vmul.f32 %v5503_v19, %v5503_v19  ;;  %v2645_v15 = vmul.f32 %v5506_v55, %v5506_v55 }
 0x54b   : >> { %6202 = vst [vmem:[#allocation33_spill] sm:$0xff] %v5506_v55  ;;  %6204 = vst [vmem:[#allocation35_spill] sm:$0xff] %v5509_v41  ;;  %v2646_v6 = vmul.f32 %v5509_v41, %v5509_v41  ;;  %v2647_v25 = vmul.f32 %v5512_v21, %v5512_v21  ;;  %v2648_v14 = vmul.f32 %v5515_v24, %v5515_v24  ;;  %v6209_v55 = vld [vmem:[#allocation43_spill] sm:$0xff] }
 0x54c   : >> { %6206 = vst [vmem:[#allocation37_spill] sm:$0xff] %v5512_v21  ;;  %v2650_v18 = vadd.f32 %v2643_v0, %v2642_v17  ;;  %v5536_v31 = vadd.f32 %v2497_v30, %v1095_v29  ;;  %v5538_v20 = vadd.f32 %v2498_v1, %v1096_v62  ;;  %v5540_v10 = vadd.f32 %v2499_v16, %v1097_v45  ;;  %v6211_v29 = vld [vmem:[#allocation45_spill] sm:$0xff]  ;;  %v6212_v30 = vld [vmem:[#allocation46_spill] sm:$0xff]  ;;  %v6214_v1 = vld [vmem:[#allocation11_spill] sm:$0xff] }
 0x54d   : >> { %v5542_v54 = vadd.f32 %v2500_v7, %v1098_v5  ;;  %v5544_v19 = vadd.f32 %v2501_v4, %v1099_v53  ;;  %v2502_v41 = vmul.f32 %v5458_v56, %v5173_v33  ;;  %v2503_v21 = vmul.f32 %v5458_v56, %v6209_v55  ;;  %v6213_v5 = vld [vmem:[#allocation47_spill] sm:$0xff]  ;;  %v6215_v33 = vld [vmem:[#allocation12_spill] sm:$0xff] }
 0x54e   : >> { %v2651_v50 = vadd.f32 %v2650_v18, %v2644_v60  ;;  %v2504_v17 = vmul.f32 %v5458_v56, %v6210_v52  ;;  %v2505_v62 = vmul.f32 %v5458_v56, %v6211_v29  ;;  %v2506_v45 = vmul.f32 %v5458_v56, %v6212_v30 }
 0x54f   : >> { %v2507_v53 = vmul.f32 %v5458_v56, %v6213_v5  ;;  %v2508_v16 = vmul.f32 %v5458_v56, %v6214_v1  ;;  %v2509_v7 = vmul.f32 %v5458_v56, %v6215_v33  ;;  %v5563_v55 = vadd.f32 %v2502_v41, %v5396_v28  ;;  %v6216_v28 = vld [vmem:[#allocation13_spill] sm:$0xff]  ;;  %v6222_v33 = vld [vmem:[#allocation18_spill] sm:$0xff] }
 0x550   : >> { %v2652_v4 = vadd.f32 %v2651_v50, %v2645_v15  ;;  %v5566_v52 = vadd.f32 %v2503_v21, %v5400_v44  ;;  %v5569_v0 = vadd.f32 %v2504_v17, %v5404_v59  ;;  %v5572_v60 = vadd.f32 %v2505_v62, %v5408_v49  ;;  %v6217_v49 = vld [vmem:[#allocation14_spill] sm:$0xff]  ;;  %v6218_v21 = vld [vmem:[#allocation15_spill] sm:$0xff]  ;;  %v6219_v15 = vld [vmem:[#allocation16_spill] sm:$0xff] }
 0x551   : >> { %v5575_v18 = vadd.f32 %v2506_v45, %v5412_v2  ;;  %v5578_v29 = vadd.f32 %v2507_v53, %v5416_v34  ;;  %v5581_v30 = vadd.f32 %v2508_v16, %v5420_v37  ;;  %v5584_v50 = vadd.f32 %v2509_v7, %v5424_v23  ;;  %v6220_v62 = vld [vmem:[#allocation17_spill] sm:$0xff]  ;;  %v6223_v7 = vld [vmem:[#allocation19_spill] sm:$0xff] }
 0x552   : >> { %v2653_v41 = vadd.f32 %v2652_v4, %v2646_v6  ;;  %v2510_v44 = vmul.f32 %v5458_v56, %v6216_v28  ;;  %v2511_v59 = vmul.f32 %v5458_v56, %v5227_v36  ;;  %v2512_v2 = vmul.f32 %v5458_v56, %v6217_v49  ;;  %v6225_v28 = vld [vmem:[#allocation20_spill] sm:$0xff]  ;;  %v6227_v49 = vld [vmem:[#allocation29_spill] sm:$0xff] }
 0x553   : >> { %v2513_v34 = vmul.f32 %v5458_v56, %v5239_v46  ;;  %v2514_v37 = vmul.f32 %v5458_v56, %v5245_v32  ;;  %v2515_v23 = vmul.f32 %v5458_v56, %v6218_v21  ;;  %v2516_v6 = vmul.f32 %v5458_v56, %v6219_v15  ;;  %v6228_v21 = vld [vmem:[#allocation30_spill] sm:$0xff] }
 0x554   : >> { %v2654_v17 = vadd.f32 %v2653_v41, %v2647_v25  ;;  %v2517_v45 = vmul.f32 %v5458_v56, %v6220_v62  ;;  %v5603_v36 = vadd.f32 %v2510_v44, %v5428_v12  ;;  %v5606_v5 = vadd.f32 %v2511_v59, %v5432_v51  ;;  %v6226_v44 = vld [vmem:[#allocation21_spill] sm:$0xff] }
 0x555   : >> { %v5609_v46 = vadd.f32 %v2512_v2, %v5436_v35  ;;  %v5612_v32 = vadd.f32 %v2513_v34, %v5440_v47  ;;  %v5615_v53 = vadd.f32 %v2514_v37, %v5444_v8  ;;  %v5618_v25 = vadd.f32 %v2515_v23, %v5448_v26  ;;  %v6221_v35 = vld [vmem:[#allocation27_spill] sm:$0xff] }
 0x556   : >> { %v2649_v1 = vmul.f32 %v5520_v22, %v5520_v22  ;;  %v2655_v12 = vadd.f32 %v2654_v17, %v2648_v14  ;;  %v5623_v16 = vadd.f32 %v2516_v6, %v5452_v9  ;;  %v5626_v51 = vadd.f32 %v2517_v45, %v5456_v11  ;;  %v6224_v14 = vld [vmem:[#allocation28_spill] sm:$0xff] }
 0x557   : >> { %v1120_v47 = vmul.f32 %v5376_v63, %v6221_v35  ;;  %v2518_v8 = vmul.f32 %v5458_v56, %v5269_v13  ;;  %v2519_v26 = vmul.f32 %v5458_v56, %v6222_v33  ;;  %v2520_v4 = vmul.f32 %v5458_v56, %v6223_v7 }
 0x558   : >> { %v2656_v41 = vadd.f32 %v2655_v12, %v2649_v1  ;;  %v1121_v9 = vmul.f32 %v5376_v63, %v6224_v14  ;;  %v2521_v11 = vmul.f32 %v5458_v56, %v6225_v28  ;;  %v2522_v59 = vmul.f32 %v5458_v56, %v6226_v44  ;;  %v2772_v28 = vld [vmem:[%s6039_s6 + $0x30] sm:$0xff] }
 0x559   : >> { %v1122_v2 = vmul.f32 %v5376_v63, %v6227_v49  ;;  %v2523_v13 = vmul.f32 %v5458_v56, %v5299_v61  ;;  %v2524_v34 = vmul.f32 %v5458_v56, %v5305_v39  ;;  %v2525_v37 = vmul.f32 %v5458_v56, %v5311_v42  ;;  %v6231_v49 = vld [vmem:[#allocation38_spill] sm:$0xff] }
 0x55a   : >> { %2657 = vadd.xlane.f32.xlu0 %v2656_v41  ;;  %v1123_v23 = vmul.f32 %v5376_v63, %v6228_v21  ;;  %v5653_v15 = vadd.f32 %v2518_v8, %v5462_v58  ;;  %v5656_v6 = vadd.f32 %v2519_v26, %v5466_v57  ;;  %v5659_v17 = vadd.f32 %v2520_v4, %v5470_v38  ;;  %v2766_v38 = vld [vmem:[%s6039_s6] sm:$0xff]  ;;  %v2769_v8 = vld [vmem:[%s6039_s6 + $0x18] sm:$0xff] }
 0x55b   : >> { %v5662_v61 = vadd.f32 %v2521_v11, %v5480_v48  ;;  %v5664_v39 = vadd.f32 %v2522_v59, %v1120_v47  ;;  %v5666_v62 = vadd.f32 %v2523_v13, %v1121_v9  ;;  %v5668_v42 = vadd.f32 %v2524_v34, %v1122_v2  ;;  %v2767_v48 = vld [vmem:[%s6039_s6 + $0x8] sm:$0xff]  ;;  %v2768_v47 = vld [vmem:[%s6039_s6 + $0x10] sm:$0xff]  ;;  %v2770_v4 = vld [vmem:[%s6039_s6 + $0x20] sm:$0xff] }
 0x55c   : >> { %v5670_v56 = vadd.f32 %v2525_v37, %v1123_v23  ;;  %v5685_v33 = vmul.f32 %v2766_v38, %v5051_v43  ;;  %v5688_v26 = vmul.f32 %v2767_v48, %v5053_v27  ;;  %v5691_v7 = vmul.f32 %v2768_v47, %v5055_v3  ;;  %v2771_v43 = vld [vmem:[%s6039_s6 + $0x28] sm:$0xff]  ;;  %v6230_v11 = vld [vmem:[#allocation36_spill] sm:$0xff] }
 0x55d   : >> { %v5697_v41 = vmul.f32 %v2769_v8, %v5057_v40  ;;  %v6229_v9 = vld [vmem:[#allocation34_spill] sm:$0xff]  ;;  %v5712_v44 = vmul.f32 %v2771_v43, %v6230_v11  ;;  %v2773_v59 = vld [vmem:[%s6039_s6 + $0x38] sm:$0xff]  ;;  %v5719_v2 = vmul.f32 %v2772_v28, %v6231_v49  ;;  %v6234_v43 = vld [vmem:[#allocation31_spill] sm:$0xff] }
 0x55e   : >> { %v2782_v14 = vadd.f32 %v5688_v26, %v5685_v33  ;;  %v5705_v27 = vmul.f32 %v2770_v4, %v6229_v9  ;;  %v6232_v34 = vld [vmem:[#allocation40_spill] sm:$0xff]  ;;  %v6233_v4 = vld [vmem:[#allocation26_spill] sm:$0xff]  ;;  %v6236_v11 = vld [vmem:[#allocation33_spill] sm:$0xff] }
 0x55f   : >> { %v5723_v37 = vmul.f32 %v2773_v59, %v6232_v34  ;;  %v6237_v59 = vld [vmem:[#allocation35_spill] sm:$0xff] }
 0x560   : >> { %v2783_v3 = vadd.f32 %v2782_v14, %v5691_v7 }
 0x562   : >> { %v2784_v40 = vadd.f32 %v2783_v3, %v5697_v41  ;;  %v6235_v3 = vld [vmem:[#allocation32_spill] sm:$0xff] }
 0x564   : >> { %v2785_v13 = vadd.f32 %v2784_v40, %v5705_v27 }
 0x566   : >> { %v2786_v21 = vadd.f32 %v2785_v13, %v5712_v44  ;;  %v6238_v13 = vld [vmem:[#allocation37_spill] sm:$0xff] }
 0x568   : >> { %v2787_v23 = vadd.f32 %v2786_v21, %v5719_v2 }
 0x5e3   : >> { %v2658_v63 = vpop.xlane.xlu0 %2657 }
 0x5e4   : >> { %v2659_v58 = vrot.slane %v2658_v63, 4 }
 0x5e6   : >> { %v2660_v45 = vadd.f32 %v2659_v58, %v2658_v63  ;;  %v2788_v63 = vadd.f32 %v2787_v23, %v5723_v37  ;;  %v2706_v58 = vpop.xlane.xlu1 %2705 }
 0x5e8   : >> { %v2661_v1 = vrot.slane %v2660_v45, 2  ;;  %2789 = vadd.xlane.f32.xlu1 %v2788_v63  ;;  %v6239_v63 = vld [vmem:[#allocation23_spill] sm:$0xff] }
 0x5ea   : >> { %v2662_v57 = vadd.f32 %v2661_v1, %v2660_v45  ;;  %v2707_v45 = vrot.slane %v2706_v58, 4 }
 0x5ec   : >> { %v2663_v12 = vrot.slane %v2662_v57, 1  ;;  %v2708_v1 = vadd.f32 %v2707_v45, %v2706_v58  ;;  %v6240_v45 = vld [vmem:[#allocation24_spill] sm:$0xff] }
 0x5ee   : >> { %v2664_v35 = vadd.f32 %v2663_v12, %v2662_v57  ;;  %v2709_v12 = vrot.slane %v2708_v1, 2 }
 0x5f0   : >> { %3587 = vpush %v2664_v35  ;;  %v2710_v35 = vadd.f32 %v2709_v12, %v2708_v1 }
 0x5f2   : >> { %v2711_v38 = vrot.slane %v2710_v35, 1 }
 0x5f4   : >> { %v2712_v47 = vadd.f32 %v2711_v38, %v2710_v35 }
 0x621   : >> { %s3588_s11 = spop %3587 }
 0x622   : >> { %s2668_s14 = smul.f32 0.00012207031, %s3588_s11 }
 0x624   : >> { %s2669_s15 = sadd.f32 1e-05, %s2668_s14 }
 0x626   : >> { %v2670_v57 = vstv %s2669_s15 }
 0x627   : >> { %3708 = vrsqrt.f32 %v2670_v57  ;;  %v6241_v57 = vld [vmem:[#allocation25_spill] sm:$0xff] }
 0x634   : >> { %v3709_v48 = vpop.eup %3708 }
 0x635   : >> { %3589 = vpush %v3709_v48 }
 0x636   : >> { %3591 = vpush %v2712_v47 }
 0x666   : >> { %s3590_s16 = spop %3589 }
 0x667   : >> { %v2673_v8 = vstv %s3590_s16  ;;  %s3592_s17 = spop %3591 }
 0x668   : >> { %v2674_v14 = vmul.f32 %v2673_v8, %v6233_v4  ;;  %v2675_v9 = vmul.f32 %v2673_v8, %v6234_v43  ;;  %v2676_v28 = vmul.f32 %v2673_v8, %v6235_v3  ;;  %v2677_v40 = vmul.f32 %v2673_v8, %v6236_v11  ;;  %s2716_s13 = smul.f32 0.00012207031, %s3592_s17 }
 0x669   : >> { %v2678_v49 = vmul.f32 %v2673_v8, %v6237_v59  ;;  %v2679_v34 = vmul.f32 %v2673_v8, %v6238_v13  ;;  %v2680_v21 = vmul.f32 %v2673_v8, %v5515_v24  ;;  %v2681_v23 = vmul.f32 %v2673_v8, %v5520_v22  ;;  %v6245_v59 = vld [vmem:[#allocation50_spill] sm:$0xff] }
 0x66a   : >> { %v2858_v58 = vadd.f32 %v2674_v14, %v6239_v63  ;;  %v2859_v1 = vadd.f32 %v2675_v9, %v6240_v45  ;;  %v2860_v12 = vadd.f32 %v2676_v28, %v6241_v57  ;;  %v2861_v35 = vadd.f32 %v2677_v40, %v5536_v31  ;;  %v6242_v14 = vld [vmem:[#allocation22_spill] sm:$0xff]  ;;  %v6243_v28 = vld [vmem:[#allocation48_spill] sm:$0xff] }
 0x66b   : >> { %v2862_v38 = vadd.f32 %v2678_v49, %v5538_v20  ;;  %v2863_v48 = vadd.f32 %v2679_v34, %v5540_v10  ;;  %v2864_v47 = vadd.f32 %v2680_v21, %v5542_v54  ;;  %v2865_v4 = vadd.f32 %v2681_v23, %v5544_v19  ;;  %v6244_v10 = vld [vmem:[#allocation49_spill] sm:$0xff]  ;;  %v6246_v21 = vld [vmem:[#allocation51_spill] sm:$0xff]  ;;  %v6247_v45 = vld [vmem:[#allocation52_spill] sm:$0xff] }
 0x66c   : >> { %v3494_v43 = vmul.f32 -1.442695, %v2858_v58  ;;  %v3495_v24 = vmul.f32 -1.442695, %v2859_v1  ;;  %v3496_v3 = vmul.f32 -1.442695, %v2860_v12  ;;  %v2717_v22 = vstv %s2716_s13 }
 0x66d   : >> { %v3497_v8 = vmul.f32 -1.442695, %v2861_v35  ;;  %v5745_v11 = vsub.f32 %v6242_v14, %v2717_v22  ;;  %v3498_v9 = vmul.f32 -1.442695, %v2862_v38  ;;  %v5748_v31 = vsub.f32 %v6243_v28, %v2717_v22  ;;  %v6248_v35 = vld [vmem:[#allocation53_spill] sm:$0xff] }
 0x66e   : >> { %3710 = vpow2.f32 %v3494_v43  ;;  %v3499_v20 = vmul.f32 -1.442695, %v2863_v48  ;;  %v5751_v40 = vsub.f32 %v6244_v10, %v2717_v22  ;;  %v3500_v19 = vmul.f32 -1.442695, %v2864_v47 }
 0x66f   : >> { %3712 = vpow2.f32 %v3495_v24  ;;  %v3501_v54 = vmul.f32 -1.442695, %v2865_v4  ;;  %v5754_v49 = vsub.f32 %v6245_v59, %v2717_v22  ;;  %v2726_v13 = vmul.f32 %v5745_v11, %v5745_v11  ;;  %v6249_v4 = vld [vmem:[#allocation54_spill] sm:$0xff] }
 0x670   : >> { %3714 = vpow2.f32 %v3496_v3  ;;  %v2727_v34 = vmul.f32 %v5748_v31, %v5748_v31  ;;  %v5761_v23 = vsub.f32 %v6246_v21, %v2717_v22  ;;  %v2728_v63 = vmul.f32 %v5751_v40, %v5751_v40 }
 0x671   : >> { %3716 = vpow2.f32 %v3497_v8  ;;  %v5766_v1 = vsub.f32 %v6247_v45, %v2717_v22  ;;  %v2729_v57 = vmul.f32 %v5754_v49, %v5754_v49  ;;  %v5772_v38 = vsub.f32 %v6248_v35, %v2717_v22 }
 0x672   : >> { %3718 = vpow2.f32 %v3498_v9  ;;  %v2734_v58 = vadd.f32 %v2727_v34, %v2726_v13  ;;  %v2730_v48 = vmul.f32 %v5761_v23, %v5761_v23  ;;  %v5779_v43 = vsub.f32 %v6249_v4, %v2717_v22 }
 0x673   : >> { %3720 = vpow2.f32 %v3499_v20  ;;  %v2731_v24 = vmul.f32 %v5766_v1, %v5766_v1  ;;  %v2732_v8 = vmul.f32 %v5772_v38, %v5772_v38 }
 0x674   : >> { %3722 = vpow2.f32 %v3500_v19  ;;  %v2735_v12 = vadd.f32 %v2734_v58, %v2728_v63  ;;  %v2733_v28 = vmul.f32 %v5779_v43, %v5779_v43 }
 0x675   : >> { %3724 = vpow2.f32 %v3501_v54 }
 0x676   : >> { %3726 = vtanh.f32 %v5603_v36  ;;  %v2736_v47 = vadd.f32 %v2735_v12, %v2729_v57 }
 0x677   : >> { %3728 = vtanh.f32 %v5606_v5 }
 0x678   : >> { %3730 = vtanh.f32 %v5609_v46  ;;  %v2737_v3 = vadd.f32 %v2736_v47, %v2730_v48 }
 0x679   : >> { %3732 = vtanh.f32 %v5612_v32 }
 0x67a   : >> { %3734 = vtanh.f32 %v5615_v53  ;;  %v2738_v14 = vadd.f32 %v2737_v3, %v2731_v24 }
 0x67b   : >> { %v3711_v36 = vpop.eup %3710  ;;  %3736 = vtanh.f32 %v5618_v25 }
 0x67c   : >> { %v3713_v5 = vpop.eup %3712  ;;  %v2890_v46 = vadd.f32 1.0, %v3711_v36  ;;  %3738 = vtanh.f32 %v5623_v16  ;;  %v2739_v20 = vadd.f32 %v2738_v14, %v2732_v8 }
 0x67d   : >> { %v3715_v22 = vpop.eup %3714  ;;  %v2891_v9 = vadd.f32 1.0, %v3713_v5  ;;  %3740 = vtanh.f32 %v5626_v51 }
 0x67e   : >> { %v3717_v32 = vpop.eup %3716  ;;  %v2892_v53 = vadd.f32 1.0, %v3715_v22  ;;  %3742 = vrcp.f32 %v2890_v46  ;;  %v2740_v54 = vadd.f32 %v2739_v20, %v2733_v28 }
 0x67f   : >> { %v3719_v10 = vpop.eup %3718  ;;  %v2893_v19 = vadd.f32 1.0, %v3717_v32  ;;  %3744 = vrcp.f32 %v2891_v9 }
 0x680   : >> { %v3721_v25 = vpop.eup %3720  ;;  %v2894_v59 = vadd.f32 1.0, %v3719_v10  ;;  %3746 = vrcp.f32 %v2892_v53  ;;  %2741 = vadd.xlane.f32.xlu0 %v2740_v54 }
 0x681   : >> { %v3723_v13 = vpop.eup %3722  ;;  %v2895_v16 = vadd.f32 1.0, %v3721_v25  ;;  %3748 = vrcp.f32 %v2893_v19 }
 0x682   : >> { %v3725_v34 = vpop.eup %3724  ;;  %3750 = vrcp.f32 %v2894_v59  ;;  %v2896_v21 = vadd.f32 1.0, %v3723_v13 }
 0x683   : >> { %v3727_v63 = vpop.eup %3726  ;;  %v2897_v58 = vadd.f32 1.0, %v3725_v34  ;;  %3752 = vrcp.f32 %v2895_v16 }
 0x684   : >> { %v3729_v51 = vpop.eup %3728  ;;  %3754 = vrcp.f32 %v2896_v21 }
 0x685   : >> { %v3731_v45 = vpop.eup %3730  ;;  %3756 = vrcp.f32 %v2897_v58 }
 0x686   : >> { %v3733_v57 = vpop.eup %3732 }
 0x687   : >> { %v3735_v12 = vpop.eup %3734 }
 0x688   : >> { %v3737_v35 = vpop.eup %3736 }
 0x689   : >> { %v3739_v48 = vpop.eup %3738 }
 0x68a   : >> { %v3741_v47 = vpop.eup %3740 }
 0x68b   : >> { %v3743_v4 = vpop.eup %3742 }
 0x68c   : >> { %v3745_v24 = vpop.eup %3744  ;;  %v5792_v3 = vmul.f32 %v3743_v4, %v3727_v63  ;;  %v2790_v63 = vpop.xlane.xlu1 %2789 }
 0x68d   : >> { %v3747_v36 = vpop.eup %3746  ;;  %v5794_v8 = vmul.f32 %v3745_v24, %v3729_v51  ;;  %v2791_v58 = vrot.slane %v2790_v63, 4 }
 0x68e   : >> { %v3749_v14 = vpop.eup %3748  ;;  %v5796_v5 = vmul.f32 %v3747_v36, %v3731_v45 }
 0x68f   : >> { %v3751_v46 = vpop.eup %3750  ;;  %v5798_v22 = vmul.f32 %v3749_v14, %v3733_v57  ;;  %v2792_v51 = vadd.f32 %v2791_v58, %v2790_v63 }
 0x690   : >> { %v3753_v9 = vpop.eup %3752  ;;  %v5800_v28 = vmul.f32 %v3751_v46, %v3735_v12 }
 0x691   : >> { %v3755_v20 = vpop.eup %3754  ;;  %v5802_v32 = vmul.f32 %v3753_v9, %v3737_v35  ;;  %v2793_v57 = vrot.slane %v2792_v51, 2 }
 0x692   : >> { %v3757_v53 = vpop.eup %3756  ;;  %v5804_v10 = vmul.f32 %v3755_v20, %v3739_v48 }
 0x693   : >> { %v5806_v19 = vmul.f32 %v3757_v53, %v3741_v47  ;;  %v2794_v12 = vadd.f32 %v2793_v57, %v2792_v51 }
 0x695   : >> { %v2795_v35 = vrot.slane %v2794_v12, 1 }
 0x697   : >> { %v2796_v47 = vadd.f32 %v2795_v35, %v2794_v12 }
 0x709   : >> { %v2742_v54 = vpop.xlane.xlu0 %2741 }
 0x70a   : >> { %v2743_v25 = vrot.slane %v2742_v54, 4 }
 0x70c   : >> { %v2744_v59 = vadd.f32 %v2743_v25, %v2742_v54 }
 0x70e   : >> { %v2745_v13 = vrot.slane %v2744_v59, 2 }
 0x710   : >> { %v2746_v16 = vadd.f32 %v2745_v13, %v2744_v59 }
 0x712   : >> { %v2747_v34 = vrot.slane %v2746_v16, 1 }
 0x714   : >> { %v2748_v21 = vadd.f32 %v2747_v34, %v2746_v16 }
 0x716   : >> { %3593 = vpush %v2748_v21 }
 0x747   : >> { %s3594_s18 = spop %3593 }
 0x748   : >> { %s2752_s19 = smul.f32 0.00012207031, %s3594_s18 }
 0x74a   : >> { %s2753_s20 = sadd.f32 1e-05, %s2752_s19  ;;  %s3572_s19 = sshll.u32 %s3918_s27, 6 }
 0x74c   : >> { %v2754_v45 = vstv %s2753_s20  ;;  %s5994_s20 = scalar_lea.vmem %s4053_s24, %s3572_s19 }
 0x74d   : >> { %3758 = vrsqrt.f32 %v2754_v45 }
 0x75a   : >> { %v3759_v48 = vpop.eup %3758 }
 0x75b   : >> { %3595 = vpush %v3759_v48 }
 0x75c   : >> { %3597 = vpush %v2796_v47 }
 0x78c   : >> { %s3596_s22 = spop %3595 }
 0x78d   : >> { %v2757_v4 = vstv %s3596_s22  ;;  %s3598_s23 = spop %3597 }
 0x78e   : >> { %v2758_v24 = vmul.f32 %v2757_v4, %v5745_v11  ;;  %v2759_v36 = vmul.f32 %v2757_v4, %v5748_v31  ;;  %v2760_v14 = vmul.f32 %v2757_v4, %v5751_v40  ;;  %v2761_v46 = vmul.f32 %v2757_v4, %v5754_v49  ;;  %s2800_s12 = smul.f32 0.00012207031, %s3598_s23 }
 0x78f   : >> { %v2762_v9 = vmul.f32 %v2757_v4, %v5761_v23  ;;  %v2763_v20 = vmul.f32 %v2757_v4, %v5766_v1  ;;  %v2764_v53 = vmul.f32 %v2757_v4, %v5772_v38  ;;  %v2765_v54 = vmul.f32 %v2757_v4, %v5779_v43 }
 0x790   : >> { %v2922_v25 = vadd.f32 %v2758_v24, %v5563_v55  ;;  %v2923_v59 = vadd.f32 %v2759_v36, %v5566_v52  ;;  %v2924_v11 = vadd.f32 %v2760_v14, %v5569_v0  ;;  %v2925_v31 = vadd.f32 %v2761_v46, %v5572_v60 }
 0x791   : >> { %v2926_v40 = vadd.f32 %v2762_v9, %v5575_v18  ;;  %v2927_v49 = vadd.f32 %v2763_v20, %v5578_v29  ;;  %v2928_v23 = vadd.f32 %v2764_v53, %v5581_v30  ;;  %v2929_v1 = vadd.f32 %v2765_v54, %v5584_v50 }
 0x792   : >> { %v3502_v13 = vmul.f32 -1.442695, %v2922_v25  ;;  %v3503_v38 = vmul.f32 -1.442695, %v2923_v59  ;;  %v3504_v16 = vmul.f32 -1.442695, %v2924_v11  ;;  %v2801_v43 = vstv %s2800_s12 }
 0x793   : >> { %v3505_v34 = vmul.f32 -1.442695, %v2925_v31  ;;  %v5825_v55 = vsub.f32 %v5685_v33, %v2801_v43  ;;  %v3506_v52 = vmul.f32 -1.442695, %v2926_v40  ;;  %v5828_v0 = vsub.f32 %v5688_v26, %v2801_v43 }
 0x794   : >> { %3760 = vpow2.f32 %v3502_v13  ;;  %v3507_v60 = vmul.f32 -1.442695, %v2927_v49  ;;  %v5831_v18 = vsub.f32 %v5691_v7, %v2801_v43  ;;  %v3508_v29 = vmul.f32 -1.442695, %v2928_v23 }
 0x795   : >> { %3762 = vpow2.f32 %v3503_v38  ;;  %v3509_v30 = vmul.f32 -1.442695, %v2929_v1  ;;  %v5834_v50 = vsub.f32 %v5697_v41, %v2801_v43  ;;  %v2810_v33 = vmul.f32 %v5825_v55, %v5825_v55 }
 0x796   : >> { %3764 = vpow2.f32 %v3504_v16  ;;  %v2811_v21 = vmul.f32 %v5828_v0, %v5828_v0  ;;  %v5841_v26 = vsub.f32 %v5705_v27, %v2801_v43  ;;  %v2812_v7 = vmul.f32 %v5831_v18, %v5831_v18  ;;  %v3844_v16 = vld [vmem:[#allocation3] sm:$0xff] }
 0x797   : >> { %3766 = vpow2.f32 %v3505_v34  ;;  %v5846_v41 = vsub.f32 %v5712_v44, %v2801_v43  ;;  %v2813_v58 = vmul.f32 %v5834_v50, %v5834_v50  ;;  %v5851_v45 = vsub.f32 %v5719_v2, %v2801_v43 }
 0x798   : >> { %3768 = vpow2.f32 %v3506_v52  ;;  %v2818_v63 = vadd.f32 %v2811_v21, %v2810_v33  ;;  %v2814_v27 = vmul.f32 %v5841_v26, %v5841_v26  ;;  %v5856_v12 = vsub.f32 %v5723_v37, %v2801_v43  ;;  %v3845_v52 = vld [vmem:[#allocation3 + $0x18] sm:$0xff] }
 0x799   : >> { %3770 = vpow2.f32 %v3507_v60  ;;  %v2815_v35 = vmul.f32 %v5846_v41, %v5846_v41  ;;  %v2816_v47 = vmul.f32 %v5851_v45, %v5851_v45 }
 0x79a   : >> { %3772 = vpow2.f32 %v3508_v29  ;;  %v2819_v51 = vadd.f32 %v2818_v63, %v2812_v7  ;;  %v2817_v46 = vmul.f32 %v5856_v12, %v5856_v12  ;;  %v3847_v63 = vld [vmem:[#allocation3 + $0x20] sm:$0xff] }
 0x79b   : >> { %3774 = vpow2.f32 %v3509_v30  ;;  %v3846_v30 = vld [vmem:[#allocation3 + $0x10] sm:$0xff] }
 0x79c   : >> { %v2820_v57 = vadd.f32 %v2819_v51, %v2813_v58 }
 0x79e   : >> { %v2821_v48 = vadd.f32 %v2820_v57, %v2814_v27  ;;  %v3848_v57 = vld [vmem:[#allocation3 + $0x28] sm:$0xff] }
 0x7a0   : >> { %v2822_v4 = vadd.f32 %v2821_v48, %v2815_v35 }
 0x7a1   : >> { %v3761_v44 = vpop.eup %3760 }
 0x7a2   : >> { %v3763_v24 = vpop.eup %3762  ;;  %v2954_v36 = vadd.f32 1.0, %v3761_v44  ;;  %v2823_v9 = vadd.f32 %v2822_v4, %v2816_v47  ;;  %v3849_v47 = vld [vmem:[#allocation3 + $0x8] sm:$0xff] }
 0x7a3   : >> { %v3765_v2 = vpop.eup %3764  ;;  %v2955_v14 = vadd.f32 1.0, %v3763_v24 }
 0x7a4   : >> { %v3767_v20 = vpop.eup %3766  ;;  %v2956_v37 = vadd.f32 1.0, %v3765_v2  ;;  %3776 = vrcp.f32 %v2954_v36  ;;  %v2824_v25 = vadd.f32 %v2823_v9, %v2817_v46  ;;  %v3850_v2 = vld [vmem:[#allocation3 + $0x30] sm:$0xff]  ;;  %v3851_v46 = vld [vmem:[#allocation3 + $0x38] sm:$0xff] }
 0x7a5   : >> { %v3769_v53 = vpop.eup %3768  ;;  %v2957_v54 = vadd.f32 1.0, %v3767_v20  ;;  %3778 = vrcp.f32 %v2955_v14 }
 0x7a6   : >> { %v3771_v59 = vpop.eup %3770  ;;  %v2958_v11 = vadd.f32 1.0, %v3769_v53  ;;  %3780 = vrcp.f32 %v2956_v37  ;;  %2825 = vadd.xlane.f32.xlu0 %v2824_v25 }
 0x7a7   : >> { %v3773_v31 = vpop.eup %3772  ;;  %v2959_v40 = vadd.f32 1.0, %v3771_v59  ;;  %3782 = vrcp.f32 %v2957_v54 }
 0x7a8   : >> { %v3775_v49 = vpop.eup %3774  ;;  %3784 = vrcp.f32 %v2958_v11  ;;  %v2960_v23 = vadd.f32 1.0, %v3773_v31 }
 0x7a9   : >> { %v2961_v1 = vadd.f32 1.0, %v3775_v49  ;;  %3786 = vrcp.f32 %v2959_v40 }
 0x7aa   : >> { %3788 = vrcp.f32 %v2960_v23 }
 0x7ab   : >> { %3790 = vrcp.f32 %v2961_v1 }
 0x7b1   : >> { %v3777_v13 = vpop.eup %3776 }
 0x7b2   : >> { %v3779_v38 = vpop.eup %3778  ;;  %v2994_v43 = vmul.f32 %v3844_v16, %v3777_v13 }
 0x7b3   : >> { %v3781_v34 = vpop.eup %3780  ;;  %v2995_v60 = vmul.f32 %v3845_v52, %v3779_v38 }
 0x7b4   : >> { %v3783_v29 = vpop.eup %3782  ;;  %v2996_v33 = vmul.f32 %v3846_v30, %v3781_v34  ;;  %v5865_v21 = vadd.f32 %v5792_v3, %v2994_v43 }
 0x7b5   : >> { %v3785_v7 = vpop.eup %3784  ;;  %v2997_v58 = vmul.f32 %v3847_v63, %v3783_v29  ;;  %v5868_v51 = vadd.f32 %v5794_v8, %v2995_v60 }
 0x7b6   : >> { %v3787_v27 = vpop.eup %3786  ;;  %v2998_v35 = vmul.f32 %v3848_v57, %v3785_v7  ;;  %v5871_v48 = vadd.f32 %v5796_v5, %v2996_v33 }
 0x7b7   : >> { %v3789_v44 = vpop.eup %3788  ;;  %v2999_v4 = vmul.f32 %v3849_v47, %v3787_v27  ;;  %v5874_v24 = vadd.f32 %v5798_v22, %v2997_v58  ;;  %v3018_v3 = vadd.f32 %v5868_v51, %v5865_v21 }
 0x7b8   : >> { %v3791_v36 = vpop.eup %3790  ;;  %v3000_v14 = vmul.f32 %v3850_v2, %v3789_v44  ;;  %v5879_v8 = vadd.f32 %v5800_v28, %v2998_v35 }
 0x7b9   : >> { %v3001_v9 = vmul.f32 %v3851_v46, %v3791_v36  ;;  %v5882_v5 = vadd.f32 %v5802_v32, %v2999_v4  ;;  %v3019_v20 = vadd.f32 %v3018_v3, %v5871_v48 }
 0x7ba   : >> { %v5886_v37 = vadd.f32 %v5804_v10, %v3000_v14 }
 0x7bb   : >> { %v5889_v22 = vadd.f32 %v5806_v19, %v3001_v9  ;;  %v3020_v53 = vadd.f32 %v3019_v20, %v5874_v24 }
 0x7bd   : >> { %v3021_v54 = vadd.f32 %v3020_v53, %v5879_v8 }
 0x7bf   : >> { %v3022_v28 = vadd.f32 %v3021_v54, %v5882_v5 }
 0x7c1   : >> { %v3023_v25 = vadd.f32 %v3022_v28, %v5886_v37 }
 0x7c3   : >> { %v3024_v59 = vadd.f32 %v3023_v25, %v5889_v22 }
 0x7c5   : >> { %3025 = vadd.xlane.f32.xlu1 %v3024_v59 }
 0x82f   : >> { %v2826_v32 = vpop.xlane.xlu0 %2825 }
 0x830   : >> { %v2827_v11 = vrot.slane %v2826_v32, 4 }
 0x832   : >> { %v2828_v31 = vadd.f32 %v2827_v11, %v2826_v32 }
 0x834   : >> { %v2829_v40 = vrot.slane %v2828_v31, 2 }
 0x836   : >> { %v2830_v10 = vadd.f32 %v2829_v40, %v2828_v31 }
 0x838   : >> { %v2831_v49 = vrot.slane %v2830_v10, 1 }
 0x83a   : >> { %v2832_v23 = vadd.f32 %v2831_v49, %v2830_v10 }
 0x83c   : >> { %3599 = vpush %v2832_v23 }
 0x84e   : >> { %v3026_v19 = vpop.xlane.xlu1 %3025 }
 0x84f   : >> { %v3027_v1 = vrot.slane %v3026_v19, 4 }
 0x851   : >> { %v3028_v13 = vadd.f32 %v3027_v1, %v3026_v19 }
 0x853   : >> { %v3029_v16 = vrot.slane %v3028_v13, 2 }
 0x855   : >> { %v3030_v43 = vadd.f32 %v3029_v16, %v3028_v13 }
 0x857   : >> { %v3031_v34 = vrot.slane %v3030_v43, 1 }
 0x859   : >> { %v3032_v60 = vadd.f32 %v3031_v34, %v3030_v43 }
 0x86d   : >> { %s3600_s25 = spop %3599 }
 0x86e   : >> { %s2836_s26 = smul.f32 0.00012207031, %s3600_s25 }
 0x870   : >> { %s2837_s10 = sadd.f32 1e-05, %s2836_s26 }
 0x872   : >> { %v2838_v38 = vstv %s2837_s10 }
 0x873   : >> { %3792 = vrsqrt.f32 %v2838_v38 }
 0x880   : >> { %v3793_v52 = vpop.eup %3792 }
 0x881   : >> { %3601 = vpush %v3793_v52 }
 0x882   : >> { %3603 = vpush %v3032_v60 }
 0x8b2   : >> { %s3602_s11 = spop %3601 }
 0x8b3   : >> { %v2841_v29 = vstv %s3602_s11  ;;  %s3604_s14 = spop %3603 }
 0x8b4   : >> { %v2842_v30 = vmul.f32 %v2841_v29, %v5825_v55  ;;  %v2843_v33 = vmul.f32 %v2841_v29, %v5828_v0  ;;  %v2844_v7 = vmul.f32 %v2841_v29, %v5831_v18  ;;  %v2845_v63 = vmul.f32 %v2841_v29, %v5834_v50  ;;  %s3036_s15 = smul.f32 0.00012207031, %s3604_s14 }
 0x8b5   : >> { %v2846_v58 = vmul.f32 %v2841_v29, %v5841_v26  ;;  %v2847_v27 = vmul.f32 %v2841_v29, %v5846_v41  ;;  %v2848_v57 = vmul.f32 %v2841_v29, %v5851_v45  ;;  %v2849_v35 = vmul.f32 %v2841_v29, %v5856_v12 }
 0x8b6   : >> { %v3094_v44 = vadd.f32 %v2842_v30, %v5653_v15  ;;  %v3095_v47 = vadd.f32 %v2843_v33, %v5656_v6  ;;  %v3096_v55 = vadd.f32 %v2844_v7, %v5659_v17  ;;  %v3097_v0 = vadd.f32 %v2845_v63, %v5662_v61 }
 0x8b7   : >> { %v3098_v18 = vadd.f32 %v2846_v58, %v5664_v39  ;;  %v3099_v50 = vadd.f32 %v2847_v27, %v5666_v62  ;;  %v3100_v26 = vadd.f32 %v2848_v57, %v5668_v42  ;;  %v3101_v41 = vadd.f32 %v2849_v35, %v5670_v56 }
 0x8b8   : >> { %v3037_v4 = vstv %s3036_s15  ;;  %v3510_v31 = vmul.f32 -1.442695, %v3094_v44  ;;  %v3511_v40 = vmul.f32 -1.442695, %v3095_v47  ;;  %v3512_v10 = vmul.f32 -1.442695, %v3096_v55 }
 0x8b9   : >> { %v5913_v45 = vsub.f32 %v5865_v21, %v3037_v4  ;;  %v5916_v15 = vsub.f32 %v5868_v51, %v3037_v4  ;;  %v5919_v6 = vsub.f32 %v5871_v48, %v3037_v4  ;;  %v5922_v17 = vsub.f32 %v5874_v24, %v3037_v4 }
 0x8ba   : >> { %v5929_v62 = vsub.f32 %v5879_v8, %v3037_v4  ;;  %v5934_v12 = vsub.f32 %v5882_v5, %v3037_v4  ;;  %v5939_v48 = vsub.f32 %v5886_v37, %v3037_v4  ;;  %v5944_v36 = vsub.f32 %v5889_v22, %v3037_v4 }
 0x8bb   : >> { %v3046_v61 = vmul.f32 %v5913_v45, %v5913_v45  ;;  %v3047_v39 = vmul.f32 %v5916_v15, %v5916_v15  ;;  %v3048_v42 = vmul.f32 %v5919_v6, %v5919_v6  ;;  %v3049_v21 = vmul.f32 %v5922_v17, %v5922_v17 }
 0x8bc   : >> { %v3050_v24 = vmul.f32 %v5929_v62, %v5929_v62  ;;  %v3051_v2 = vmul.f32 %v5934_v12, %v5934_v12  ;;  %v3052_v8 = vmul.f32 %v5939_v48, %v5939_v48  ;;  %v3053_v9 = vmul.f32 %v5944_v36, %v5944_v36 }
 0x8bd   : >> { %v3054_v56 = vadd.f32 %v3047_v39, %v3046_v61  ;;  %v3513_v49 = vmul.f32 -1.442695, %v3097_v0  ;;  %v3514_v23 = vmul.f32 -1.442695, %v3098_v18  ;;  %v3515_v19 = vmul.f32 -1.442695, %v3099_v50 }
 0x8be   : >> { %v3516_v1 = vmul.f32 -1.442695, %v3100_v26  ;;  %v3517_v13 = vmul.f32 -1.442695, %v3101_v41 }
 0x8bf   : >> { %v3055_v51 = vadd.f32 %v3054_v56, %v3048_v42 }
 0x8c1   : >> { %v3056_v3 = vadd.f32 %v3055_v51, %v3049_v21 }
 0x8c3   : >> { %v3057_v14 = vadd.f32 %v3056_v3, %v3050_v24 }
 0x8c5   : >> { %v3058_v46 = vadd.f32 %v3057_v14, %v3051_v2 }
 0x8c7   : >> { %v3059_v5 = vadd.f32 %v3058_v46, %v3052_v8 }
 0x8c9   : >> { %v3060_v20 = vadd.f32 %v3059_v5, %v3053_v9 }
 0x8cb   : >> { %3061 = vadd.xlane.f32.xlu0 %v3060_v20 }
 0x954   : >> { %v3062_v37 = vpop.xlane.xlu0 %3061 }
 0x955   : >> { %v3063_v53 = vrot.slane %v3062_v37, 4 }
 0x957   : >> { %v3064_v54 = vadd.f32 %v3063_v53, %v3062_v37 }
 0x959   : >> { %v3065_v28 = vrot.slane %v3064_v54, 2 }
 0x95b   : >> { %v3066_v22 = vadd.f32 %v3065_v28, %v3064_v54 }
 0x95d   : >> { %v3067_v25 = vrot.slane %v3066_v22, 1 }
 0x95f   : >> { %v3068_v59 = vadd.f32 %v3067_v25, %v3066_v22 }
 0x961   : >> { %3605 = vpush %v3068_v59 }
 0x992   : >> { %s3606_s16 = spop %3605 }
 0x993   : >> { %s3072_s17 = smul.f32 0.00012207031, %s3606_s16 }
 0x995   : >> { %s3073_s13 = sadd.f32 1e-05, %s3072_s17 }
 0x997   : >> { %v3074_v32 = vstv %s3073_s13 }
 0x998   : >> { %3794 = vrsqrt.f32 %v3074_v32 }
 0x999   : >> { %3796 = vpow2.f32 %v3510_v31 }
 0x99a   : >> { %3798 = vpow2.f32 %v3511_v40 }
 0x99b   : >> { %3800 = vpow2.f32 %v3512_v10 }
 0x99c   : >> { %3802 = vpow2.f32 %v3513_v49 }
 0x99d   : >> { %3804 = vpow2.f32 %v3514_v23 }
 0x99e   : >> { %3806 = vpow2.f32 %v3515_v19 }
 0x99f   : >> { %3808 = vpow2.f32 %v3516_v1 }
 0x9a0   : >> { %3810 = vpow2.f32 %v3517_v13 }
 0x9a5   : >> { %v3795_v11 = vpop.eup %3794 }
 0x9a6   : >> { %3607 = vpush %v3795_v11  ;;  %v3797_v38 = vpop.eup %3796 }
 0x9a7   : >> { %v3799_v16 = vpop.eup %3798  ;;  %v3126_v52 = vadd.f32 1.0, %v3797_v38 }
 0x9a8   : >> { %v3801_v43 = vpop.eup %3800  ;;  %v3127_v29 = vadd.f32 1.0, %v3799_v16 }
 0x9a9   : >> { %v3803_v34 = vpop.eup %3802  ;;  %v3128_v33 = vadd.f32 1.0, %v3801_v43  ;;  %3812 = vrcp.f32 %v3126_v52 }
 0x9aa   : >> { %v3805_v60 = vpop.eup %3804  ;;  %v3129_v63 = vadd.f32 1.0, %v3803_v34  ;;  %3814 = vrcp.f32 %v3127_v29 }
 0x9ab   : >> { %v3807_v30 = vpop.eup %3806  ;;  %v3130_v27 = vadd.f32 1.0, %v3805_v60  ;;  %3816 = vrcp.f32 %v3128_v33 }
 0x9ac   : >> { %v3809_v7 = vpop.eup %3808  ;;  %v3131_v57 = vadd.f32 1.0, %v3807_v30  ;;  %3818 = vrcp.f32 %v3129_v63 }
 0x9ad   : >> { %v3811_v58 = vpop.eup %3810  ;;  %v3132_v35 = vadd.f32 1.0, %v3809_v7  ;;  %3820 = vrcp.f32 %v3130_v27 }
 0x9ae   : >> { %v3133_v44 = vadd.f32 1.0, %v3811_v58  ;;  %3822 = vrcp.f32 %v3131_v57 }
 0x9af   : >> { %3824 = vrcp.f32 %v3132_v35 }
 0x9b0   : >> { %3826 = vrcp.f32 %v3133_v44 }
 0x9d7   : >> { %s3608_s18 = spop %3607 }
 0x9d8   : >> { %v3077_v47 = vstv %s3608_s18 }
 0x9d9   : >> { %v5953_v55 = vmul.f32 %v3077_v47, %v5913_v45  ;;  %v5956_v0 = vmul.f32 %v3077_v47, %v5916_v15  ;;  %v5959_v18 = vmul.f32 %v3077_v47, %v5919_v6  ;;  %v5962_v50 = vmul.f32 %v3077_v47, %v5922_v17  ;;  %v3813_v15 = vpop.eup %3812 }
 0x9da   : >> { %v5965_v26 = vmul.f32 %v3077_v47, %v5929_v62  ;;  %v5968_v41 = vmul.f32 %v3077_v47, %v5934_v12  ;;  %v5971_v4 = vmul.f32 %v3077_v47, %v5939_v48  ;;  %v5974_v45 = vmul.f32 %v3077_v47, %v5944_v36  ;;  %v3815_v6 = vpop.eup %3814 }
 0x9db   : >> { %3828 = vtanh.f32 %v5953_v55  ;;  %3174 = vst [vmem:[#allocation3] sm:$0xff] %v5953_v55  ;;  %3175 = vst [vmem:[#allocation3 + $0x18] sm:$0xff] %v5956_v0  ;;  %v3817_v17 = vpop.eup %3816 }
 0x9dc   : >> { %3176 = vst [vmem:[#allocation3 + $0x10] sm:$0xff] %v5959_v18  ;;  %3177 = vst [vmem:[#allocation3 + $0x20] sm:$0xff] %v5962_v50  ;;  %3830 = vtanh.f32 %v5956_v0  ;;  %v3819_v61 = vpop.eup %3818 }
 0x9dd   : >> { %3178 = vst [vmem:[#allocation3 + $0x28] sm:$0xff] %v5965_v26  ;;  %3179 = vst [vmem:[#allocation3 + $0x8] sm:$0xff] %v5968_v41  ;;  %3832 = vtanh.f32 %v5959_v18  ;;  %v3821_v39 = vpop.eup %3820 }
 0x9de   : >> { %3180 = vst [vmem:[#allocation3 + $0x30] sm:$0xff] %v5971_v4  ;;  %3181 = vst [vmem:[#allocation3 + $0x38] sm:$0xff] %v5974_v45  ;;  %3834 = vtanh.f32 %v5962_v50  ;;  %v3823_v62 = vpop.eup %3822 }
 0x9df   : >> { %3836 = vtanh.f32 %v5965_v26  ;;  %v3825_v42 = vpop.eup %3824 }
 0x9e0   : >> { %3838 = vtanh.f32 %v5968_v41  ;;  %v3827_v56 = vpop.eup %3826 }
 0x9e1   : >> { %3840 = vtanh.f32 %v5971_v4 }
 0x9e2   : >> { %3842 = vtanh.f32 %v5974_v45 }
 0x9e8   : >> { %v3829_v12 = vpop.eup %3828 }
 0x9e9   : >> { %v3831_v21 = vpop.eup %3830  ;;  %v3158_v51 = vmul.f32 %v3829_v12, %v3813_v15 }
 0x9ea   : >> { %v3833_v48 = vpop.eup %3832  ;;  %v3159_v24 = vmul.f32 %v3831_v21, %v3815_v6 }
 0x9eb   : >> { %v3835_v3 = vpop.eup %3834  ;;  %v3160_v36 = vmul.f32 %v3833_v48, %v3817_v17  ;;  %3166 = vst [vmem:[#allocation2 + $0x30] sm:$0xff] %v3158_v51  ;;  %3185 = vst [vmem:[%s5994_s20] sm:$0xff] %v3158_v51 }
 0x9ec   : >> { %v3837_v2 = vpop.eup %3836  ;;  %v3161_v14 = vmul.f32 %v3835_v3, %v3819_v61  ;;  %3167 = vst [vmem:[#allocation2] sm:$0xff] %v3159_v24  ;;  %3186 = vst [vmem:[%s5994_s20 + $0x8] sm:$0xff] %v3159_v24 }
 0x9ed   : >> { %v3839_v8 = vpop.eup %3838  ;;  %v3162_v46 = vmul.f32 %v3837_v2, %v3821_v39  ;;  %3168 = vst [vmem:[#allocation2 + $0x18] sm:$0xff] %v3160_v36  ;;  %3187 = vst [vmem:[%s5994_s20 + $0x10] sm:$0xff] %v3160_v36 }
 0x9ee   : >> { %v3841_v9 = vpop.eup %3840  ;;  %v3163_v5 = vmul.f32 %v3839_v8, %v3823_v62  ;;  %3169 = vst [vmem:[#allocation2 + $0x10] sm:$0xff] %v3161_v14  ;;  %3188 = vst [vmem:[%s5994_s20 + $0x18] sm:$0xff] %v3161_v14  ;;  %3196 = sbr.rel (%p3520_p6) target bundleno = 2551 (0x9f7), region = 67 }
 0x9ef   : >> { %v3843_v20 = vpop.eup %3842  ;;  %v3164_v37 = vmul.f32 %v3841_v9, %v3825_v42  ;;  %3170 = vst [vmem:[#allocation2 + $0x8] sm:$0xff] %v3162_v46  ;;  %3189 = vst [vmem:[%s5994_s20 + $0x20] sm:$0xff] %v3162_v46 }
 0x9f0   : >> { %v3165_v53 = vmul.f32 %v3843_v20, %v3827_v56  ;;  %3171 = vst [vmem:[#allocation2 + $0x20] sm:$0xff] %v3163_v5  ;;  %3190 = vst [vmem:[%s5994_s20 + $0x28] sm:$0xff] %v3163_v5 }
 0x9f1   : >> { %3172 = vst [vmem:[#allocation2 + $0x28] sm:$0xff] %v3164_v37  ;;  %3191 = vst [vmem:[%s5994_s20 + $0x30] sm:$0xff] %v3164_v37 }
 0x9f2   : >> { %3173 = vst [vmem:[#allocation2 + $0x38] sm:$0xff] %v3165_v53  ;;  %3192 = vst [vmem:[%s5994_s20 + $0x38] sm:$0xff] %v3165_v53 }
 0x9f3   : >> { %3197 = vst [vmem:[%s4058_s9] sm:$0xff] %v5953_v55  ;;  %3198 = vst [vmem:[%s4058_s9 + $0x8] sm:$0xff] %v5956_v0 }
 0x9f4   : >> { %3199 = vst [vmem:[%s4058_s9 + $0x10] sm:$0xff] %v5959_v18  ;;  %3200 = vst [vmem:[%s4058_s9 + $0x18] sm:$0xff] %v5962_v50 }
 0x9f5   : >> { %3201 = vst [vmem:[%s4058_s9 + $0x20] sm:$0xff] %v5965_v26  ;;  %3202 = vst [vmem:[%s4058_s9 + $0x28] sm:$0xff] %v5968_v41 }
 0x9f6   : >> { %3203 = vst [vmem:[%s4058_s9 + $0x30] sm:$0xff] %v5971_v4  ;;  %3204 = vst [vmem:[%s4058_s9 + $0x38] sm:$0xff] %v5974_v45 }
 0x9f7 PF: >> { %s465_s27 = sadd.s32 1, %s3918_s27  }
 0x9f8   : >> { %p462_p7 = scmp.ge.s32.totalorder %s465_s27, 8  }
 0x9fa   : > { %464 = sbr.rel (!%p462_p7) target bundleno = 43 (0x2b), region = 111 }
 0x9ff PF: > { %s19_s29 = sadd.s32 1, %s3914_s29   ;;  %s6250_s27 = smov %s3910_s28 }
 0xa00   : > { %p16_p8 = scmp.ge.s32.totalorder %s19_s29, 4   ;;  %s6251_s28 = smov %s6253_s30 }
 0xa02   :  { %18 = sbr.rel (!%p16_p8) target bundleno = 2 (0x2), region = 122 }

</bundles_post_ra>
